<compile_context>
chip_gen: v5e
topology: v5e:2x2
jax: 0.10.0
libtpu: 0.0.40
codegen_flags: <defaults>
</compile_context>

<pallas_src>
import numpy as np

import jax
import jax.numpy as jnp
from jax.experimental import pallas as pl
from jax.experimental.pallas import tpu as pltpu


# ----------------------------- Pallas kernel --------------------------------

def gconv_stack_kernel(eidx_col_ref, eidx_row_ref, obj_in_ref, pred_in_ref,
                       w1_ref, b1_ref, w1b_ref, b1b_ref,
                       w2a_ref, b2a_ref, w2b_ref, b2b_ref,
                       new_obj_ref, new_pred_ref):
    """All GraphTripleConv layers in one kernel invocation (grid=(1,))."""
    f32 = jnp.float32
    O, D = obj_in_ref.shape
    T = pred_in_ref.shape[0]
    L = w1_ref.shape[0]
    H = w2a_ref.shape[2]

    # ---- one-time setup: stacked one-hot gather matrix, its transpose, and
    #      the 'avg' pooling normalizer (edges never change between layers).
    lane = jax.lax.broadcasted_iota(jnp.int32, (2 * T, O), 1)
    g = (lane == eidx_col_ref[...]).astype(f32)               # (2T, O) = [s_oh; o_oh]
    sub = jax.lax.broadcasted_iota(jnp.int32, (O, 2 * T), 0)
    gT = (sub == eidx_row_ref[...]).astype(f32)               # (O, 2T)

    counts = jnp.sum(gT, axis=1, keepdims=True)               # (O, 1) edge count / obj
    invc = jnp.broadcast_to(1.0 / jnp.maximum(counts, 1.0), (O, H))   # broadcast once

    def layer(l, carry):
        obj, pred = carry                                      # (O, D), (T, D)

        # gather: [obj[s_idx]; obj[o_idx]] in ONE one-hot matmul (exact)
        both = jnp.dot(g, obj, preferred_element_type=f32)     # (2T, D)
        cur_s = both[:T]
        cur_o = both[T:]

        # net1 layer 1: single K=3D matmul on lane-concatenated triple, ReLU
        x = jnp.concatenate([cur_s, pred, cur_o], axis=1)      # (T, 3D)
        h1 = jnp.maximum(jnp.dot(x, w1_ref[l], preferred_element_type=f32)
                         + b1_ref[l], 0.0)                     # (T, H)

        # net1 layer 2: one wide matmul (N = 2H + D), ReLU, lane-aligned slices
        t = jnp.maximum(jnp.dot(h1, w1b_ref[l], preferred_element_type=f32)
                        + b1b_ref[l], 0.0)                     # (T, 2H + D)
        new_p = t[:, H:H + D]                                  # (T, D)

        # scatter-add pooling over objects: ONE plain matmul on the stacked
        # [new_s; new_o] block, then 'avg' normalization (pre-broadcast invc).
        sv = jnp.concatenate([t[:, :H], t[:, H + D:]], axis=0)  # (2T, H)
        pooled = jnp.dot(gT, sv, preferred_element_type=f32) * invc   # (O, H)

        # net2: Linear -> ReLU -> Linear -> ReLU
        h2 = jnp.maximum(jnp.dot(pooled, w2a_ref[l], preferred_element_type=f32)
                         + b2a_ref[l], 0.0)
        new_obj = jnp.maximum(jnp.dot(h2, w2b_ref[l], preferred_element_type=f32)
                              + b2b_ref[l], 0.0)               # (O, D)
        return new_obj, new_p

    obj, pred = jax.lax.fori_loop(0, L, layer,
                                  (obj_in_ref[...], pred_in_ref[...]),
                                  unroll=True)

    # single write-back at the very end of the stack
    new_obj_ref[...] = obj
    new_pred_ref[...] = pred


# ------------------------------ wrapper --------------------------------------

def graph_triple_conv_net(obj_vecs, pred_vecs, edges, stacked, num_layers):
    """Run the whole layer stack in one pallas_call, one grid step."""
    O, D = obj_vecs.shape
    T = pred_vecs.shape[0]

    s_idx = edges[:, 0].astype(jnp.int32)
    o_idx = edges[:, 1].astype(jnp.int32)
    eidx = jnp.concatenate([s_idx, o_idx])          # (2T,)
    eidx_col = eidx.reshape(2 * T, 1)               # for lane-iota one-hot
    eidx_row = eidx.reshape(1, 2 * T)               # for sublane-iota one-hot (no transpose in-kernel)

    def full(shape):
        nd = len(shape)
        # whole-array block, constant index -> DMA'd once, VMEM-resident
        return pl.BlockSpec(shape, lambda l, nd=nd: (0,) * nd)

    in_specs = [
        full((2 * T, 1)), full((1, 2 * T)),                 # edge indices
        full((O, D)), full((T, D)),                         # obj_vecs, pred_vecs
        full(stacked['w1'].shape), full(stacked['b1'].shape),     # net1 Linear(3D, H)
        full(stacked['w1b'].shape), full(stacked['b1b'].shape),   # net1 Linear(H, 2H+D)
        full(stacked['w2a'].shape), full(stacked['b2a'].shape),   # net2 Linear(H, H)
        full(stacked['w2b'].shape), full(stacked['b2b'].shape),   # net2 Linear(H, D)
    ]
    out_specs = (pl.BlockSpec((O, D), lambda l: (0, 0)),
                 pl.BlockSpec((T, D), lambda l: (0, 0)))

    new_obj, new_pred = pl.pallas_call(
        gconv_stack_kernel,
        out_shape=(jax.ShapeDtypeStruct((O, D), jnp.float32),
                   jax.ShapeDtypeStruct((T, D), jnp.float32)),
        grid=(1,),
        in_specs=in_specs,
        out_specs=out_specs,
        compiler_params=pltpu.CompilerParams(
            dimension_semantics=("arbitrary",),   # single sequential step
        ),
    )(eidx_col, eidx_row, obj_vecs, pred_vecs,
      stacked['w1'], stacked['b1'], stacked['w1b'], stacked['b1b'],
      stacked['w2a'], stacked['b2a'], stacked['w2b'], stacked['b2b'])
    return new_obj, new_pred


# ------------------------- parameter initialization --------------------------

def _kaiming(key, fan_in, fan_out):
    # nn.init.kaiming_normal_ default: gain=sqrt(2), std = gain / sqrt(fan_in)
    return jax.random.normal(key, (fan_in, fan_out), jnp.float32) * np.sqrt(2.0 / fan_in)


def _bias(key, fan_in, fan_out):
    bound = 1.0 / np.sqrt(fan_in)
    return jax.random.uniform(key, (1, fan_out), jnp.float32, -bound, bound)


def init_layer_params(key, D, H):
    """One GraphTripleConv layer (output_dim == input_dim, as in the module)."""
    ks = jax.random.split(key, 8)
    W1 = _kaiming(ks[0], 3 * D, H)            # Linear(3*Din, H)
    b1 = _bias(ks[1], 3 * D, H)
    W1b = _kaiming(ks[2], H, 2 * H + D)       # Linear(H, 2H + Dout)
    b1b = _bias(ks[3], H, 2 * H + D)
    W2a = _kaiming(ks[4], H, H)               # Linear(H, H)
    b2a = _bias(ks[5], H, H)
    W2b = _kaiming(ks[6], H, D)               # Linear(H, Dout)
    b2b = _bias(ks[7], H, D)
    return dict(w1=W1, b1=b1, w1b=W1b, b1b=b1b,
                w2a=W2a, b2a=b2a, w2b=W2b, b2b=b2b)


def stack_layer_params(layer_params):
    return {k: jnp.stack([p[k] for p in layer_params], axis=0)
            for k in layer_params[0]}


# --------------------------- pure-JAX reference ------------------------------

def gconv_layer_ref(obj_vecs, pred_vecs, edges, p):
    hp = "highest"  # true-f32 matmuls so the reference matches kernel precision
    s_idx = edges[:, 0]
    o_idx = edges[:, 1]
    cur_s = obj_vecs[s_idx]
    cur_o = obj_vecs[o_idx]
    x = jnp.concatenate([cur_s, pred_vecs, cur_o], axis=1)
    h1 = jnp.maximum(jnp.dot(x, p['w1'], precision=hp) + p['b1'], 0.0)
    t = jnp.maximum(jnp.dot(h1, p['w1b'], precision=hp) + p['b1b'], 0.0)
    H = p['w2a'].shape[0]
    D = p['w2b'].shape[1]
    new_s, new_p, new_o = t[:, :H], t[:, H:H + D], t[:, H + D:]
    O = obj_vecs.shape[0]
    pooled = jnp.zeros((O, H), jnp.float32).at[s_idx].add(new_s).at[o_idx].add(new_o)
    counts = jnp.zeros((O,), jnp.float32).at[s_idx].add(1.0).at[o_idx].add(1.0)
    counts = jnp.maximum(counts, 1.0)
    pooled = pooled / counts[:, None]
    h2 = jnp.maximum(jnp.dot(pooled, p['w2a'], precision=hp) + p['b2a'], 0.0)
    new_obj = jnp.maximum(jnp.dot(h2, p['w2b'], precision=hp) + p['b2b'], 0.0)
    return new_obj, new_p


# ---------------------------------- main -------------------------------------

if __name__ == "__main__":
    key = jax.random.PRNGKey(0)
    # Small but lane-dense shapes: Din = H = Dout = 128 (multiples of 128).
    O, T, D, H, num_layers = 32, 64, 128, 128, 3

    k_obj, k_pred, k_edge, k_param = jax.random.split(key, 4)
    obj_vecs = jax.random.normal(k_obj, (O, D), jnp.float32)
    pred_vecs = jax.random.normal(k_pred, (T, D), jnp.float32)
    edges = jax.random.randint(k_edge, (T, 2), 0, O, jnp.int32)

    layer_params = [init_layer_params(jax.random.fold_in(k_param, i), D, H)
                    for i in range(num_layers)]
    stacked = stack_layer_params(layer_params)

    out_obj, out_pred = graph_triple_conv_net(obj_vecs, pred_vecs, edges,
                                              stacked, num_layers)
    jax.block_until_ready((out_obj, out_pred))

    # reference check (pure JAX, layer by layer)
    ref_obj, ref_pred = obj_vecs, pred_vecs
    for p in layer_params:
        ref_obj, ref_pred = gconv_layer_ref(ref_obj, ref_pred, edges, p)

    np.testing.assert_allclose(np.asarray(out_obj), np.asarray(ref_obj),
                               rtol=1e-4, atol=1e-4)
    np.testing.assert_allclose(np.asarray(out_pred), np.asarray(ref_pred),
                               rtol=1e-4, atol=1e-4)
    print("KERNEL_OK")
</pallas_src>

<mosaic_0001>
module attributes {stable_mosaic.version = 11 : i64} {
  func.func @gconv_stack_kernel(%arg0: i32, %arg1: memref<128x1xi32, #tpu.memory_space<vmem>>, %arg2: memref<1x128xi32, #tpu.memory_space<vmem>>, %arg3: memref<32x128xf32, #tpu.memory_space<vmem>>, %arg4: memref<64x128xf32, #tpu.memory_space<vmem>>, %arg5: memref<3x384x128xf32, #tpu.memory_space<vmem>>, %arg6: memref<3x1x128xf32, #tpu.memory_space<vmem>>, %arg7: memref<3x128x384xf32, #tpu.memory_space<vmem>>, %arg8: memref<3x1x384xf32, #tpu.memory_space<vmem>>, %arg9: memref<3x128x128xf32, #tpu.memory_space<vmem>>, %arg10: memref<3x1x128xf32, #tpu.memory_space<vmem>>, %arg11: memref<3x128x128xf32, #tpu.memory_space<vmem>>, %arg12: memref<3x1x128xf32, #tpu.memory_space<vmem>>, %arg13: memref<32x128xf32, #tpu.memory_space<vmem>>, %arg14: memref<64x128xf32, #tpu.memory_space<vmem>>) attributes {dimension_semantics = [#tpu.dimension_semantics<arbitrary>], iteration_bounds = array<i64: 1>, scalar_prefetch = 0 : i64, scratch_operands = 0 : i64, tpu.core_type = #tpu.core_type<tc>, window_params = [{pipeline_mode = #tpu.pipeline_mode<synchronous>, transform_indices = @transform_0, window_bounds = array<i64: 128, 1>}, {pipeline_mode = #tpu.pipeline_mode<synchronous>, transform_indices = @transform_1, window_bounds = array<i64: 1, 128>}, {pipeline_mode = #tpu.pipeline_mode<synchronous>, transform_indices = @transform_2, window_bounds = array<i64: 32, 128>}, {pipeline_mode = #tpu.pipeline_mode<synchronous>, transform_indices = @transform_3, window_bounds = array<i64: 64, 128>}, {pipeline_mode = #tpu.pipeline_mode<synchronous>, transform_indices = @transform_4, window_bounds = array<i64: 3, 384, 128>}, {pipeline_mode = #tpu.pipeline_mode<synchronous>, transform_indices = @transform_5, window_bounds = array<i64: 3, 1, 128>}, {pipeline_mode = #tpu.pipeline_mode<synchronous>, transform_indices = @transform_6, window_bounds = array<i64: 3, 128, 384>}, {pipeline_mode = #tpu.pipeline_mode<synchronous>, transform_indices = @transform_7, window_bounds = array<i64: 3, 1, 384>}, {pipeline_mode = #tpu.pipeline_mode<synchronous>, transform_indices = @transform_8, window_bounds = array<i64: 3, 128, 128>}, {pipeline_mode = #tpu.pipeline_mode<synchronous>, transform_indices = @transform_9, window_bounds = array<i64: 3, 1, 128>}, {pipeline_mode = #tpu.pipeline_mode<synchronous>, transform_indices = @transform_10, window_bounds = array<i64: 3, 128, 128>}, {pipeline_mode = #tpu.pipeline_mode<synchronous>, transform_indices = @transform_11, window_bounds = array<i64: 3, 1, 128>}, {pipeline_mode = #tpu.pipeline_mode<synchronous>, transform_indices = @transform_12, window_bounds = array<i64: 32, 128>}, {pipeline_mode = #tpu.pipeline_mode<synchronous>, transform_indices = @transform_13, window_bounds = array<i64: 64, 128>}]} {
    %0 = tpu.iota {dimensions = array<i32: 1>} : vector<128x32xi32>
    %c0 = arith.constant 0 : index
    %c0_0 = arith.constant 0 : index
    %1 = vector.load %arg1[%c0, %c0_0] : memref<128x1xi32, #tpu.memory_space<vmem>>, vector<128x1xi32>
    %2 = vector.broadcast %1 : vector<128x1xi32> to vector<128x32xi32>
    %3 = arith.cmpi eq, %0, %2 : vector<128x32xi32>
    %4 = arith.extui %3 : vector<128x32xi1> to vector<128x32xi32>
    %5 = arith.sitofp %4 : vector<128x32xi32> to vector<128x32xf32>
    %6 = tpu.iota {dimensions = array<i32: 0>} : vector<32x128xi32>
    %c0_1 = arith.constant 0 : index
    %c0_2 = arith.constant 0 : index
    %7 = vector.load %arg2[%c0_1, %c0_2] : memref<1x128xi32, #tpu.memory_space<vmem>>, vector<1x128xi32>
    %8 = vector.broadcast %7 : vector<1x128xi32> to vector<32x128xi32>
    %9 = arith.cmpi eq, %6, %8 : vector<32x128xi32>
    %10 = arith.extui %9 : vector<32x128xi1> to vector<32x128xi32>
    %11 = arith.sitofp %10 : vector<32x128xi32> to vector<32x128xf32>
    %cst = arith.constant dense<0.000000e+00> : vector<32xf32>
    %12 = vector.multi_reduction <add>, %11, %cst [1] : vector<32x128xf32> to vector<32xf32>
    %13 = vector.shape_cast %12 : vector<32xf32> to vector<32x1xf32>
    %cst_3 = arith.constant 1.000000e+00 : f32
    %14 = vector.broadcast %cst_3 : f32 to vector<32x1xf32>
    %15 = arith.maximumf %13, %14 : vector<32x1xf32>
    %cst_4 = arith.constant 1.000000e+00 : f32
    %16 = vector.broadcast %cst_4 : f32 to vector<32x1xf32>
    %17 = arith.divf %16, %15 : vector<32x1xf32>
    %18 = vector.shape_cast %17 : vector<32x1xf32> to vector<32x1xf32>
    %19 = vector.broadcast %18 : vector<32x1xf32> to vector<32x128xf32>
    %c0_5 = arith.constant 0 : index
    %c0_6 = arith.constant 0 : index
    %20 = vector.load %arg3[%c0_5, %c0_6] : memref<32x128xf32, #tpu.memory_space<vmem>>, vector<32x128xf32>
    %c0_7 = arith.constant 0 : index
    %c0_8 = arith.constant 0 : index
    %21 = vector.load %arg4[%c0_7, %c0_8] : memref<64x128xf32, #tpu.memory_space<vmem>>, vector<64x128xf32>
    %c0_i32 = arith.constant 0 : i32
    %cst_9 = arith.constant dense<0.000000e+00> : vector<128x128xf32>
    %22 = tpu.matmul %5, %20, %cst_9 {dimension_numbers = #tpu.dot_dimension_numbers<[1], [0], [0], [1], [0, 0, 1, 1], [], []>} : vector<128x32xf32>, vector<32x128xf32>, vector<128x128xf32> -> vector<128x128xf32>
    %23 = vector.extract_strided_slice %22 {offsets = [0, 0], sizes = [64, 128], strides = [1, 1]} : vector<128x128xf32> to vector<64x128xf32>
    %24 = vector.extract_strided_slice %22 {offsets = [64, 0], sizes = [64, 128], strides = [1, 1]} : vector<128x128xf32> to vector<64x128xf32>
    %25 = tpu.concatenate %23, %21, %24 in 1 : vector<64x128xf32>, vector<64x128xf32>, vector<64x128xf32> -> vector<64x384xf32>
    %26 = arith.index_cast %c0_i32 : i32 to index
    %c0_10 = arith.constant 0 : index
    %c0_11 = arith.constant 0 : index
    %27 = vector.load %arg5[%26, %c0_10, %c0_11] : memref<3x384x128xf32, #tpu.memory_space<vmem>>, vector<1x384x128xf32>
    %28 = vector.shape_cast %27 : vector<1x384x128xf32> to vector<384x128xf32>
    %cst_12 = arith.constant dense<0.000000e+00> : vector<64x128xf32>
    %29 = tpu.matmul %25, %28, %cst_12 {dimension_numbers = #tpu.dot_dimension_numbers<[1], [0], [0], [1], [0, 0, 1, 1], [], []>} : vector<64x384xf32>, vector<384x128xf32>, vector<64x128xf32> -> vector<64x128xf32>
    %30 = arith.index_cast %c0_i32 : i32 to index
    %c0_13 = arith.constant 0 : index
    %c0_14 = arith.constant 0 : index
    %31 = vector.load %arg6[%30, %c0_13, %c0_14] : memref<3x1x128xf32, #tpu.memory_space<vmem>>, vector<1x1x128xf32>
    %32 = vector.shape_cast %31 : vector<1x1x128xf32> to vector<1x128xf32>
    %33 = vector.broadcast %32 : vector<1x128xf32> to vector<64x128xf32>
    %34 = arith.addf %29, %33 : vector<64x128xf32>
    %cst_15 = arith.constant 0.000000e+00 : f32
    %35 = vector.broadcast %cst_15 : f32 to vector<64x128xf32>
    %36 = arith.maximumf %34, %35 : vector<64x128xf32>
    %37 = arith.index_cast %c0_i32 : i32 to index
    %c0_16 = arith.constant 0 : index
    %c0_17 = arith.constant 0 : index
    %38 = vector.load %arg7[%37, %c0_16, %c0_17] : memref<3x128x384xf32, #tpu.memory_space<vmem>>, vector<1x128x384xf32>
    %39 = vector.shape_cast %38 : vector<1x128x384xf32> to vector<128x384xf32>
    %cst_18 = arith.constant dense<0.000000e+00> : vector<64x384xf32>
    %40 = tpu.matmul %36, %39, %cst_18 {dimension_numbers = #tpu.dot_dimension_numbers<[1], [0], [0], [1], [0, 0, 1, 1], [], []>} : vector<64x128xf32>, vector<128x384xf32>, vector<64x384xf32> -> vector<64x384xf32>
    %41 = arith.index_cast %c0_i32 : i32 to index
    %c0_19 = arith.constant 0 : index
    %c0_20 = arith.constant 0 : index
    %42 = vector.load %arg8[%41, %c0_19, %c0_20] : memref<3x1x384xf32, #tpu.memory_space<vmem>>, vector<1x1x384xf32>
    %43 = vector.shape_cast %42 : vector<1x1x384xf32> to vector<1x384xf32>
    %44 = vector.broadcast %43 : vector<1x384xf32> to vector<64x384xf32>
    %45 = arith.addf %40, %44 : vector<64x384xf32>
    %cst_21 = arith.constant 0.000000e+00 : f32
    %46 = vector.broadcast %cst_21 : f32 to vector<64x384xf32>
    %47 = arith.maximumf %45, %46 : vector<64x384xf32>
    %48 = vector.extract_strided_slice %47 {offsets = [0, 128], sizes = [64, 128], strides = [1, 1]} : vector<64x384xf32> to vector<64x128xf32>
    %49 = vector.extract_strided_slice %47 {offsets = [0, 0], sizes = [64, 128], strides = [1, 1]} : vector<64x384xf32> to vector<64x128xf32>
    %50 = vector.extract_strided_slice %47 {offsets = [0, 256], sizes = [64, 128], strides = [1, 1]} : vector<64x384xf32> to vector<64x128xf32>
    %51 = tpu.concatenate %49, %50 in 0 : vector<64x128xf32>, vector<64x128xf32> -> vector<128x128xf32>
    %cst_22 = arith.constant dense<0.000000e+00> : vector<32x128xf32>
    %52 = tpu.matmul %11, %51, %cst_22 {dimension_numbers = #tpu.dot_dimension_numbers<[1], [0], [0], [1], [0, 0, 1, 1], [], []>} : vector<32x128xf32>, vector<128x128xf32>, vector<32x128xf32> -> vector<32x128xf32>
    %53 = arith.mulf %52, %19 : vector<32x128xf32>
    %54 = arith.index_cast %c0_i32 : i32 to index
    %c0_23 = arith.constant 0 : index
    %c0_24 = arith.constant 0 : index
    %55 = vector.load %arg9[%54, %c0_23, %c0_24] : memref<3x128x128xf32, #tpu.memory_space<vmem>>, vector<1x128x128xf32>
    %56 = vector.shape_cast %55 : vector<1x128x128xf32> to vector<128x128xf32>
    %cst_25 = arith.constant dense<0.000000e+00> : vector<32x128xf32>
    %57 = tpu.matmul %53, %56, %cst_25 {dimension_numbers = #tpu.dot_dimension_numbers<[1], [0], [0], [1], [0, 0, 1, 1], [], []>} : vector<32x128xf32>, vector<128x128xf32>, vector<32x128xf32> -> vector<32x128xf32>
    %58 = arith.index_cast %c0_i32 : i32 to index
    %c0_26 = arith.constant 0 : index
    %c0_27 = arith.constant 0 : index
    %59 = vector.load %arg10[%58, %c0_26, %c0_27] : memref<3x1x128xf32, #tpu.memory_space<vmem>>, vector<1x1x128xf32>
    %60 = vector.shape_cast %59 : vector<1x1x128xf32> to vector<1x128xf32>
    %61 = vector.broadcast %60 : vector<1x128xf32> to vector<32x128xf32>
    %62 = arith.addf %57, %61 : vector<32x128xf32>
    %cst_28 = arith.constant 0.000000e+00 : f32
    %63 = vector.broadcast %cst_28 : f32 to vector<32x128xf32>
    %64 = arith.maximumf %62, %63 : vector<32x128xf32>
    %65 = arith.index_cast %c0_i32 : i32 to index
    %c0_29 = arith.constant 0 : index
    %c0_30 = arith.constant 0 : index
    %66 = vector.load %arg11[%65, %c0_29, %c0_30] : memref<3x128x128xf32, #tpu.memory_space<vmem>>, vector<1x128x128xf32>
    %67 = vector.shape_cast %66 : vector<1x128x128xf32> to vector<128x128xf32>
    %cst_31 = arith.constant dense<0.000000e+00> : vector<32x128xf32>
    %68 = tpu.matmul %64, %67, %cst_31 {dimension_numbers = #tpu.dot_dimension_numbers<[1], [0], [0], [1], [0, 0, 1, 1], [], []>} : vector<32x128xf32>, vector<128x128xf32>, vector<32x128xf32> -> vector<32x128xf32>
    %69 = arith.index_cast %c0_i32 : i32 to index
    %c0_32 = arith.constant 0 : index
    %c0_33 = arith.constant 0 : index
    %70 = vector.load %arg12[%69, %c0_32, %c0_33] : memref<3x1x128xf32, #tpu.memory_space<vmem>>, vector<1x1x128xf32>
    %71 = vector.shape_cast %70 : vector<1x1x128xf32> to vector<1x128xf32>
    %72 = vector.broadcast %71 : vector<1x128xf32> to vector<32x128xf32>
    %73 = arith.addf %68, %72 : vector<32x128xf32>
    %cst_34 = arith.constant 0.000000e+00 : f32
    %74 = vector.broadcast %cst_34 : f32 to vector<32x128xf32>
    %75 = arith.maximumf %73, %74 : vector<32x128xf32>
    %c1_i32 = arith.constant 1 : i32
    %cst_35 = arith.constant dense<0.000000e+00> : vector<128x128xf32>
    %76 = tpu.matmul %5, %75, %cst_35 {dimension_numbers = #tpu.dot_dimension_numbers<[1], [0], [0], [1], [0, 0, 1, 1], [], []>} : vector<128x32xf32>, vector<32x128xf32>, vector<128x128xf32> -> vector<128x128xf32>
    %77 = vector.extract_strided_slice %76 {offsets = [0, 0], sizes = [64, 128], strides = [1, 1]} : vector<128x128xf32> to vector<64x128xf32>
    %78 = vector.extract_strided_slice %76 {offsets = [64, 0], sizes = [64, 128], strides = [1, 1]} : vector<128x128xf32> to vector<64x128xf32>
    %79 = tpu.concatenate %77, %48, %78 in 1 : vector<64x128xf32>, vector<64x128xf32>, vector<64x128xf32> -> vector<64x384xf32>
    %80 = arith.index_cast %c1_i32 : i32 to index
    %c0_36 = arith.constant 0 : index
    %c0_37 = arith.constant 0 : index
    %81 = vector.load %arg5[%80, %c0_36, %c0_37] : memref<3x384x128xf32, #tpu.memory_space<vmem>>, vector<1x384x128xf32>
    %82 = vector.shape_cast %81 : vector<1x384x128xf32> to vector<384x128xf32>
    %cst_38 = arith.constant dense<0.000000e+00> : vector<64x128xf32>
    %83 = tpu.matmul %79, %82, %cst_38 {dimension_numbers = #tpu.dot_dimension_numbers<[1], [0], [0], [1], [0, 0, 1, 1], [], []>} : vector<64x384xf32>, vector<384x128xf32>, vector<64x128xf32> -> vector<64x128xf32>
    %84 = arith.index_cast %c1_i32 : i32 to index
    %c0_39 = arith.constant 0 : index
    %c0_40 = arith.constant 0 : index
    %85 = vector.load %arg6[%84, %c0_39, %c0_40] : memref<3x1x128xf32, #tpu.memory_space<vmem>>, vector<1x1x128xf32>
    %86 = vector.shape_cast %85 : vector<1x1x128xf32> to vector<1x128xf32>
    %87 = vector.broadcast %86 : vector<1x128xf32> to vector<64x128xf32>
    %88 = arith.addf %83, %87 : vector<64x128xf32>
    %cst_41 = arith.constant 0.000000e+00 : f32
    %89 = vector.broadcast %cst_41 : f32 to vector<64x128xf32>
    %90 = arith.maximumf %88, %89 : vector<64x128xf32>
    %91 = arith.index_cast %c1_i32 : i32 to index
    %c0_42 = arith.constant 0 : index
    %c0_43 = arith.constant 0 : index
    %92 = vector.load %arg7[%91, %c0_42, %c0_43] : memref<3x128x384xf32, #tpu.memory_space<vmem>>, vector<1x128x384xf32>
    %93 = vector.shape_cast %92 : vector<1x128x384xf32> to vector<128x384xf32>
    %cst_44 = arith.constant dense<0.000000e+00> : vector<64x384xf32>
    %94 = tpu.matmul %90, %93, %cst_44 {dimension_numbers = #tpu.dot_dimension_numbers<[1], [0], [0], [1], [0, 0, 1, 1], [], []>} : vector<64x128xf32>, vector<128x384xf32>, vector<64x384xf32> -> vector<64x384xf32>
    %95 = arith.index_cast %c1_i32 : i32 to index
    %c0_45 = arith.constant 0 : index
    %c0_46 = arith.constant 0 : index
    %96 = vector.load %arg8[%95, %c0_45, %c0_46] : memref<3x1x384xf32, #tpu.memory_space<vmem>>, vector<1x1x384xf32>
    %97 = vector.shape_cast %96 : vector<1x1x384xf32> to vector<1x384xf32>
    %98 = vector.broadcast %97 : vector<1x384xf32> to vector<64x384xf32>
    %99 = arith.addf %94, %98 : vector<64x384xf32>
    %cst_47 = arith.constant 0.000000e+00 : f32
    %100 = vector.broadcast %cst_47 : f32 to vector<64x384xf32>
    %101 = arith.maximumf %99, %100 : vector<64x384xf32>
    %102 = vector.extract_strided_slice %101 {offsets = [0, 128], sizes = [64, 128], strides = [1, 1]} : vector<64x384xf32> to vector<64x128xf32>
    %103 = vector.extract_strided_slice %101 {offsets = [0, 0], sizes = [64, 128], strides = [1, 1]} : vector<64x384xf32> to vector<64x128xf32>
    %104 = vector.extract_strided_slice %101 {offsets = [0, 256], sizes = [64, 128], strides = [1, 1]} : vector<64x384xf32> to vector<64x128xf32>
    %105 = tpu.concatenate %103, %104 in 0 : vector<64x128xf32>, vector<64x128xf32> -> vector<128x128xf32>
    %cst_48 = arith.constant dense<0.000000e+00> : vector<32x128xf32>
    %106 = tpu.matmul %11, %105, %cst_48 {dimension_numbers = #tpu.dot_dimension_numbers<[1], [0], [0], [1], [0, 0, 1, 1], [], []>} : vector<32x128xf32>, vector<128x128xf32>, vector<32x128xf32> -> vector<32x128xf32>
    %107 = arith.mulf %106, %19 : vector<32x128xf32>
    %108 = arith.index_cast %c1_i32 : i32 to index
    %c0_49 = arith.constant 0 : index
    %c0_50 = arith.constant 0 : index
    %109 = vector.load %arg9[%108, %c0_49, %c0_50] : memref<3x128x128xf32, #tpu.memory_space<vmem>>, vector<1x128x128xf32>
    %110 = vector.shape_cast %109 : vector<1x128x128xf32> to vector<128x128xf32>
    %cst_51 = arith.constant dense<0.000000e+00> : vector<32x128xf32>
    %111 = tpu.matmul %107, %110, %cst_51 {dimension_numbers = #tpu.dot_dimension_numbers<[1], [0], [0], [1], [0, 0, 1, 1], [], []>} : vector<32x128xf32>, vector<128x128xf32>, vector<32x128xf32> -> vector<32x128xf32>
    %112 = arith.index_cast %c1_i32 : i32 to index
    %c0_52 = arith.constant 0 : index
    %c0_53 = arith.constant 0 : index
    %113 = vector.load %arg10[%112, %c0_52, %c0_53] : memref<3x1x128xf32, #tpu.memory_space<vmem>>, vector<1x1x128xf32>
    %114 = vector.shape_cast %113 : vector<1x1x128xf32> to vector<1x128xf32>
    %115 = vector.broadcast %114 : vector<1x128xf32> to vector<32x128xf32>
    %116 = arith.addf %111, %115 : vector<32x128xf32>
    %cst_54 = arith.constant 0.000000e+00 : f32
    %117 = vector.broadcast %cst_54 : f32 to vector<32x128xf32>
    %118 = arith.maximumf %116, %117 : vector<32x128xf32>
    %119 = arith.index_cast %c1_i32 : i32 to index
    %c0_55 = arith.constant 0 : index
    %c0_56 = arith.constant 0 : index
    %120 = vector.load %arg11[%119, %c0_55, %c0_56] : memref<3x128x128xf32, #tpu.memory_space<vmem>>, vector<1x128x128xf32>
    %121 = vector.shape_cast %120 : vector<1x128x128xf32> to vector<128x128xf32>
    %cst_57 = arith.constant dense<0.000000e+00> : vector<32x128xf32>
    %122 = tpu.matmul %118, %121, %cst_57 {dimension_numbers = #tpu.dot_dimension_numbers<[1], [0], [0], [1], [0, 0, 1, 1], [], []>} : vector<32x128xf32>, vector<128x128xf32>, vector<32x128xf32> -> vector<32x128xf32>
    %123 = arith.index_cast %c1_i32 : i32 to index
    %c0_58 = arith.constant 0 : index
    %c0_59 = arith.constant 0 : index
    %124 = vector.load %arg12[%123, %c0_58, %c0_59] : memref<3x1x128xf32, #tpu.memory_space<vmem>>, vector<1x1x128xf32>
    %125 = vector.shape_cast %124 : vector<1x1x128xf32> to vector<1x128xf32>
    %126 = vector.broadcast %125 : vector<1x128xf32> to vector<32x128xf32>
    %127 = arith.addf %122, %126 : vector<32x128xf32>
    %cst_60 = arith.constant 0.000000e+00 : f32
    %128 = vector.broadcast %cst_60 : f32 to vector<32x128xf32>
    %129 = arith.maximumf %127, %128 : vector<32x128xf32>
    %c2_i32 = arith.constant 2 : i32
    %cst_61 = arith.constant dense<0.000000e+00> : vector<128x128xf32>
    %130 = tpu.matmul %5, %129, %cst_61 {dimension_numbers = #tpu.dot_dimension_numbers<[1], [0], [0], [1], [0, 0, 1, 1], [], []>} : vector<128x32xf32>, vector<32x128xf32>, vector<128x128xf32> -> vector<128x128xf32>
    %131 = vector.extract_strided_slice %130 {offsets = [0, 0], sizes = [64, 128], strides = [1, 1]} : vector<128x128xf32> to vector<64x128xf32>
    %132 = vector.extract_strided_slice %130 {offsets = [64, 0], sizes = [64, 128], strides = [1, 1]} : vector<128x128xf32> to vector<64x128xf32>
    %133 = tpu.concatenate %131, %102, %132 in 1 : vector<64x128xf32>, vector<64x128xf32>, vector<64x128xf32> -> vector<64x384xf32>
    %134 = arith.index_cast %c2_i32 : i32 to index
    %c0_62 = arith.constant 0 : index
    %c0_63 = arith.constant 0 : index
    %135 = vector.load %arg5[%134, %c0_62, %c0_63] : memref<3x384x128xf32, #tpu.memory_space<vmem>>, vector<1x384x128xf32>
    %136 = vector.shape_cast %135 : vector<1x384x128xf32> to vector<384x128xf32>
    %cst_64 = arith.constant dense<0.000000e+00> : vector<64x128xf32>
    %137 = tpu.matmul %133, %136, %cst_64 {dimension_numbers = #tpu.dot_dimension_numbers<[1], [0], [0], [1], [0, 0, 1, 1], [], []>} : vector<64x384xf32>, vector<384x128xf32>, vector<64x128xf32> -> vector<64x128xf32>
    %138 = arith.index_cast %c2_i32 : i32 to index
    %c0_65 = arith.constant 0 : index
    %c0_66 = arith.constant 0 : index
    %139 = vector.load %arg6[%138, %c0_65, %c0_66] : memref<3x1x128xf32, #tpu.memory_space<vmem>>, vector<1x1x128xf32>
    %140 = vector.shape_cast %139 : vector<1x1x128xf32> to vector<1x128xf32>
    %141 = vector.broadcast %140 : vector<1x128xf32> to vector<64x128xf32>
    %142 = arith.addf %137, %141 : vector<64x128xf32>
    %cst_67 = arith.constant 0.000000e+00 : f32
    %143 = vector.broadcast %cst_67 : f32 to vector<64x128xf32>
    %144 = arith.maximumf %142, %143 : vector<64x128xf32>
    %145 = arith.index_cast %c2_i32 : i32 to index
    %c0_68 = arith.constant 0 : index
    %c0_69 = arith.constant 0 : index
    %146 = vector.load %arg7[%145, %c0_68, %c0_69] : memref<3x128x384xf32, #tpu.memory_space<vmem>>, vector<1x128x384xf32>
    %147 = vector.shape_cast %146 : vector<1x128x384xf32> to vector<128x384xf32>
    %cst_70 = arith.constant dense<0.000000e+00> : vector<64x384xf32>
    %148 = tpu.matmul %144, %147, %cst_70 {dimension_numbers = #tpu.dot_dimension_numbers<[1], [0], [0], [1], [0, 0, 1, 1], [], []>} : vector<64x128xf32>, vector<128x384xf32>, vector<64x384xf32> -> vector<64x384xf32>
    %149 = arith.index_cast %c2_i32 : i32 to index
    %c0_71 = arith.constant 0 : index
    %c0_72 = arith.constant 0 : index
    %150 = vector.load %arg8[%149, %c0_71, %c0_72] : memref<3x1x384xf32, #tpu.memory_space<vmem>>, vector<1x1x384xf32>
    %151 = vector.shape_cast %150 : vector<1x1x384xf32> to vector<1x384xf32>
    %152 = vector.broadcast %151 : vector<1x384xf32> to vector<64x384xf32>
    %153 = arith.addf %148, %152 : vector<64x384xf32>
    %cst_73 = arith.constant 0.000000e+00 : f32
    %154 = vector.broadcast %cst_73 : f32 to vector<64x384xf32>
    %155 = arith.maximumf %153, %154 : vector<64x384xf32>
    %156 = vector.extract_strided_slice %155 {offsets = [0, 128], sizes = [64, 128], strides = [1, 1]} : vector<64x384xf32> to vector<64x128xf32>
    %157 = vector.extract_strided_slice %155 {offsets = [0, 0], sizes = [64, 128], strides = [1, 1]} : vector<64x384xf32> to vector<64x128xf32>
    %158 = vector.extract_strided_slice %155 {offsets = [0, 256], sizes = [64, 128], strides = [1, 1]} : vector<64x384xf32> to vector<64x128xf32>
    %159 = tpu.concatenate %157, %158 in 0 : vector<64x128xf32>, vector<64x128xf32> -> vector<128x128xf32>
    %cst_74 = arith.constant dense<0.000000e+00> : vector<32x128xf32>
    %160 = tpu.matmul %11, %159, %cst_74 {dimension_numbers = #tpu.dot_dimension_numbers<[1], [0], [0], [1], [0, 0, 1, 1], [], []>} : vector<32x128xf32>, vector<128x128xf32>, vector<32x128xf32> -> vector<32x128xf32>
    %161 = arith.mulf %160, %19 : vector<32x128xf32>
    %162 = arith.index_cast %c2_i32 : i32 to index
    %c0_75 = arith.constant 0 : index
    %c0_76 = arith.constant 0 : index
    %163 = vector.load %arg9[%162, %c0_75, %c0_76] : memref<3x128x128xf32, #tpu.memory_space<vmem>>, vector<1x128x128xf32>
    %164 = vector.shape_cast %163 : vector<1x128x128xf32> to vector<128x128xf32>
    %cst_77 = arith.constant dense<0.000000e+00> : vector<32x128xf32>
    %165 = tpu.matmul %161, %164, %cst_77 {dimension_numbers = #tpu.dot_dimension_numbers<[1], [0], [0], [1], [0, 0, 1, 1], [], []>} : vector<32x128xf32>, vector<128x128xf32>, vector<32x128xf32> -> vector<32x128xf32>
    %166 = arith.index_cast %c2_i32 : i32 to index
    %c0_78 = arith.constant 0 : index
    %c0_79 = arith.constant 0 : index
    %167 = vector.load %arg10[%166, %c0_78, %c0_79] : memref<3x1x128xf32, #tpu.memory_space<vmem>>, vector<1x1x128xf32>
    %168 = vector.shape_cast %167 : vector<1x1x128xf32> to vector<1x128xf32>
    %169 = vector.broadcast %168 : vector<1x128xf32> to vector<32x128xf32>
    %170 = arith.addf %165, %169 : vector<32x128xf32>
    %cst_80 = arith.constant 0.000000e+00 : f32
    %171 = vector.broadcast %cst_80 : f32 to vector<32x128xf32>
    %172 = arith.maximumf %170, %171 : vector<32x128xf32>
    %173 = arith.index_cast %c2_i32 : i32 to index
    %c0_81 = arith.constant 0 : index
    %c0_82 = arith.constant 0 : index
    %174 = vector.load %arg11[%173, %c0_81, %c0_82] : memref<3x128x128xf32, #tpu.memory_space<vmem>>, vector<1x128x128xf32>
    %175 = vector.shape_cast %174 : vector<1x128x128xf32> to vector<128x128xf32>
    %cst_83 = arith.constant dense<0.000000e+00> : vector<32x128xf32>
    %176 = tpu.matmul %172, %175, %cst_83 {dimension_numbers = #tpu.dot_dimension_numbers<[1], [0], [0], [1], [0, 0, 1, 1], [], []>} : vector<32x128xf32>, vector<128x128xf32>, vector<32x128xf32> -> vector<32x128xf32>
    %177 = arith.index_cast %c2_i32 : i32 to index
    %c0_84 = arith.constant 0 : index
    %c0_85 = arith.constant 0 : index
    %178 = vector.load %arg12[%177, %c0_84, %c0_85] : memref<3x1x128xf32, #tpu.memory_space<vmem>>, vector<1x1x128xf32>
    %179 = vector.shape_cast %178 : vector<1x1x128xf32> to vector<1x128xf32>
    %180 = vector.broadcast %179 : vector<1x128xf32> to vector<32x128xf32>
    %181 = arith.addf %176, %180 : vector<32x128xf32>
    %cst_86 = arith.constant 0.000000e+00 : f32
    %182 = vector.broadcast %cst_86 : f32 to vector<32x128xf32>
    %183 = arith.maximumf %181, %182 : vector<32x128xf32>
    %c3_i32 = arith.constant 3 : i32
    %c0_87 = arith.constant 0 : index
    %c0_88 = arith.constant 0 : index
    %184 = vector.load %arg13[%c0_87, %c0_88] : memref<32x128xf32, #tpu.memory_space<vmem>>, vector<32x128xf32>
    tpu.vector_store %arg13[%c0_87, %c0_88], %183 {strides = array<i32>} : memref<32x128xf32, #tpu.memory_space<vmem>>, vector<32x128xf32>,
    %c0_89 = arith.constant 0 : index
    %c0_90 = arith.constant 0 : index
    %185 = vector.load %arg14[%c0_89, %c0_90] : memref<64x128xf32, #tpu.memory_space<vmem>>, vector<64x128xf32>
    tpu.vector_store %arg14[%c0_89, %c0_90], %156 {strides = array<i32>} : memref<64x128xf32, #tpu.memory_space<vmem>>, vector<64x128xf32>,
    return
  }
  func.func @transform_0(%arg0: i32) -> (i32, i32) {
    %c0_i32 = arith.constant 0 : i32
    %c0_i32_0 = arith.constant 0 : i32
    %c0_i32_1 = arith.constant 0 : i32
    return %c0_i32, %c0_i32_0 : i32, i32
  }
  func.func @transform_1(%arg0: i32) -> (i32, i32) {
    %c0_i32 = arith.constant 0 : i32
    %c0_i32_0 = arith.constant 0 : i32
    %c0_i32_1 = arith.constant 0 : i32
    return %c0_i32, %c0_i32_0 : i32, i32
  }
  func.func @transform_2(%arg0: i32) -> (i32, i32) {
    %c0_i32 = arith.constant 0 : i32
    %c0_i32_0 = arith.constant 0 : i32
    %c0_i32_1 = arith.constant 0 : i32
    return %c0_i32, %c0_i32_0 : i32, i32
  }
  func.func @transform_3(%arg0: i32) -> (i32, i32) {
    %c0_i32 = arith.constant 0 : i32
    %c0_i32_0 = arith.constant 0 : i32
    %c0_i32_1 = arith.constant 0 : i32
    return %c0_i32, %c0_i32_0 : i32, i32
  }
  func.func @transform_4(%arg0: i32) -> (i32, i32, i32) {
    %c0_i32 = arith.constant 0 : i32
    %c0_i32_0 = arith.constant 0 : i32
    %c0_i32_1 = arith.constant 0 : i32
    %c0_i32_2 = arith.constant 0 : i32
    return %c0_i32, %c0_i32_0, %c0_i32_1 : i32, i32, i32
  }
  func.func @transform_5(%arg0: i32) -> (i32, i32, i32) {
    %c0_i32 = arith.constant 0 : i32
    %c0_i32_0 = arith.constant 0 : i32
    %c0_i32_1 = arith.constant 0 : i32
    %c0_i32_2 = arith.constant 0 : i32
    return %c0_i32, %c0_i32_0, %c0_i32_1 : i32, i32, i32
  }
  func.func @transform_6(%arg0: i32) -> (i32, i32, i32) {
    %c0_i32 = arith.constant 0 : i32
    %c0_i32_0 = arith.constant 0 : i32
    %c0_i32_1 = arith.constant 0 : i32
    %c0_i32_2 = arith.constant 0 : i32
    return %c0_i32, %c0_i32_0, %c0_i32_1 : i32, i32, i32
  }
  func.func @transform_7(%arg0: i32) -> (i32, i32, i32) {
    %c0_i32 = arith.constant 0 : i32
    %c0_i32_0 = arith.constant 0 : i32
    %c0_i32_1 = arith.constant 0 : i32
    %c0_i32_2 = arith.constant 0 : i32
    return %c0_i32, %c0_i32_0, %c0_i32_1 : i32, i32, i32
  }
  func.func @transform_8(%arg0: i32) -> (i32, i32, i32) {
    %c0_i32 = arith.constant 0 : i32
    %c0_i32_0 = arith.constant 0 : i32
    %c0_i32_1 = arith.constant 0 : i32
    %c0_i32_2 = arith.constant 0 : i32
    return %c0_i32, %c0_i32_0, %c0_i32_1 : i32, i32, i32
  }
  func.func @transform_9(%arg0: i32) -> (i32, i32, i32) {
    %c0_i32 = arith.constant 0 : i32
    %c0_i32_0 = arith.constant 0 : i32
    %c0_i32_1 = arith.constant 0 : i32
    %c0_i32_2 = arith.constant 0 : i32
    return %c0_i32, %c0_i32_0, %c0_i32_1 : i32, i32, i32
  }
  func.func @transform_10(%arg0: i32) -> (i32, i32, i32) {
    %c0_i32 = arith.constant 0 : i32
    %c0_i32_0 = arith.constant 0 : i32
    %c0_i32_1 = arith.constant 0 : i32
    %c0_i32_2 = arith.constant 0 : i32
    return %c0_i32, %c0_i32_0, %c0_i32_1 : i32, i32, i32
  }
  func.func @transform_11(%arg0: i32) -> (i32, i32, i32) {
    %c0_i32 = arith.constant 0 : i32
    %c0_i32_0 = arith.constant 0 : i32
    %c0_i32_1 = arith.constant 0 : i32
    %c0_i32_2 = arith.constant 0 : i32
    return %c0_i32, %c0_i32_0, %c0_i32_1 : i32, i32, i32
  }
  func.func @transform_12(%arg0: i32) -> (i32, i32) {
    %c0_i32 = arith.constant 0 : i32
    %c0_i32_0 = arith.constant 0 : i32
    %c0_i32_1 = arith.constant 0 : i32
    return %c0_i32, %c0_i32_0 : i32, i32
  }
  func.func @transform_13(%arg0: i32) -> (i32, i32) {
    %c0_i32 = arith.constant 0 : i32
    %c0_i32_0 = arith.constant 0 : i32
    %c0_i32_1 = arith.constant 0 : i32
    return %c0_i32, %c0_i32_0 : i32, i32
  }
}

</mosaic_0001>

<bundles_post_ra>
// kernel: tpu_custom_call.1
= control target key start
LH: loop header
LB: loop body
LE: loop exit
PB: predicated region body
PF: predicated region fallthrough
CT: control target
= control target key end

     0   :  { %19 = vsyncpa [#allocation3], 0  ;;  %s3088_s0 = inlined_call_operand.vmem [shape: s32[128,1], index: 0, kind: input, shape index: {}]   ;;  %s3089_s1 = inlined_call_operand.vmem [shape: s32[1,128], index: 1, kind: input, shape index: {}]   ;;  %s3090_s2 = inlined_call_operand.vmem [shape: f32[32,128], index: 2, kind: input, shape index: {}]   ;;  %s3091_s3 = inlined_call_operand.vmem [shape: f32[64,128], index: 3, kind: input, shape index: {}]   ;;  %s3092_s4 = inlined_call_operand.hbm [shape: f32[3,384,128], index: 4, kind: input, shape index: {}]   ;;  %s3093_s5 = inlined_call_operand.vmem [shape: f32[3,1,128], index: 5, kind: input, shape index: {}]   ;;  %s3094_s6 = inlined_call_operand.hbm [shape: f32[3,128,384], index: 6, kind: input, shape index: {}]   ;;  %s3095_s7 = inlined_call_operand.vmem [shape: f32[3,1,384], index: 7, kind: input, shape index: {}]   ;;  %s3096_s8 = inlined_call_operand.hbm [shape: f32[3,128,128], index: 8, kind: input, shape index: {}]   ;;  %s3097_s9 = inlined_call_operand.vmem [shape: f32[3,1,128], index: 9, kind: input, shape index: {}]   ;;  %s3098_s10 = inlined_call_operand.hbm [shape: f32[3,128,128], index: 10, kind: input, shape index: {}]   ;;  %s3099_s11 = inlined_call_operand.vmem [shape: f32[3,1,128], index: 11, kind: input, shape index: {}]   ;;  %s3100_s12 = inlined_call_operand.hbm [shape: f32[32,128], index: 12, kind: output, shape index: {0}]   ;;  %s3101_s13 = inlined_call_operand.hbm [shape: f32[64,128], index: 13, kind: output, shape index: {1}]  }
   0x1   :  { %20 = vsyncpa [#allocation6], 0 }
   0x2   :  { %21 = vsyncpa [#allocation9], 0 }
   0x3   :  { %22 = vsyncpa [#allocation4], 0  ;;  %s51_s27 = sshll.u32 %s3094_s6, 4  ;;  %s52_s27 = int_to_ptr.hbm [resolvable:$true] %s51_s27 }
   0x4   :  { %23 = vsyncpa [#allocation12], 0  ;;  %s2487_s28 = smov [#allocation5]   ;;  %s36_s15 = sshll.u32 %s3092_s4, 4  ;;  %s37_s15 = int_to_ptr.hbm [resolvable:$true] %s36_s15 }
   0x5   :  { %s53_s29 = sshll.u32 %s2487_s28, 4  ;;  %s2488_s16 = smov 384   ;;  %s54_s29 = int_to_ptr.vmem [resolvable:$true] %s53_s29 }
   0x6   :  { %s2489_s17 = smov 24   ;;  %s2490_s18 = smov [#allocation2]  }
   0x7   :  { %59 = dma.hbm_to_vmem [thread:$0]  %s52_s27, 18432, %s54_s29, [#allocation6], %s2488_s16, %s2488_s16, %s2489_s17  }
   0x8   :  { %s38_s19 = sshll.u32 %s2490_s18, 4  ;;  %s2491_s20 = smov 128   ;;  %s39_s19 = int_to_ptr.vmem [resolvable:$true] %s38_s19 }
   0x9   :  { %s2492_s21 = smov 8   ;;  %s66_s23 = sshll.u32 %s3096_s8, 4  ;;  %s67_s23 = int_to_ptr.hbm [resolvable:$true] %s66_s23 }
   0xa   :  { %44 = dma.hbm_to_vmem [thread:$0]  %s37_s15, 18432, %s39_s19, [#allocation3], %s2491_s20, %s2491_s20, %s2492_s21  }
   0xb   :  { %s2493_s24 = smov [#allocation7]   ;;  %s81_s27 = sshll.u32 %s3098_s10, 4  ;;  %s82_s27 = int_to_ptr.hbm [resolvable:$true] %s81_s27 }
   0xc   :  { %s68_s4 = sshll.u32 %s2493_s24, 4  ;;  %s2494_s28 = smov [#allocation8]   ;;  %s69_s4 = int_to_ptr.vmem [resolvable:$true] %s68_s4 }
   0xd   :  { %74 = dma.hbm_to_vmem [thread:$0]  %s67_s23, 6144, %s69_s4, [#allocation6], %s2491_s20, %s2491_s20, %s2492_s21  }
   0xe   :  { %s83_s29 = sshll.u32 %s2494_s28, 4  ;;  %s84_s29 = int_to_ptr.vmem [resolvable:$true] %s83_s29 }
   0xf   :  { %89 = dma.hbm_to_vmem [thread:$0]  %s82_s27, 6144, %s84_s29, [#allocation9], %s2491_s20, %s2491_s20, %s2492_s21  }
  0x10   :  { %2477 = dma.done.wait [#allocation3], 18432  }
  0x11   :  { %2478 = vsyncadd [#allocation3], 4294948864 }
  0x12   :  { %2479 = dma.done.wait [#allocation6], 24576  }
  0x13   :  { %2480 = vsyncadd [#allocation6], 4294942720 }
  0x14   :  { %2481 = dma.done.wait [#allocation9], 6144  }
  0x15   :  { %2482 = vsyncadd [#allocation9], 4294961152  ;;  %v2495_v0 = vmov 0   ;;  %v112_v1 = vld [vmem:[%s3088_s0 + $0x10] sm:$0xff]  ;;  %v110_v2 = vld [vmem:[%s3088_s0] sm:$0xff]  ;;  %v108_v21 = vlaneseq  ;;  %vm325_vm0 = vcmask 261120  }
  0x16   :  { %2313 = vset.pattern.permute.xlu1 %v2495_v0  ;;  %2312 = vset.pattern.permute.xlu0 %v2495_v0  ;;  %v114_v3 = vld [vmem:[%s3088_s0 + $0x20] sm:$0xff]  ;;  %v113_v4 = vld [vmem:[%s3088_s0 + $0x18] sm:$0xff]  ;;  %v111_v5 = vld [vmem:[%s3088_s0 + $0x8] sm:$0xff]  ;;  %v2496_v24 = vmov 0.0   ;;  %s2498_s26 = smov [#allocation11]   ;;  %s2191_s28 = sshll.u32 %s3101_s13, 4  ;;  %s2192_s28 = int_to_ptr.hbm [resolvable:$true] %s2191_s28 }
  0x17   :  { %2314 = vset.pattern.permute.xlu2 %v2495_v0  ;;  %133 = vperm.xlu1 %2313, %v112_v1   ;;  %v115_v6 = vld [vmem:[%s3088_s0 + $0x28] sm:$0xff]  ;;  %v316_v7 = vld [vmem:[%s3090_s2 + $0x18] sm:$0xff]  ;;  %v315_v8 = vld [vmem:[%s3090_s2 + $0x10] sm:$0xff]  ;;  %v2652_v22 = vand.u32 127, %v108_v21  ;;  %s2499_s13 = smov [#allocation10]  }
  0x18   :  { %127 = vperm.xlu0 %2312, %v110_v2   ;;  %139 = vperm.xlu2 %2314, %v114_v3   ;;  %v314_v9 = vld [vmem:[%s3090_s2 + $0x8] sm:$0xff]  ;;  %v117_v10 = vld [vmem:[%s3088_s0 + $0x38] sm:$0xff]  ;;  %v116_v11 = vld [vmem:[%s3088_s0 + $0x30] sm:$0xff]  ;;  %s2176_s8 = sshll.u32 %s2499_s13, 4  ;;  %s2177_s8 = int_to_ptr.vmem [resolvable:$true] %s2176_s8 }
  0x19   :  { %386 = vmatpush.msra.mxu0 %v316_v7  ;;  %v118_v12 = vld [vmem:[%s3088_s0 + $0x40] sm:$0xff]  ;;  %v120_v13 = vld [vmem:[%s3088_s0 + $0x50] sm:$0xff]  ;;  %v119_v14 = vld [vmem:[%s3088_s0 + $0x48] sm:$0xff] }
  0x1a   :  { %v121_v15 = vld [vmem:[%s3088_s0 + $0x58] sm:$0xff]  ;;  %v123_v16 = vld [vmem:[%s3088_s0 + $0x68] sm:$0xff]  ;;  %v122_v17 = vld [vmem:[%s3088_s0 + $0x60] sm:$0xff] }
  0x1b   :  { %387 = vmatpush.msra.mxu0 %v315_v8  ;;  %v124_v18 = vld [vmem:[%s3088_s0 + $0x70] sm:$0xff]  ;;  %v125_v19 = vld [vmem:[%s3088_s0 + $0x78] sm:$0xff]  ;;  %v313_v20 = vld [vmem:[%s3090_s2] sm:$0xff]  ;;  %s2178_s2 = sshll.u32 %s3100_s12, 4  ;;  %s2179_s2 = int_to_ptr.hbm [resolvable:$true] %s2178_s2 }
  0x1c   :  { %v470_v40 = vld [vmem:[#allocation2 + $0xf8] sm:$0xff]  ;;  %v469_v41 = vld [vmem:[#allocation2 + $0xf0] sm:$0xff]  ;;  %v468_v43 = vld [vmem:[#allocation2 + $0xe8] sm:$0xff] }
  0x1d   :  { %388 = vmatpush.msra.mxu0 %v314_v9  ;;  %v454_v42 = vld [vmem:[#allocation2 + $0x78] sm:$0xff]  ;;  %532 = vmatpush.msra.mxu2 %v470_v40  ;;  %v453_v46 = vld [vmem:[#allocation2 + $0x70] sm:$0xff]  ;;  %v467_v47 = vld [vmem:[#allocation2 + $0xe0] sm:$0xff] }
  0x1e   :  { %491 = vmatpush.msra.mxu1 %v454_v42  ;;  %v452_v48 = vld [vmem:[#allocation2 + $0x68] sm:$0xff]  ;;  %v466_v50 = vld [vmem:[#allocation2 + $0xd8] sm:$0xff]  ;;  %v451_v51 = vld [vmem:[#allocation2 + $0x60] sm:$0xff] }
  0x1f   :  { %136 = vperm.xlu1 %2313, %v113_v4   ;;  %389 = vmatpush.msra.mxu0 %v313_v20  ;;  %v465_v52 = vld [vmem:[#allocation2 + $0xd0] sm:$0xff]  ;;  %v450_v53 = vld [vmem:[#allocation2 + $0x58] sm:$0xff]  ;;  %v464_v54 = vld [vmem:[#allocation2 + $0xc8] sm:$0xff] }
  0x20   :  { %130 = vperm.xlu0 %2312, %v111_v5   ;;  %142 = vperm.xlu2 %2314, %v115_v6   ;;  %v449_v56 = vld [vmem:[#allocation2 + $0x50] sm:$0xff]  ;;  %v463_v57 = vld [vmem:[#allocation2 + $0xc0] sm:$0xff]  ;;  %v448_v58 = vld [vmem:[#allocation2 + $0x48] sm:$0xff] }
  0x21   :  { %533 = vmatpush.msra.mxu2 %v469_v41  ;;  %492 = vmatpush.msra.mxu1 %v453_v46  ;;  %v462_v60 = vld [vmem:[#allocation2 + $0xb8] sm:$0xff]  ;;  %v447_v61 = vld [vmem:[#allocation2 + $0x40] sm:$0xff]  ;;  %v461_v62 = vld [vmem:[#allocation2 + $0xb0] sm:$0xff] }
  0x22   :  { %v446_v63 = vld [vmem:[#allocation2 + $0x38] sm:$0xff]  ;;  %v460_v0 = vld [vmem:[#allocation2 + $0xa8] sm:$0xff]  ;;  %v445_v2 = vld [vmem:[#allocation2 + $0x30] sm:$0xff] }
  0x23   :  { %534 = vmatpush.msra.mxu2 %v468_v43  ;;  %493 = vmatpush.msra.mxu1 %v452_v48  ;;  %v459_v3 = vld [vmem:[#allocation2 + $0xa0] sm:$0xff]  ;;  %v444_v4 = vld [vmem:[#allocation2 + $0x28] sm:$0xff]  ;;  %v458_v5 = vld [vmem:[#allocation2 + $0x98] sm:$0xff] }
  0x24   :  { %v443_v6 = vld [vmem:[#allocation2 + $0x20] sm:$0xff]  ;;  %v457_v7 = vld [vmem:[#allocation2 + $0x90] sm:$0xff]  ;;  %v442_v9 = vld [vmem:[#allocation2 + $0x18] sm:$0xff] }
  0x25   :  { %535 = vmatpush.msra.mxu2 %v467_v47  ;;  %494 = vmatpush.msra.mxu1 %v451_v51  ;;  %v486_v41 = vld [vmem:[#allocation2 + $0x178] sm:$0xff]  ;;  %v485_v42 = vld [vmem:[#allocation2 + $0x170] sm:$0xff]  ;;  %v484_v43 = vld [vmem:[#allocation2 + $0x168] sm:$0xff] }
  0x26   :  { %573 = vmatpush.msra.mxu3 %v486_v41  ;;  %v482_v47 = vld [vmem:[#allocation2 + $0x158] sm:$0xff]  ;;  %v481_v48 = vld [vmem:[#allocation2 + $0x150] sm:$0xff]  ;;  %v479_v51 = vld [vmem:[#allocation2 + $0x140] sm:$0xff] }
  0x27   :  { %148 = vperm.xlu1 %2313, %v117_v10   ;;  %536 = vmatpush.msra.mxu2 %v466_v50  ;;  %v456_v10 = vld [vmem:[#allocation2 + $0x88] sm:$0xff] }
  0x28   :  { %145 = vperm.xlu0 %2312, %v116_v11   ;;  %151 = vperm.xlu2 %2314, %v118_v12   ;;  %v441_v12 = vld [vmem:[#allocation2 + $0x10] sm:$0xff]  ;;  %v480_v50 = vld [vmem:[#allocation2 + $0x148] sm:$0xff] }
  0x29   :  { %537 = vmatpush.msra.mxu2 %v465_v52  ;;  %495 = vmatpush.msra.mxu1 %v450_v53  ;;  %v478_v53 = vld [vmem:[#allocation2 + $0x138] sm:$0xff]  ;;  %v655_v41 = vld [vmem:[#allocation5 + $0x108] sm:$0xff] }
  0x2a   :  { %574 = vmatpush.msra.mxu3 %v485_v42  ;;  %v656_v42 = vld [vmem:[#allocation5 + $0x110] sm:$0xff] }
  0x2b   :  { %538 = vmatpush.msra.mxu2 %v464_v54  ;;  %496 = vmatpush.msra.mxu1 %v449_v56  ;;  %v477_v54 = vld [vmem:[#allocation2 + $0x130] sm:$0xff]  ;;  %v324_v56 = vld [vmem:[%s3091_s3 + $0x38] sm:$0xff] }
  0x2c   :  { %575 = vmatpush.msra.mxu3 %v484_v43  ;;  %v652_v43 = vld [vmem:[#allocation5 + $0xf0] sm:$0xff] }
  0x2d   :  { %539 = vmatpush.msra.mxu2 %v463_v57  ;;  %497 = vmatpush.msra.mxu1 %v448_v58  ;;  %v476_v57 = vld [vmem:[#allocation2 + $0x128] sm:$0xff]  ;;  %v475_v58 = vld [vmem:[#allocation2 + $0x120] sm:$0xff] }
  0x2f   :  { %157 = vperm.xlu1 %2313, %v120_v13   ;;  %540 = vmatpush.msra.mxu2 %v462_v60  ;;  %v455_v13 = vld [vmem:[#allocation2 + $0x80] sm:$0xff]  ;;  %v474_v60 = vld [vmem:[#allocation2 + $0x118] sm:$0xff] }
  0x30   :  { %154 = vperm.xlu0 %2312, %v119_v14   ;;  %160 = vperm.xlu2 %2314, %v121_v15   ;;  %v317_v14 = vld [vmem:[%s3091_s3] sm:$0xff] }
  0x31   :  { %498 = vmatpush.msra.mxu1 %v447_v61  ;;  %541 = vmatpush.msra.mxu2 %v461_v62  ;;  %v473_v61 = vld [vmem:[#allocation2 + $0x110] sm:$0xff]  ;;  %v472_v62 = vld [vmem:[#allocation2 + $0x108] sm:$0xff] }
  0x33   :  { %499 = vmatpush.msra.mxu1 %v446_v63  ;;  %542 = vmatpush.msra.mxu2 %v460_v0  ;;  %v471_v63 = vld [vmem:[#allocation2 + $0x100] sm:$0xff] }
  0x35   :  { %500 = vmatpush.msra.mxu1 %v445_v2  ;;  %543 = vmatpush.msra.mxu2 %v459_v3 }
  0x37   :  { %166 = vperm.xlu1 %2313, %v123_v16   ;;  %501 = vmatpush.msra.mxu1 %v444_v4  ;;  %v440_v16 = vld [vmem:[#allocation2 + $0x8] sm:$0xff] }
  0x38   :  { %163 = vperm.xlu0 %2312, %v122_v17   ;;  %169 = vperm.xlu2 %2314, %v124_v18   ;;  %v439_v17 = vld [vmem:[#allocation2] sm:$0xff] }
  0x39   :  { %544 = vmatpush.msra.mxu2 %v458_v5  ;;  %502 = vmatpush.msra.mxu1 %v443_v6 }
  0x3b   :  { %545 = vmatpush.msra.mxu2 %v457_v7  ;;  %503 = vmatpush.msra.mxu1 %v442_v9 }
  0x3d   :  { %546 = vmatpush.msra.mxu2 %v456_v10  ;;  %504 = vmatpush.msra.mxu1 %v441_v12 }
  0x3f   :  { %547 = vmatpush.msra.mxu2 %v455_v13  ;;  %505 = vmatpush.msra.mxu1 %v440_v16  ;;  %v669_v16 = vld [vmem:[#allocation5 + $0x178] sm:$0xff] }
  0x40   :  { %172 = vperm.xlu0 %2312, %v125_v19   ;;  %548 = vmatmul.f32.vlgmr.msra.gmra.mxu2 %v317_v14  ;;  %v318_v19 = vld [vmem:[%s3091_s3 + $0x8] sm:$0xff] }
  0x41   :  { %506 = vmatpush.msra.mxu1 %v439_v17  ;;  %v667_v14 = vld [vmem:[#allocation5 + $0x168] sm:$0xff]  ;;  %v664_v17 = vld [vmem:[#allocation5 + $0x150] sm:$0xff] }
  0x43   :  { %678 = vmatpush.msrb.mxu1 %v667_v14  ;;  %v623_v14 = vld [vmem:[#allocation5 + $0x8] sm:$0xff] }
  0x45   :  { %679 = vmatpush.msrb.mxu1 %v664_v17 }
  0x48   :  { %551 = vmatmul.f32.gmra.mxu2 %v318_v19  ;;  %v665_v19 = vld [vmem:[#allocation5 + $0x158] sm:$0xff] }
  0x72   :  { %v140_v32 = vpop.permute.xlu2 %139 }
  0x73   :  { %vm178_vm5 = vcmp.eq.s32.totalorder %v2652_v22, %v140_v32  ;;  %v320_v32 = vld [vmem:[%s3091_s3 + $0x18] sm:$0xff] }
  0x74   :  { %v2680_v33 = vsel %vm178_vm5, 1.0, %v2496_v24 }
  0x7a   :  { %v143_v34 = vpop.permute.xlu2 %142 }
  0x7b   :  { %vm179_vm6 = vcmp.eq.s32.totalorder %v2652_v22, %v143_v34 }
  0x7c   :  { %v2686_v35 = vsel %vm179_vm6, 1.0, %v2496_v24 }
  0x82   :  { %v152_v44 = vpop.permute.xlu2 %151 }
  0x83   :  { %vm182_vm9 = vcmp.eq.s32.totalorder %v2652_v22, %v152_v44  ;;  %v483_v44 = vld [vmem:[#allocation2 + $0x160] sm:$0xff] }
  0x84   :  { %v2704_v45 = vsel %vm182_vm9, 1.0, %v2496_v24  ;;  %576 = vmatpush.msra.mxu3 %v483_v44  ;;  %v653_v44 = vld [vmem:[#allocation5 + $0xf8] sm:$0xff] }
  0x86   :  { %577 = vmatpush.msra.mxu3 %v482_v47  ;;  %v649_v47 = vld [vmem:[#allocation5 + $0xd8] sm:$0xff] }
  0x88   :  { %578 = vmatpush.msra.mxu3 %v481_v48  ;;  %v650_v48 = vld [vmem:[#allocation5 + $0xe0] sm:$0xff] }
  0x89   :  { %v134_v28 = vpop.permute.xlu1 %133 }
  0x8a   :  { %v128_v23 = vpop.permute.xlu0 %127  ;;  %vm176_vm3 = vcmp.eq.s32.totalorder %v2652_v22, %v134_v28  ;;  %v161_v8 = vpop.permute.xlu2 %160  ;;  %579 = vmatpush.msra.mxu3 %v480_v50  ;;  %v646_v50 = vld [vmem:[#allocation5 + $0xc0] sm:$0xff] }
  0x8b   :  { %vm174_vm1 = vcmp.eq.s32.totalorder %v2652_v22, %v128_v23  ;;  %v2668_v29 = vsel %vm176_vm3, 1.0, %v2496_v24  ;;  %vm185_vm12 = vcmp.eq.s32.totalorder %v2652_v22, %v161_v8 }
  0x8c   :  { %v2656_v25 = vsel %vm174_vm1, 1.0, %v2496_v24  ;;  %v2722_v11 = vsel %vm185_vm12, 1.0, %v2496_v24  ;;  %580 = vmatpush.msra.mxu3 %v479_v51  ;;  %v647_v51 = vld [vmem:[#allocation5 + $0xc8] sm:$0xff] }
  0x8d   :  { %2231 = vmatmul.msk.f32.vlgmr.msra.gmra.mxu0 %vm325_vm0, %v2656_v25 }
  0x8e   :  { %581 = vmatpush.msra.mxu3 %v478_v53  ;;  %v643_v53 = vld [vmem:[#allocation5 + $0xa8] sm:$0xff] }
  0x90   :  { %582 = vmatpush.msra.mxu3 %v477_v54  ;;  %v644_v54 = vld [vmem:[#allocation5 + $0xb0] sm:$0xff] }
  0x91   :  { %v137_v30 = vpop.permute.xlu1 %136 }
  0x92   :  { %v131_v26 = vpop.permute.xlu0 %130  ;;  %vm177_vm4 = vcmp.eq.s32.totalorder %v2652_v22, %v137_v30  ;;  %v170_v28 = vpop.permute.xlu2 %169  ;;  %583 = vmatpush.msra.mxu3 %v476_v57  ;;  %v640_v57 = vld [vmem:[#allocation5 + $0x90] sm:$0xff] }
  0x93   :  { %vm175_vm2 = vcmp.eq.s32.totalorder %v2652_v22, %v131_v26  ;;  %v2674_v31 = vsel %vm177_vm4, 1.0, %v2496_v24  ;;  %v319_v26 = vld [vmem:[%s3091_s3 + $0x10] sm:$0xff]  ;;  %vm188_vm15 = vcmp.eq.s32.totalorder %v2652_v22, %v170_v28  ;;  %v662_v28 = vld [vmem:[#allocation5 + $0x140] sm:$0xff] }
  0x94   :  { %v2662_v27 = vsel %vm175_vm2, 1.0, %v2496_v24  ;;  %554 = vmatmul.f32.gmra.mxu2 %v319_v26  ;;  %v2749_v30 = vsel %vm188_vm15, 1.0, %v2496_v24  ;;  %584 = vmatpush.msra.mxu3 %v475_v58  ;;  %v661_v26 = vld [vmem:[#allocation5 + $0x138] sm:$0xff] }
  0x95   :  { %2232 = vmatmul.msk.f32.gmra.mxu0 %vm325_vm0, %v2662_v27  ;;  %680 = vmatpush.msrb.mxu1 %v661_v26  ;;  %v641_v58 = vld [vmem:[#allocation5 + $0x98] sm:$0xff] }
  0x96   :  { %585 = vmatpush.msra.mxu3 %v474_v60  ;;  %v637_v60 = vld [vmem:[#allocation5 + $0x78] sm:$0xff] }
  0x98   :  { %586 = vmatpush.msra.mxu3 %v473_v61  ;;  %v638_v61 = vld [vmem:[#allocation5 + $0x80] sm:$0xff] }
  0x99   :  { %v149_v38 = vpop.permute.xlu1 %148 }
  0x9a   :  { %v146_v36 = vpop.permute.xlu0 %145  ;;  %vm181_vm8 = vcmp.eq.s32.totalorder %v2652_v22, %v149_v38  ;;  %v321_v38 = vld [vmem:[%s3091_s3 + $0x20] sm:$0xff]  ;;  %587 = vmatpush.msra.mxu3 %v472_v62  ;;  %v639_v62 = vld [vmem:[#allocation5 + $0x88] sm:$0xff] }
  0x9b   :  { %vm180_vm7 = vcmp.eq.s32.totalorder %v2652_v22, %v146_v36  ;;  %v2698_v39 = vsel %vm181_vm8, 1.0, %v2496_v24 }
  0x9c   :  { %v2692_v37 = vsel %vm180_vm7, 1.0, %v2496_v24  ;;  %557 = vmatmul.f32.gmra.mxu2 %v320_v32  ;;  %588 = vmatpush.msra.mxu3 %v471_v63  ;;  %v663_v32 = vld [vmem:[#allocation5 + $0x148] sm:$0xff]  ;;  %v634_v63 = vld [vmem:[#allocation5 + $0x60] sm:$0xff] }
  0x9d   :  { %2233 = vmatmul.msk.f32.gmra.mxu0 %vm325_vm0, %v2668_v29 }
  0x9e   :  { %760 = vmatpush.msrb.mxu3 %v669_v16 }
  0xa1   :  { %v158_v59 = vpop.permute.xlu1 %157 }
  0xa2   :  { %v155_v49 = vpop.permute.xlu0 %154  ;;  %vm184_vm11 = vcmp.eq.s32.totalorder %v2652_v22, %v158_v59 }
  0xa3   :  { %vm183_vm10 = vcmp.eq.s32.totalorder %v2652_v22, %v155_v49  ;;  %v2716_v1 = vsel %vm184_vm11, 1.0, %v2496_v24  ;;  %v323_v49 = vld [vmem:[%s3091_s3 + $0x30] sm:$0xff] }
  0xa4   :  { %v2710_v55 = vsel %vm183_vm10, 1.0, %v2496_v24  ;;  %560 = vmatmul.f32.gmra.mxu2 %v321_v38  ;;  %v659_v38 = vld [vmem:[#allocation5 + $0x128] sm:$0xff] }
  0xa5   :  { %2234 = vmatmul.msk.f32.gmra.mxu0 %vm325_vm0, %v2674_v31 }
  0xa9   :  { %v167_v20 = vpop.permute.xlu1 %166 }
  0xaa   :  { %v164_v15 = vpop.permute.xlu0 %163  ;;  %vm187_vm14 = vcmp.eq.s32.totalorder %v2652_v22, %v167_v20  ;;  %v666_v20 = vld [vmem:[#allocation5 + $0x160] sm:$0xff] }
  0xab   :  { %vm186_vm13 = vcmp.eq.s32.totalorder %v2652_v22, %v164_v15  ;;  %v2740_v23 = vsel %vm187_vm14, 1.0, %v2496_v24  ;;  %v668_v15 = vld [vmem:[#allocation5 + $0x170] sm:$0xff]  ;;  %761 = vmatpush.msrb.mxu3 %v666_v20  ;;  %v2777_v20 = vld [vmem:[%s3093_s5] ss:$0 sm:$0xff] }
  0xac   :  { %v2731_v18 = vsel %vm186_vm13, 1.0, %v2496_v24  ;;  %719 = vmatpush.msrb.mxu2 %v668_v15  ;;  %v624_v15 = vld [vmem:[#allocation5 + $0x10] sm:$0xff] }
  0xad   :  { %2235 = vmatmul.msk.f32.gmra.mxu0 %vm325_vm0, %v2680_v33  ;;  %762 = vmatpush.msrb.mxu3 %v663_v32 }
  0xae   :  { %720 = vmatpush.msrb.mxu2 %v665_v19 }
  0xb0   :  { %721 = vmatpush.msrb.mxu2 %v662_v28 }
  0xb2   :  { %v173_v34 = vpop.permute.xlu0 %172  ;;  %722 = vmatpush.msrb.mxu2 %v659_v38 }
  0xb3   :  { %vm189_vm1 = vcmp.eq.s32.totalorder %v2652_v22, %v173_v34  ;;  %v322_v22 = vld [vmem:[%s3091_s3 + $0x28] sm:$0xff]  ;;  %v658_v34 = vld [vmem:[#allocation5 + $0x120] sm:$0xff]  ;;  %s2189_s3 = sshll.u32 %s2498_s26, 4  ;;  %s2190_s3 = int_to_ptr.vmem [resolvable:$true] %s2189_s3 }
  0xb4   :  { %v2758_v36 = vsel %vm189_vm1, 1.0, %v2496_v24  ;;  %563 = vmatmul.f32.gmra.mxu2 %v322_v22  ;;  %681 = vmatpush.msrb.mxu1 %v658_v34  ;;  %v657_v22 = vld [vmem:[#allocation5 + $0x118] sm:$0xff] }
  0xb5   :  { %2236 = vmatmul.msk.f32.gmra.mxu0 %vm325_vm0, %v2686_v35  ;;  %723 = vmatpush.msrb.mxu2 %v656_v42 }
  0xb6   :  { %682 = vmatpush.msrb.mxu1 %v655_v41 }
  0xb7   :  { %724 = vmatpush.msrb.mxu2 %v653_v44 }
  0xb8   :  { %683 = vmatpush.msrb.mxu1 %v652_v43 }
  0xb9   :  { %725 = vmatpush.msrb.mxu2 %v650_v48 }
  0xba   :  { %684 = vmatpush.msrb.mxu1 %v649_v47 }
  0xbb   :  { %726 = vmatpush.msrb.mxu2 %v647_v51 }
  0xbc   :  { %566 = vmatmul.f32.gmra.mxu2 %v323_v49  ;;  %v651_v49 = vld [vmem:[#allocation5 + $0xe8] sm:$0xff]  ;;  %685 = vmatpush.msrb.mxu1 %v646_v50 }
  0xbd   :  { %2237 = vmatmul.msk.f32.gmra.mxu0 %vm325_vm0, %v2692_v37  ;;  %727 = vmatpush.msrb.mxu2 %v644_v54 }
  0xbe   :  { %686 = vmatpush.msrb.mxu1 %v643_v53 }
  0xbf   :  { %728 = vmatpush.msrb.mxu2 %v641_v58 }
  0xc0   :  { %687 = vmatpush.msrb.mxu1 %v640_v57 }
  0xc1   :  { %729 = vmatpush.msrb.mxu2 %v638_v61 }
  0xc2   :  { %688 = vmatpush.msrb.mxu1 %v637_v60 }
  0xc3   :  { %v549_v17 = vpop.f32.mrf.mxu2 }
  0xc4   :  { %569 = vmatmul.f32.gmra.mxu2 %v324_v56  ;;  %v645_v56 = vld [vmem:[#allocation5 + $0xb8] sm:$0xff]  ;;  %689 = vmatpush.msrb.mxu1 %v634_v63 }
  0xc5   :  { %2238 = vmatmul.msk.f32.gmra.mxu0 %vm325_vm0, %v2698_v39 }
  0xcb   :  { %v552_v26 = vpop.f32.mrf.mxu2 }
  0xcd   :  { %2239 = vmatmul.msk.f32.gmra.mxu0 %vm325_vm0, %v2704_v45 }
  0xd5   :  { %2240 = vmatmul.msk.f32.gmra.mxu0 %vm325_vm0, %v2710_v55 }
  0xdd   :  { %2241 = vmatmul.msk.f32.gmra.mxu0 %vm325_vm0, %v2716_v1 }
  0xe5   :  { %2242 = vmatmul.msk.f32.gmra.mxu0 %vm325_vm0, %v2722_v11 }
  0xed   :  { %2243 = vmatmul.msk.f32.gmra.mxu0 %vm325_vm0, %v2731_v18 }
  0xf5   :  { %2244 = vmatmul.msk.f32.gmra.mxu0 %vm325_vm0, %v2740_v23 }
  0xfd   :  { %2245 = vmatmul.msk.f32.gmra.mxu0 %vm325_vm0, %v2749_v30 }
 0x105   :  { %2246 = vmatmul.msk.f32.gmra.mxu0 %vm325_vm0, %v2758_v36 }
 0x10a   :  { %v391_v40 = vpop.f32.mrf.mxu0 }
 0x10b   :  { %507 = vmatmul.f32.vlgmr.msra.gmra.mxu1 %v391_v40  ;;  %v660_v40 = vld [vmem:[#allocation5 + $0x130] sm:$0xff] }
 0x10c   :  { %763 = vmatpush.msrb.mxu3 %v660_v40 }
 0x10e   :  { %764 = vmatpush.msrb.mxu3 %v657_v22 }
 0x112   :  { %v394_v46 = vpop.f32.mrf.mxu0 }
 0x113   :  { %510 = vmatmul.f32.gmra.mxu1 %v394_v46  ;;  %v654_v46 = vld [vmem:[#allocation5 + $0x100] sm:$0xff] }
 0x114   :  { %765 = vmatpush.msrb.mxu3 %v654_v46 }
 0x116   :  { %766 = vmatpush.msrb.mxu3 %v651_v49 }
 0x117   :  { %v555_v41 = vpop.f32.mrf.mxu2 }
 0x11a   :  { %v397_v52 = vpop.f32.mrf.mxu0 }
 0x11b   :  { %513 = vmatmul.f32.gmra.mxu1 %v397_v52  ;;  %v648_v52 = vld [vmem:[#allocation5 + $0xd0] sm:$0xff] }
 0x11c   :  { %767 = vmatpush.msrb.mxu3 %v648_v52 }
 0x11e   :  { %768 = vmatpush.msrb.mxu3 %v645_v56 }
 0x11f   :  { %v558_v50 = vpop.f32.mrf.mxu2 }
 0x122   :  { %v400_v59 = vpop.f32.mrf.mxu0 }
 0x123   :  { %516 = vmatmul.f32.gmra.mxu1 %v400_v59  ;;  %v642_v59 = vld [vmem:[#allocation5 + $0xa0] sm:$0xff] }
 0x124   :  { %769 = vmatpush.msrb.mxu3 %v642_v59 }
 0x126   :  { %770 = vmatpush.msrb.mxu3 %v639_v62 }
 0x127   :  { %v561_v58 = vpop.f32.mrf.mxu2 }
 0x12a   :  { %v403_v0 = vpop.f32.mrf.mxu0 }
 0x12b   :  { %519 = vmatmul.f32.gmra.mxu1 %v403_v0  ;;  %v635_v0 = vld [vmem:[#allocation5 + $0x68] sm:$0xff] }
 0x12c   :  { %730 = vmatpush.msrb.mxu2 %v635_v0 }
 0x132   :  { %v406_v2 = vpop.f32.mrf.mxu0 }
 0x133   :  { %522 = vmatmul.f32.gmra.mxu1 %v406_v2  ;;  %v636_v2 = vld [vmem:[#allocation5 + $0x70] sm:$0xff] }
 0x134   :  { %771 = vmatpush.msrb.mxu3 %v636_v2 }
 0x13a   :  { %v409_v3 = vpop.f32.mrf.mxu0 }
 0x13b   :  { %525 = vmatmul.f32.gmra.mxu1 %v409_v3  ;;  %v631_v3 = vld [vmem:[#allocation5 + $0x48] sm:$0xff] }
 0x13c   :  { %690 = vmatpush.msrb.mxu1 %v631_v3  ;;  %v564_v3 = vpop.f32.mrf.mxu2 }
 0x142   :  { %v412_v4 = vpop.f32.mrf.mxu0 }
 0x143   :  { %528 = vmatmul.f32.gmra.mxu1 %v412_v4  ;;  %v632_v4 = vld [vmem:[#allocation5 + $0x50] sm:$0xff] }
 0x144   :  { %731 = vmatpush.msrb.mxu2 %v632_v4 }
 0x14a   :  { %v415_v5 = vpop.f32.mrf.mxu0 }
 0x14b   :  { %589 = vmatmul.f32.vlgmr.msra.gmra.mxu3 %v415_v5  ;;  %v633_v5 = vld [vmem:[#allocation5 + $0x58] sm:$0xff] }
 0x14c   :  { %772 = vmatpush.msrb.mxu3 %v633_v5 }
 0x152   :  { %v418_v6 = vpop.f32.mrf.mxu0 }
 0x153   :  { %592 = vmatmul.f32.gmra.mxu3 %v418_v6  ;;  %v628_v6 = vld [vmem:[#allocation5 + $0x30] sm:$0xff] }
 0x154   :  { %691 = vmatpush.msrb.mxu1 %v628_v6 }
 0x15a   :  { %v421_v7 = vpop.f32.mrf.mxu0 }
 0x15b   :  { %595 = vmatmul.f32.gmra.mxu3 %v421_v7  ;;  %v629_v7 = vld [vmem:[#allocation5 + $0x38] sm:$0xff] }
 0x15c   :  { %732 = vmatpush.msrb.mxu2 %v629_v7 }
 0x162   :  { %v424_v8 = vpop.f32.mrf.mxu0 }
 0x163   :  { %598 = vmatmul.f32.gmra.mxu3 %v424_v8  ;;  %v630_v8 = vld [vmem:[#allocation5 + $0x40] sm:$0xff] }
 0x164   :  { %773 = vmatpush.msrb.mxu3 %v630_v8 }
 0x16a   :  { %v427_v9 = vpop.f32.mrf.mxu0 }
 0x16b   :  { %601 = vmatmul.f32.gmra.mxu3 %v427_v9  ;;  %v625_v9 = vld [vmem:[#allocation5 + $0x18] sm:$0xff] }
 0x16c   :  { %692 = vmatpush.msrb.mxu1 %v625_v9 }
 0x172   :  { %v430_v10 = vpop.f32.mrf.mxu0 }
 0x173   :  { %604 = vmatmul.f32.gmra.mxu3 %v430_v10  ;;  %v626_v10 = vld [vmem:[#allocation5 + $0x20] sm:$0xff] }
 0x174   :  { %733 = vmatpush.msrb.mxu2 %v626_v10 }
 0x176   :  { %734 = vmatpush.msrb.mxu2 %v623_v14 }
 0x17a   :  { %v433_v12 = vpop.f32.mrf.mxu0 }
 0x17b   :  { %607 = vmatmul.f32.gmra.mxu3 %v433_v12  ;;  %v627_v12 = vld [vmem:[#allocation5 + $0x28] sm:$0xff] }
 0x17c   :  { %774 = vmatpush.msrb.mxu3 %v627_v12 }
 0x17e   :  { %775 = vmatpush.msrb.mxu3 %v624_v15 }
 0x182   :  { %v436_v13 = vpop.f32.mrf.mxu0 }
 0x183   :  { %610 = vmatmul.f32.gmra.mxu3 %v436_v13  ;;  %v622_v13 = vld [vmem:[#allocation5] sm:$0xff] }
 0x184   :  { %693 = vmatpush.msrb.mxu1 %v622_v13  ;;  %v567_v13 = vpop.f32.mrf.mxu2 }
 0x188   :  { %v508_v16 = vpop.f32.mrf.mxu1 }
 0x189   :  { %v509_v28 = vadd.f32 %v2777_v20, %v508_v16 }
 0x18b   :  { %v550_v34 = vadd.f32 %v549_v17, %v509_v28 }
 0x190   :  { %v511_v19 = vpop.f32.mrf.mxu1 }
 0x191   :  { %v512_v42 = vadd.f32 %v2777_v20, %v511_v19 }
 0x193   :  { %v553_v43 = vadd.f32 %v552_v26, %v512_v42 }
 0x198   :  { %v514_v32 = vpop.f32.mrf.mxu1 }
 0x199   :  { %v515_v48 = vadd.f32 %v2777_v20, %v514_v32 }
 0x19b   :  { %v556_v51 = vadd.f32 %v555_v41, %v515_v48 }
 0x1a0   :  { %v517_v44 = vpop.f32.mrf.mxu1 }
 0x1a1   :  { %v518_v56 = vadd.f32 %v2777_v20, %v517_v44 }
 0x1a3   :  { %v559_v59 = vadd.f32 %v558_v50, %v518_v56 }
 0x1a8   :  { %v520_v54 = vpop.f32.mrf.mxu1 }
 0x1a9   :  { %v521_v62 = vadd.f32 %v2777_v20, %v520_v54 }
 0x1ab   :  { %v562_v2 = vadd.f32 %v561_v58, %v521_v62  ;;  %v2828_v62 = vld [vmem:[%s3095_s7] sm:$0x7] }
 0x1b0   :  { %v523_v0 = vpop.f32.mrf.mxu1 }
 0x1b1   :  { %v524_v6 = vadd.f32 %v2777_v20, %v523_v0 }
 0x1b3   :  { %v565_v9 = vadd.f32 %v564_v3, %v524_v6 }
 0x1b8   :  { %v526_v8 = vpop.f32.mrf.mxu1 }
 0x1b9   :  { %v527_v14 = vadd.f32 %v2777_v20, %v526_v8 }
 0x1bb   :  { %v568_v16 = vadd.f32 %v567_v13, %v527_v14 }
 0x1c0   :  { %v529_v17 = vpop.f32.mrf.mxu1 }
 0x1c1   :  { %v530_v28 = vadd.f32 %v2777_v20, %v529_v17 }
 0x1ce   :  { %v590_v38 = vpop.f32.mrf.mxu3 }
 0x1cf   :  { %v591_v40 = vadd.f32 %v590_v38, %v550_v34  ;;  %v570_v34 = vpop.f32.mrf.mxu2 }
 0x1d0   :  { %v571_v38 = vadd.f32 %v570_v34, %v530_v28 }
 0x1d1   :  { %v614_v22 = vmax.f32 %v591_v40, 0.0 }
 0x1d3   :  { %694 = vmatmul.f32.vlgmr.msrb.gmra.mxu1 %v614_v22  ;;  %735 = vmatmul.f32.vlgmr.msrb.gmra.mxu2 %v614_v22 }
 0x1d4   :  { %776 = vmatmul.f32.vlgmr.msrb.gmra.mxu3 %v614_v22 }
 0x1d6   :  { %v593_v46 = vpop.f32.mrf.mxu3 }
 0x1d7   :  { %v594_v47 = vadd.f32 %v593_v46, %v553_v43 }
 0x1d9   :  { %v615_v49 = vmax.f32 %v594_v47, 0.0 }
 0x1db   :  { %697 = vmatmul.f32.gmra.mxu1 %v615_v49  ;;  %738 = vmatmul.f32.gmra.mxu2 %v615_v49 }
 0x1dc   :  { %779 = vmatmul.f32.gmra.mxu3 %v615_v49 }
 0x1de   :  { %v596_v52 = vpop.f32.mrf.mxu3 }
 0x1df   :  { %v597_v53 = vadd.f32 %v596_v52, %v556_v51  ;;  %v2794_v51 = vshrl.u32 %v108_v21, 7  ;;  %v2799_v52 = vld [vmem:[%s3089_s1] ss:$0 sm:$0xff] }
 0x1e1   :  { %v616_v57 = vmax.f32 %v597_v53, 0.0  ;;  %vm229_vm2 = vcmp.eq.s32.totalorder %v2794_v51, %v2799_v52 }
 0x1e2   :  { %v2227_v53 = vsel %vm229_vm2, 1.0, %v2496_v24 }
 0x1e3   :  { %700 = vmatmul.f32.gmra.mxu1 %v616_v57  ;;  %741 = vmatmul.f32.gmra.mxu2 %v616_v57 }
 0x1e4   :  { %782 = vmatmul.f32.gmra.mxu3 %v616_v57  ;;  %241 = vadd.xlane.f32.xlu1 %v2227_v53  ;;  %v2808_v57 = vadd.s32 8, %v2794_v51 }
 0x1e6   :  { %v599_v60 = vpop.f32.mrf.mxu3  ;;  %vm230_vm3 = vcmp.eq.s32.totalorder %v2808_v57, %v2799_v52  ;;  %v2052_v57 = vld [vmem:[#allocation7 + $0x108] sm:$0xff] }
 0x1e7   :  { %v600_v61 = vadd.f32 %v599_v60, %v559_v59  ;;  %v2228_v21 = vsel %vm230_vm3, 1.0, %v2496_v24  ;;  %v2817_v60 = vadd.s32 16, %v2794_v51 }
 0x1e8   :  { %243 = vadd.xlane.f32.xlu2 %v2228_v21 }
 0x1e9   :  { %v617_v63 = vmax.f32 %v600_v61, 0.0  ;;  %vm231_vm4 = vcmp.eq.s32.totalorder %v2817_v60, %v2799_v52 }
 0x1ea   :  { %v2229_v61 = vsel %vm231_vm4, 1.0, %v2496_v24 }
 0x1eb   :  { %703 = vmatmul.f32.gmra.mxu1 %v617_v63  ;;  %744 = vmatmul.f32.gmra.mxu2 %v617_v63 }
 0x1ec   :  { %785 = vmatmul.f32.gmra.mxu3 %v617_v63  ;;  %245 = vadd.xlane.f32.xlu0 %v2229_v61  ;;  %v674_v63 = vperm.slane %v2828_v62, 2 }
 0x1ee   :  { %v602_v4 = vpop.f32.mrf.mxu3 }
 0x1ef   :  { %v603_v5 = vadd.f32 %v602_v4, %v562_v2 }
 0x1f1   :  { %v618_v7 = vmax.f32 %v603_v5, 0.0  ;;  %v2832_v5 = vadd.s32 24, %v2794_v51  ;;  %v2054_v51 = vld [vmem:[#allocation7 + $0x118] sm:$0xff] }
 0x1f3   :  { %706 = vmatmul.f32.gmra.mxu1 %v618_v7  ;;  %747 = vmatmul.f32.gmra.mxu2 %v618_v7  ;;  %vm232_vm5 = vcmp.eq.s32.totalorder %v2832_v5, %v2799_v52  ;;  %v2115_v52 = vld [vmem:[#allocation8 + $0x148] sm:$0xff]  ;;  %v2114_v5 = vld [vmem:[#allocation8 + $0x140] sm:$0xff] }
 0x1f4   :  { %788 = vmatmul.f32.gmra.mxu3 %v618_v7 }
 0x1f6   :  { %v605_v10 = vpop.f32.mrf.mxu3 }
 0x1f7   :  { %v606_v12 = vadd.f32 %v605_v10, %v565_v9  ;;  %v2230_v10 = vsel %vm232_vm5, 1.0, %v2496_v24 }
 0x1f8   :  { %247 = vadd.xlane.f32.xlu2 %v2230_v10  ;;  %v861_v10 = vld [vmem:[#allocation7 + $0x18] sm:$0xff] }
 0x1f9   :  { %v619_v15 = vmax.f32 %v606_v12, 0.0 }
 0x1fb   :  { %709 = vmatmul.f32.gmra.mxu1 %v619_v15  ;;  %750 = vmatmul.f32.gmra.mxu2 %v619_v15 }
 0x1fc   :  { %791 = vmatmul.f32.gmra.mxu3 %v619_v15 }
 0x1fe   :  { %v608_v19 = vpop.f32.mrf.mxu3 }
 0x1ff   :  { %v609_v26 = vadd.f32 %v608_v19, %v568_v16 }
 0x201   :  { %v620_v32 = vmax.f32 %v609_v26, 0.0  ;;  %v672_v26 = vperm.slane %v2828_v62, 0 }
 0x203   :  { %712 = vmatmul.f32.gmra.mxu1 %v620_v32  ;;  %753 = vmatmul.f32.gmra.mxu2 %v620_v32 }
 0x204   :  { %794 = vmatmul.f32.gmra.mxu3 %v620_v32 }
 0x206   :  { %v611_v40 = vpop.f32.mrf.mxu3 }
 0x207   :  { %v612_v41 = vadd.f32 %v611_v40, %v571_v38 }
 0x209   :  { %v621_v42 = vmax.f32 %v612_v41, 0.0 }
 0x20b   :  { %715 = vmatmul.f32.gmra.mxu1 %v621_v42  ;;  %756 = vmatmul.f32.gmra.mxu2 %v621_v42 }
 0x20c   :  { %797 = vmatmul.f32.gmra.mxu3 %v621_v42 }
 0x250   :  { %v2787_v22 = vpop.f32.mrf.mxu1 }
 0x257   :  { %v777_v43 = vpop.f32.mrf.mxu3 }
 0x258   :  { %v2789_v44 = vpop.f32.mrf.mxu1  ;;  %v778_v28 = vadd.f32 %v777_v43, %v674_v63 }
 0x25a   :  { %v803_v40 = vmax.f32 %v778_v28, 0.0  ;;  %v1059_v28 = vld [vmem:[#allocation2 + $0x268] sm:$0xff] }
 0x25f   :  { %v780_v46 = vpop.f32.mrf.mxu3 }
 0x260   :  { %v2791_v20 = vpop.f32.mrf.mxu1  ;;  %v781_v16 = vadd.f32 %v780_v46, %v674_v63 }
 0x261   :  { %v702_v53 = vadd.f32 %v2791_v20, %v672_v26  ;;  %v871_v20 = vld [vmem:[#allocation7 + $0x68] sm:$0xff] }
 0x262   :  { %v806_v38 = vmax.f32 %v781_v16, 0.0  ;;  %v858_v16 = vld [vmem:[#allocation7] sm:$0xff] }
 0x267   :  { %v783_v47 = vpop.f32.mrf.mxu3 }
 0x268   :  { %v704_v49 = vpop.f32.mrf.mxu1  ;;  %v784_v14 = vadd.f32 %v783_v47, %v674_v63 }
 0x26a   :  { %v809_v32 = vmax.f32 %v784_v14, 0.0  ;;  %v859_v14 = vld [vmem:[#allocation7 + $0x8] sm:$0xff] }
 0x26f   :  { %v786_v48 = vpop.f32.mrf.mxu3 }
 0x270   :  { %v707_v54 = vpop.f32.mrf.mxu1  ;;  %v787_v12 = vadd.f32 %v786_v48, %v674_v63  ;;  %v705_v48 = vadd.f32 %v704_v49, %v672_v26  ;;  %v2497_v49 = vmov 1.0  }
 0x271   :  { %v708_v47 = vadd.f32 %v707_v54, %v672_v26 }
 0x272   :  { %v812_v17 = vmax.f32 %v787_v12, 0.0  ;;  %v810_v21 = vmax.f32 %v705_v48, 0.0  ;;  %v860_v12 = vld [vmem:[#allocation7 + $0x10] sm:$0xff]  ;;  %v1054_v48 = vld [vmem:[#allocation2 + $0x240] sm:$0xff] }
 0x273   :  { %v813_v43 = vmax.f32 %v708_v47, 0.0  ;;  %v1055_v47 = vld [vmem:[#allocation2 + $0x248] sm:$0xff] }
 0x277   :  { %v789_v50 = vpop.f32.mrf.mxu3 }
 0x278   :  { %v710_v58 = vpop.f32.mrf.mxu1  ;;  %v790_v8 = vadd.f32 %v789_v50, %v674_v63 }
 0x279   :  { %v711_v41 = vadd.f32 %v710_v58, %v672_v26  ;;  %v807_v58 = vmax.f32 %v702_v53, 0.0 }
 0x27a   :  { %v815_v15 = vmax.f32 %v790_v8, 0.0  ;;  %v863_v8 = vld [vmem:[#allocation7 + $0x28] sm:$0xff] }
 0x27b   :  { %v816_v50 = vmax.f32 %v711_v41, 0.0 }
 0x27f   :  { %v792_v56 = vpop.f32.mrf.mxu3 }
 0x280   :  { %v713_v4 = vpop.f32.mrf.mxu1  ;;  %v793_v6 = vadd.f32 %v792_v56, %v674_v63  ;;  %v699_v56 = vadd.f32 %v2789_v44, %v672_v26  ;;  %v872_v44 = vld [vmem:[#allocation7 + $0x70] sm:$0xff] }
 0x281   :  { %v714_v24 = vadd.f32 %v713_v4, %v672_v26  ;;  %v866_v4 = vld [vmem:[#allocation7 + $0x40] sm:$0xff] }
 0x282   :  { %v818_v13 = vmax.f32 %v793_v6, 0.0  ;;  %v804_v61 = vmax.f32 %v699_v56, 0.0  ;;  %v865_v6 = vld [vmem:[#allocation7 + $0x38] sm:$0xff]  ;;  %v1052_v56 = vld [vmem:[#allocation2 + $0x230] sm:$0xff] }
 0x283   :  { %v819_v46 = vmax.f32 %v714_v24, 0.0  ;;  %v1057_v24 = vld [vmem:[#allocation2 + $0x258] sm:$0xff] }
 0x287   :  { %v795_v59 = vpop.f32.mrf.mxu3 }
 0x288   :  { %v796_v2 = vadd.f32 %v795_v59, %v674_v63  ;;  %v716_v19 = vpop.f32.mrf.mxu1  ;;  %v696_v59 = vadd.f32 %v2787_v22, %v672_v26  ;;  %v873_v22 = vld [vmem:[#allocation7 + $0x78] sm:$0xff] }
 0x289   :  { %v717_v34 = vadd.f32 %v716_v19, %v672_v26  ;;  %878 = vmatpush.msra.mxu1 %v873_v22  ;;  %v1060_v19 = vld [vmem:[#allocation2 + $0x270] sm:$0xff]  ;;  %v244_v26 = vpop.xlane.xlu2 %243 }
 0x28a   :  { %v821_v9 = vmax.f32 %v796_v2, 0.0  ;;  %v801_v54 = vmax.f32 %v696_v59, 0.0  ;;  %v868_v2 = vld [vmem:[#allocation7 + $0x50] sm:$0xff] }
 0x28b   :  { %v822_v42 = vmax.f32 %v717_v34, 0.0  ;;  %879 = vmatpush.msra.mxu1 %v872_v44  ;;  %v1058_v34 = vld [vmem:[#allocation2 + $0x260] sm:$0xff] }
 0x28c   :  { %v1050_v44 = vld [vmem:[#allocation2 + $0x220] sm:$0xff] }
 0x28d   :  { %880 = vmatpush.msra.mxu1 %v871_v20 }
 0x28f   :  { %v798_v0 = vpop.f32.mrf.mxu3 }
 0x290   :  { %v799_v3 = vadd.f32 %v798_v0, %v674_v63  ;;  %v870_v63 = vld [vmem:[#allocation7 + $0x60] sm:$0xff]  ;;  %v869_v0 = vld [vmem:[#allocation7 + $0x58] sm:$0xff] }
 0x291   :  { %881 = vmatpush.msra.mxu1 %v870_v63  ;;  %v248_v59 = vpop.xlane.xlu2 %247 }
 0x292   :  { %v824_v7 = vmax.f32 %v799_v3, 0.0  ;;  %v867_v3 = vld [vmem:[#allocation7 + $0x48] sm:$0xff] }
 0x293   :  { %882 = vmatpush.msra.mxu1 %v869_v0 }
 0x294   :  { %825 = vmatpush.msrb.mxu0 %v824_v7  ;;  %v864_v7 = vld [vmem:[#allocation7 + $0x30] sm:$0xff] }
 0x295   :  { %883 = vmatpush.msra.mxu1 %v868_v2 }
 0x296   :  { %826 = vmatpush.msrb.mxu0 %v821_v9  ;;  %v862_v9 = vld [vmem:[#allocation7 + $0x20] sm:$0xff] }
 0x297   :  { %884 = vmatpush.msra.mxu1 %v867_v3 }
 0x298   :  { %827 = vmatpush.msrb.mxu0 %v818_v13  ;;  %v242_v13 = vpop.xlane.xlu1 %241 }
 0x299   :  { %885 = vmatpush.msra.mxu1 %v866_v4  ;;  %v1049_v4 = vld [vmem:[#allocation2 + $0x218] sm:$0xff] }
 0x29a   :  { %828 = vmatpush.msrb.mxu0 %v815_v15  ;;  %v249_v15 = vmax.f32 %v242_v13, 1.0  ;;  %v1046_v13 = vld [vmem:[#allocation2 + $0x200] sm:$0xff] }
 0x29b   :  { %886 = vmatpush.msra.mxu1 %v865_v6  ;;  %v1048_v6 = vld [vmem:[#allocation2 + $0x210] sm:$0xff] }
 0x29c   :  { %829 = vmatpush.msrb.mxu0 %v812_v17  ;;  %v1061_v17 = vld [vmem:[#allocation2 + $0x278] sm:$0xff]  ;;  %2325 = vrcp.f32 %v249_v15  ;;  %vm258_vm6 = vweird.f32 %v249_v15  ;;  %v264_v22 = vand.u32 2147483648, %v249_v15  ;;  %v262_v0 = vand.u32 2147483647, %v249_v15 }
 0x29d   :  { %887 = vmatpush.msra.mxu1 %v864_v7 }
 0x29e   :  { %830 = vmatpush.msrb.mxu0 %v809_v32  ;;  %v2860_v32 = vmax.f32 %v244_v26, 1.0  ;;  %v265_v7 = vor.u32 1.1754944e-38, %v264_v22  ;;  %vm263_vm9 = vcmp.eq.f32.partialorder %v262_v0, 8.507059e+37 }
 0x29f   :  { %888 = vmatpush.msra.mxu1 %v863_v8 }
 0x2a0   :  { %831 = vmatpush.msrb.mxu0 %v806_v38  ;;  %2327 = vrcp.f32 %v2860_v32  ;;  %vm273_vm10 = vweird.f32 %v2860_v32 }
 0x2a1   :  { %889 = vmatpush.msra.mxu1 %v862_v9 }
 0x2a2   :  { %832 = vmatpush.msrb.mxu0 %v803_v40  ;;  %v2326_v38 = vpop.eup %2325  ;;  %v1056_v40 = vld [vmem:[#allocation2 + $0x250] sm:$0xff] }
 0x2a3   :  { %890 = vmatpush.msra.mxu1 %v861_v10  ;;  %v254_v41 = vmul.f32 %v2326_v38, %v249_v15  ;;  %vm259_vm7 = vweird.f32 %v2326_v38 }
 0x2a4   :  { %833 = vmatpush.msrb.mxu0 %v822_v42  ;;  %v246_v42 = vpop.xlane.xlu0 %245  ;;  %vm2869_vm8 = vmor %vm258_vm6, %vm259_vm7 }
 0x2a5   :  { %891 = vmatpush.msra.mxu1 %v860_v12  ;;  %v1047_v12 = vld [vmem:[#allocation2 + $0x208] sm:$0xff] }
 0x2a6   :  { %834 = vmatpush.msrb.mxu0 %v819_v46  ;;  %v2863_v46 = vmax.f32 %v246_v42, 1.0  ;;  %v2328_v53 = vpop.eup %2327 }
 0x2a7   :  { %892 = vmatpush.msra.mxu1 %v859_v14  ;;  %vm274_vm11 = vweird.f32 %v2328_v53 }
 0x2a8   :  { %835 = vmatpush.msrb.mxu0 %v816_v50  ;;  %v255_v50 = vsub.f32 1.0, %v254_v41  ;;  %2329 = vrcp.f32 %v2863_v46  ;;  %vm275_vm12 = vmor %vm273_vm10, %vm274_vm11  ;;  %vm288_vm14 = vweird.f32 %v2863_v46 }
 0x2a9   :  { %893 = vmatpush.msra.mxu1 %v858_v16  ;;  %v279_v16 = vand.u32 2147483648, %v2860_v32 }
 0x2aa   :  { %836 = vmatpush.msrb.mxu0 %v813_v43  ;;  %v1053_v43 = vld [vmem:[#allocation2 + $0x238] sm:$0xff] }
 0x2ab   :  { %1124 = vmatpush.msrb.mxu1 %v1061_v17 }
 0x2ac   :  { %837 = vmatpush.msrb.mxu0 %v810_v21  ;;  %v269_v21 = vmul.f32 %v2328_v53, %v2860_v32 }
 0x2ad   :  { %1125 = vmatpush.msrb.mxu1 %v1060_v19 }
 0x2ae   :  { %838 = vmatpush.msrb.mxu0 %v807_v58  ;;  %v256_v58 = vmul.f32 %v2326_v38, %v255_v50  ;;  %v270_v20 = vsub.f32 1.0, %v269_v21  ;;  %v2330_v2 = vpop.eup %2329  ;;  %v736_v21 = vpop.f32.mrf.mxu2 }
 0x2af   :  { %1126 = vmatpush.msrb.mxu1 %v1059_v28  ;;  %v284_v8 = vmul.f32 %v2330_v2, %v2863_v46  ;;  %v277_v28 = vand.u32 2147483647, %v2860_v32  ;;  %vm289_vm15 = vweird.f32 %v2330_v2 }
 0x2b0   :  { %839 = vmatpush.msrb.mxu0 %v804_v61  ;;  %v1051_v61 = vld [vmem:[#allocation2 + $0x228] sm:$0xff]  ;;  %v257_v63 = vadd.f32 %v2326_v38, %v256_v58  ;;  %v271_v10 = vmul.f32 %v2328_v53, %v270_v20  ;;  %vm290_vm1 = vmor %vm288_vm14, %vm289_vm15 }
 0x2b1   :  { %1127 = vmatpush.msrb.mxu1 %v1058_v34  ;;  %v285_v17 = vsub.f32 1.0, %v284_v8  ;;  %vm278_vm13 = vcmp.eq.f32.partialorder %v277_v28, 8.507059e+37 }
 0x2b2   :  { %840 = vmatpush.msrb.mxu0 %v801_v54  ;;  %v2867_v54 = vmax.f32 %v248_v59, 1.0  ;;  %v261_v9 = vsel %vm2869_vm8, %v2326_v38, %v257_v63  ;;  %v272_v26 = vadd.f32 %v2328_v53, %v271_v10  ;;  %v280_v38 = vor.u32 1.1754944e-38, %v279_v16 }
 0x2b3   :  { %2247 = vmatmul.msk.f32.vlgmr.msrb.gmra.mxu0 %vm229_vm2, %v2497_v49  ;;  %1128 = vmatpush.msrb.mxu1 %v1057_v24  ;;  %v2878_v14 = vsel %vm263_vm9, %v265_v7, %v261_v9  ;;  %v286_v41 = vmul.f32 %v2330_v2, %v285_v17  ;;  %v673_v7 = vperm.slane %v2828_v62, 1  ;;  %v925_v62 = vld [vmem:[#allocation8 + $0x70] sm:$0xff] }
 0x2b4   :  { %2331 = vrcp.f32 %v2867_v54  ;;  %vm303_vm7 = vweird.f32 %v2867_v54 }
 0x2b5   :  { %1129 = vmatpush.msrb.mxu1 %v1056_v40  ;;  %v276_v40 = vsel %vm275_vm12, %v2328_v53, %v272_v26  ;;  %v737_v9 = vadd.f32 %v736_v21, %v673_v7 }
 0x2b7   :  { %1130 = vmatpush.msrb.mxu1 %v1055_v47  ;;  %v2885_v47 = vsel %vm278_vm13, %v280_v38, %v276_v40 }
 0x2b9   :  { %1131 = vmatpush.msrb.mxu1 %v1054_v48  ;;  %v294_v48 = vand.u32 2147483648, %v2863_v46 }
 0x2ba   :  { %v2332_v34 = vpop.eup %2331 }
 0x2bb   :  { %2248 = vmatmul.msk.f32.gmra.mxu0 %vm230_vm3, %v2497_v49  ;;  %1132 = vmatpush.msrb.mxu1 %v1053_v43  ;;  %v299_v24 = vmul.f32 %v2332_v34, %v2867_v54  ;;  %v287_v43 = vadd.f32 %v2330_v2, %v286_v41  ;;  %v295_v53 = vor.u32 1.1754944e-38, %v294_v48  ;;  %vm304_vm8 = vweird.f32 %v2332_v34  ;;  %v923_v41 = vld [vmem:[#allocation8 + $0x60] sm:$0xff]  ;;  %v922_v48 = vld [vmem:[#allocation8 + $0x58] sm:$0xff] }
 0x2bc   :  { %vm305_vm9 = vmor %vm303_vm7, %vm304_vm8 }
 0x2bd   :  { %1133 = vmatpush.msrb.mxu1 %v1052_v56  ;;  %v300_v50 = vsub.f32 1.0, %v299_v24  ;;  %v292_v56 = vand.u32 2147483647, %v2863_v46  ;;  %v291_v59 = vsel %vm290_vm1, %v2330_v2, %v287_v43  ;;  %v307_v46 = vand.u32 2147483647, %v2867_v54  ;;  %v739_v2 = vpop.f32.mrf.mxu2  ;;  %v924_v24 = vld [vmem:[#allocation8 + $0x68] sm:$0xff] }
 0x2be   :  { %v920_v43 = vld [vmem:[#allocation8 + $0x48] sm:$0xff] }
 0x2bf   :  { %1134 = vmatpush.msrb.mxu1 %v1051_v61  ;;  %vm293_vm6 = vcmp.eq.f32.partialorder %v292_v56, 8.507059e+37  ;;  %v301_v58 = vmul.f32 %v2332_v34, %v300_v50  ;;  %vm308_vm10 = vcmp.eq.f32.partialorder %v307_v46, 8.507059e+37  ;;  %v921_v50 = vld [vmem:[#allocation8 + $0x50] sm:$0xff]  ;;  %v919_v56 = vld [vmem:[#allocation8 + $0x40] sm:$0xff]  ;;  %v914_v46 = vld [vmem:[#allocation8 + $0x18] sm:$0xff] }
 0x2c0   :  { %v2891_v22 = vsel %vm293_vm6, %v295_v53, %v291_v59  ;;  %v918_v59 = vld [vmem:[#allocation8 + $0x38] sm:$0xff] }
 0x2c1   :  { %1135 = vmatpush.msrb.mxu1 %v1050_v44  ;;  %v309_v44 = vand.u32 2147483648, %v2867_v54  ;;  %v302_v63 = vadd.f32 %v2332_v34, %v301_v58  ;;  %v917_v58 = vld [vmem:[#allocation8 + $0x30] sm:$0xff] }
 0x2c3   :  { %2249 = vmatmul.msk.f32.gmra.mxu0 %vm231_vm4, %v2497_v49  ;;  %1136 = vmatpush.msrb.mxu1 %v1049_v4  ;;  %v310_v0 = vor.u32 1.1754944e-38, %v309_v44  ;;  %v306_v3 = vsel %vm305_vm9, %v2332_v34, %v302_v63  ;;  %v926_v34 = vld [vmem:[#allocation8 + $0x78] sm:$0xff]  ;;  %v916_v44 = vld [vmem:[#allocation8 + $0x28] sm:$0xff] }
 0x2c4   :  { %931 = vmatpush.msra.mxu2 %v926_v34 }
 0x2c5   :  { %1137 = vmatpush.msrb.mxu1 %v1048_v6  ;;  %v2896_v6 = vsel %vm308_vm10, %v310_v0, %v306_v3  ;;  %v742_v10 = vpop.f32.mrf.mxu2 }
 0x2c6   :  { %v743_v16 = vadd.f32 %v742_v10, %v673_v7  ;;  %932 = vmatpush.msra.mxu2 %v925_v62  ;;  %v2317_v10 = vld [vmem:[%s3097_s9] ss:$0 sm:$0xff] }
 0x2c7   :  { %1138 = vmatpush.msrb.mxu1 %v1047_v12  ;;  %v802_v12 = vmax.f32 %v737_v9, 0.0  ;;  %v911_v9 = vld [vmem:[#allocation8] sm:$0xff] }
 0x2c8   :  { %v808_v17 = vmax.f32 %v743_v16, 0.0  ;;  %933 = vmatpush.msra.mxu2 %v924_v24 }
 0x2c9   :  { %1139 = vmatpush.msrb.mxu1 %v1046_v13  ;;  %v740_v13 = vadd.f32 %v739_v2, %v673_v7 }
 0x2ca   :  { %934 = vmatpush.msra.mxu2 %v923_v41  ;;  %v2318_v41 = vld [vmem:[%s3099_s11] ss:$0 sm:$0xff] }
 0x2cb   :  { %2250 = vmatmul.msk.f32.gmra.mxu0 %vm232_vm5, %v2497_v49  ;;  %v805_v54 = vmax.f32 %v740_v13, 0.0 }
 0x2cc   :  { %935 = vmatpush.msra.mxu2 %v922_v48 }
 0x2ce   :  { %936 = vmatpush.msra.mxu2 %v921_v50 }
 0x2d0   :  { %937 = vmatpush.msra.mxu2 %v920_v43 }
 0x2d2   :  { %938 = vmatpush.msra.mxu2 %v919_v56 }
 0x2d4   :  { %939 = vmatpush.msra.mxu2 %v918_v59 }
 0x2d6   :  { %940 = vmatpush.msra.mxu2 %v917_v58  ;;  %v1045_v58 = vld [vmem:[#allocation2 + $0x1f8] sm:$0xff] }
 0x2d7   :  { %1083 = vmatpush.msra.mxu0 %v1045_v58 }
 0x2d8   :  { %941 = vmatpush.msra.mxu2 %v916_v44  ;;  %v1043_v44 = vld [vmem:[#allocation2 + $0x1e8] sm:$0xff] }
 0x330   :  { %v842_v15 = vpop.f32.mrf.mxu0 }
 0x331   :  { %v854_v19 = vmul.f32 %v842_v15, %v2878_v14  ;;  %v745_v15 = vpop.f32.mrf.mxu2 }
 0x332   :  { %v746_v26 = vadd.f32 %v745_v15, %v673_v7 }
 0x333   :  { %894 = vmatmul.f32.vlgmr.msra.gmra.mxu1 %v854_v19 }
 0x334   :  { %v811_v28 = vmax.f32 %v746_v26, 0.0 }
 0x338   :  { %v845_v42 = vpop.f32.mrf.mxu0 }
 0x339   :  { %v855_v32 = vmul.f32 %v845_v42, %v2885_v47  ;;  %v748_v19 = vpop.f32.mrf.mxu2 }
 0x33a   :  { %v749_v38 = vadd.f32 %v748_v19, %v673_v7 }
 0x33b   :  { %897 = vmatmul.f32.gmra.mxu1 %v855_v32 }
 0x33c   :  { %v814_v42 = vmax.f32 %v749_v38, 0.0 }
 0x340   :  { %v848_v61 = vpop.f32.mrf.mxu0 }
 0x341   :  { %v856_v20 = vmul.f32 %v848_v61, %v2891_v22  ;;  %v751_v40 = vpop.f32.mrf.mxu2 }
 0x342   :  { %v752_v32 = vadd.f32 %v751_v40, %v673_v7 }
 0x343   :  { %900 = vmatmul.f32.gmra.mxu1 %v856_v20  ;;  %v915_v20 = vld [vmem:[#allocation8 + $0x20] sm:$0xff] }
 0x344   :  { %v817_v53 = vmax.f32 %v752_v32, 0.0  ;;  %942 = vmatpush.msra.mxu2 %v915_v20  ;;  %v1042_v20 = vld [vmem:[#allocation2 + $0x1e0] sm:$0xff] }
 0x346   :  { %943 = vmatpush.msra.mxu2 %v914_v46  ;;  %v1040_v46 = vld [vmem:[#allocation2 + $0x1d0] sm:$0xff] }
 0x348   :  { %v851_v4 = vpop.f32.mrf.mxu0 }
 0x349   :  { %v857_v8 = vmul.f32 %v851_v4, %v2896_v6  ;;  %v754_v21 = vpop.f32.mrf.mxu2  ;;  %v913_v4 = vld [vmem:[#allocation8 + $0x10] sm:$0xff] }
 0x34a   :  { %v755_v61 = vadd.f32 %v754_v21, %v673_v7  ;;  %944 = vmatpush.msra.mxu2 %v913_v4  ;;  %v1036_v4 = vld [vmem:[#allocation2 + $0x1b0] sm:$0xff] }
 0x34b   :  { %903 = vmatmul.f32.gmra.mxu1 %v857_v8  ;;  %v912_v8 = vld [vmem:[#allocation8 + $0x8] sm:$0xff] }
 0x34c   :  { %v820_v63 = vmax.f32 %v755_v61, 0.0  ;;  %945 = vmatpush.msra.mxu2 %v912_v8  ;;  %v1044_v61 = vld [vmem:[#allocation2 + $0x1f0] sm:$0xff]  ;;  %v1035_v8 = vld [vmem:[#allocation2 + $0x1a8] sm:$0xff] }
 0x34d   :  { %1084 = vmatpush.msra.mxu0 %v1044_v61 }
 0x34e   :  { %946 = vmatpush.msra.mxu2 %v911_v9  ;;  %v1034_v9 = vld [vmem:[#allocation2 + $0x1a0] sm:$0xff] }
 0x34f   :  { %1085 = vmatpush.msra.mxu0 %v1043_v44 }
 0x351   :  { %v757_v0 = vpop.f32.mrf.mxu2  ;;  %1086 = vmatpush.msra.mxu0 %v1042_v20 }
 0x352   :  { %v758_v3 = vadd.f32 %v757_v0, %v673_v7  ;;  %v1039_v0 = vld [vmem:[#allocation2 + $0x1c8] sm:$0xff] }
 0x353   :  { %1140 = vmatmul.f32.vlgmr.msrb.gmra.mxu1 %v802_v12 }
 0x354   :  { %v823_v2 = vmax.f32 %v758_v3, 0.0  ;;  %v1038_v3 = vld [vmem:[#allocation2 + $0x1c0] sm:$0xff] }
 0x35b   :  { %1143 = vmatmul.f32.gmra.mxu1 %v805_v54 }
 0x363   :  { %1146 = vmatmul.f32.gmra.mxu1 %v808_v17 }
 0x36b   :  { %1149 = vmatmul.f32.gmra.mxu1 %v811_v28 }
 0x373   :  { %1152 = vmatmul.f32.gmra.mxu1 %v814_v42 }
 0x37b   :  { %1155 = vmatmul.f32.gmra.mxu1 %v817_v53 }
 0x383   :  { %1158 = vmatmul.f32.gmra.mxu1 %v820_v63  ;;  %v1041_v63 = vld [vmem:[#allocation2 + $0x1d8] sm:$0xff] }
 0x384   :  { %1087 = vmatpush.msra.mxu0 %v1041_v63 }
 0x386   :  { %1088 = vmatpush.msra.mxu0 %v1040_v46 }
 0x388   :  { %1089 = vmatpush.msra.mxu0 %v1039_v0 }
 0x38a   :  { %1090 = vmatpush.msra.mxu0 %v1038_v3 }
 0x38b   :  { %1161 = vmatmul.f32.gmra.mxu1 %v823_v2  ;;  %v1037_v2 = vld [vmem:[#allocation2 + $0x1b8] sm:$0xff] }
 0x38c   :  { %1091 = vmatpush.msra.mxu0 %v1037_v2 }
 0x38e   :  { %1092 = vmatpush.msra.mxu0 %v1036_v4 }
 0x390   :  { %1093 = vmatpush.msra.mxu0 %v1035_v8  ;;  %v1260_v8 = vld [vmem:[#allocation5 + $0x2e8] sm:$0xff] }
 0x392   :  { %1094 = vmatpush.msra.mxu0 %v1034_v9  ;;  %v1261_v9 = vld [vmem:[#allocation5 + $0x2f0] sm:$0xff] }
 0x393   :  { %1313 = vmatpush.msra.mxu1 %v1261_v9  ;;  %v1221_v9 = vld [vmem:[#allocation5 + $0x1b0] sm:$0xff] }
 0x3b0   :  { %v895_v12 = vpop.f32.mrf.mxu1 }
 0x3b1   :  { %v896_v13 = vadd.f32 %v2317_v10, %v895_v12  ;;  %v1032_v12 = vld [vmem:[#allocation2 + $0x190] sm:$0xff] }
 0x3b3   :  { %v907_v54 = vmax.f32 %v896_v13, 0.0  ;;  %v1031_v13 = vld [vmem:[#allocation2 + $0x188] sm:$0xff] }
 0x3b5   :  { %947 = vmatmul.f32.vlgmr.msra.gmra.mxu2 %v907_v54  ;;  %v1030_v54 = vld [vmem:[#allocation2 + $0x180] sm:$0xff] }
 0x3b8   :  { %v898_v15 = vpop.f32.mrf.mxu1 }
 0x3b9   :  { %v899_v16 = vadd.f32 %v2317_v10, %v898_v15 }
 0x3bb   :  { %v908_v17 = vmax.f32 %v899_v16, 0.0  ;;  %v1077_v16 = vld [vmem:[#allocation2 + $0x2f8] sm:$0xff] }
 0x3bc   :  { %1165 = vmatpush.msrb.mxu2 %v1077_v16  ;;  %v1255_v16 = vld [vmem:[#allocation5 + $0x2c0] sm:$0xff] }
 0x3bd   :  { %950 = vmatmul.f32.gmra.mxu2 %v908_v17  ;;  %v1076_v17 = vld [vmem:[#allocation2 + $0x2f0] sm:$0xff] }
 0x3be   :  { %1166 = vmatpush.msrb.mxu2 %v1076_v17  ;;  %v1256_v17 = vld [vmem:[#allocation5 + $0x2c8] sm:$0xff] }
 0x3c0   :  { %v901_v7 = vpop.f32.mrf.mxu1 }
 0x3c1   :  { %v902_v19 = vadd.f32 %v2317_v10, %v901_v7  ;;  %v1075_v7 = vld [vmem:[#allocation2 + $0x2e8] sm:$0xff] }
 0x3c2   :  { %1167 = vmatpush.msrb.mxu2 %v1075_v7  ;;  %v1251_v7 = vld [vmem:[#allocation5 + $0x2a0] sm:$0xff] }
 0x3c3   :  { %v909_v26 = vmax.f32 %v902_v19, 0.0  ;;  %v1074_v19 = vld [vmem:[#allocation2 + $0x2e0] sm:$0xff] }
 0x3c4   :  { %1168 = vmatpush.msrb.mxu2 %v1074_v19  ;;  %v1252_v19 = vld [vmem:[#allocation5 + $0x2a8] sm:$0xff] }
 0x3c5   :  { %953 = vmatmul.f32.gmra.mxu2 %v909_v26 }
 0x3c8   :  { %v904_v28 = vpop.f32.mrf.mxu1 }
 0x3c9   :  { %v905_v34 = vadd.f32 %v2317_v10, %v904_v28  ;;  %v1033_v10 = vld [vmem:[#allocation2 + $0x198] sm:$0xff] }
 0x3ca   :  { %1095 = vmatpush.msra.mxu0 %v1033_v10  ;;  %v1073_v28 = vld [vmem:[#allocation2 + $0x2d8] sm:$0xff] }
 0x3cb   :  { %v910_v62 = vmax.f32 %v905_v34, 0.0  ;;  %v1072_v34 = vld [vmem:[#allocation2 + $0x2d0] sm:$0xff]  ;;  %1169 = vmatpush.msrb.mxu2 %v1073_v28  ;;  %v1262_v10 = vld [vmem:[#allocation5 + $0x2f8] sm:$0xff]  ;;  %v1248_v28 = vld [vmem:[#allocation5 + $0x288] sm:$0xff] }
 0x3cc   :  { %1096 = vmatpush.msra.mxu0 %v1032_v12  ;;  %v1257_v12 = vld [vmem:[#allocation5 + $0x2d0] sm:$0xff] }
 0x3cd   :  { %956 = vmatmul.f32.gmra.mxu2 %v910_v62  ;;  %v1071_v62 = vld [vmem:[#allocation2 + $0x2c8] sm:$0xff] }
 0x3ce   :  { %1097 = vmatpush.msra.mxu0 %v1031_v13  ;;  %1170 = vmatpush.msrb.mxu2 %v1072_v34  ;;  %v1258_v13 = vld [vmem:[#allocation5 + $0x2d8] sm:$0xff]  ;;  %v1249_v34 = vld [vmem:[#allocation5 + $0x290] sm:$0xff] }
 0x3cf   :  { %1314 = vmatpush.msra.mxu1 %v1258_v13  ;;  %v1218_v13 = vld [vmem:[#allocation5 + $0x198] sm:$0xff] }
 0x3d0   :  { %1098 = vmatpush.msra.mxu0 %v1030_v54  ;;  %1171 = vmatpush.msrb.mxu2 %v1071_v62  ;;  %v1259_v54 = vld [vmem:[#allocation5 + $0x2e0] sm:$0xff]  ;;  %v1250_v62 = vld [vmem:[#allocation5 + $0x298] sm:$0xff] }
 0x3d1   :  { %1315 = vmatpush.msra.mxu1 %v1255_v16  ;;  %v1215_v16 = vld [vmem:[#allocation5 + $0x180] sm:$0xff] }
 0x3d2   :  { %1272 = vmatpush.msrb.mxu0 %v1260_v8  ;;  %v1226_v8 = vld [vmem:[#allocation5 + $0x1d8] sm:$0xff] }
 0x3d3   :  { %1316 = vmatpush.msra.mxu1 %v1252_v19 }
 0x3d4   :  { %1273 = vmatpush.msrb.mxu0 %v1257_v12  ;;  %v1223_v12 = vld [vmem:[#allocation5 + $0x1c0] sm:$0xff] }
 0x3d5   :  { %1317 = vmatpush.msra.mxu1 %v1249_v34  ;;  %v2941_v34 = vld [vmem:[%s3093_s5 + $0x1] ss:$0 sm:$0xff] }
 0x438   :  { %v948_v38 = vpop.f32.mrf.mxu2 }
 0x439   :  { %v949_v56 = vadd.f32 %v2318_v41, %v948_v38  ;;  %v1070_v38 = vld [vmem:[#allocation2 + $0x2c0] sm:$0xff] }
 0x43a   :  { %1172 = vmatpush.msrb.mxu2 %v1070_v38  ;;  %v1245_v38 = vld [vmem:[#allocation5 + $0x270] sm:$0xff] }
 0x43b   :  { %v960_v59 = vmax.f32 %v949_v56, 0.0  ;;  %v1063_v56 = vld [vmem:[#allocation2 + $0x288] sm:$0xff] }
 0x440   :  { %v951_v24 = vpop.f32.mrf.mxu2 }
 0x441   :  { %v952_v32 = vadd.f32 %v2318_v41, %v951_v24 }
 0x443   :  { %v961_v53 = vmax.f32 %v952_v32, 0.0  ;;  %v1065_v32 = vld [vmem:[#allocation2 + $0x298] sm:$0xff] }
 0x448   :  { %v954_v40 = vpop.f32.mrf.mxu2 }
 0x449   :  { %v955_v48 = vadd.f32 %v2318_v41, %v954_v40  ;;  %v1069_v40 = vld [vmem:[#allocation2 + $0x2b8] sm:$0xff] }
 0x44a   :  { %1173 = vmatpush.msrb.mxu2 %v1069_v40  ;;  %v1247_v40 = vld [vmem:[#allocation5 + $0x280] sm:$0xff] }
 0x44b   :  { %v962_v21 = vmax.f32 %v955_v48, 0.0  ;;  %v1066_v48 = vld [vmem:[#allocation2 + $0x2a0] sm:$0xff] }
 0x450   :  { %v957_v42 = vpop.f32.mrf.mxu2 }
 0x451   :  { %v958_v50 = vadd.f32 %v2318_v41, %v957_v42  ;;  %v1068_v41 = vld [vmem:[#allocation2 + $0x2b0] sm:$0xff]  ;;  %v1067_v42 = vld [vmem:[#allocation2 + $0x2a8] sm:$0xff] }
 0x452   :  { %1174 = vmatpush.msrb.mxu2 %v1068_v41  ;;  %v1242_v41 = vld [vmem:[#allocation5 + $0x258] sm:$0xff] }
 0x453   :  { %v963_v43 = vmax.f32 %v958_v50, 0.0 }
 0x454   :  { %1175 = vmatpush.msrb.mxu2 %v1067_v42  ;;  %v1243_v42 = vld [vmem:[#allocation5 + $0x260] sm:$0xff] }
 0x455   :  { %976 = vmatpush.msra.mxu3 %v963_v43  ;;  %v1064_v43 = vld [vmem:[#allocation2 + $0x290] sm:$0xff] }
 0x456   :  { %1176 = vmatpush.msrb.mxu2 %v1066_v48  ;;  %v1244_v48 = vld [vmem:[#allocation5 + $0x268] sm:$0xff] }
 0x457   :  { %977 = vmatpush.msra.mxu3 %v962_v21  ;;  %v1062_v21 = vld [vmem:[#allocation2 + $0x280] sm:$0xff] }
 0x458   :  { %1177 = vmatpush.msrb.mxu2 %v1065_v32  ;;  %v1240_v32 = vld [vmem:[#allocation5 + $0x248] sm:$0xff] }
 0x459   :  { %978 = vmatpush.msra.mxu3 %v961_v53 }
 0x45a   :  { %1178 = vmatpush.msrb.mxu2 %v1064_v43  ;;  %v1241_v43 = vld [vmem:[#allocation5 + $0x250] sm:$0xff] }
 0x45b   :  { %979 = vmatpush.msra.mxu3 %v960_v59 }
 0x45c   :  { %2251 = vmatmul.msk.f32.vlgmr.msra.gmra.mxu3 %vm325_vm0, %v2656_v25  ;;  %1179 = vmatpush.msrb.mxu2 %v1063_v56  ;;  %v1236_v56 = vld [vmem:[#allocation5 + $0x228] sm:$0xff] }
 0x45e   :  { %1180 = vmatpush.msrb.mxu2 %v1062_v21  ;;  %v1237_v21 = vld [vmem:[#allocation5 + $0x230] sm:$0xff] }
 0x460   :  { %1354 = vmatpush.msra.mxu2 %v1262_v10  ;;  %v1222_v10 = vld [vmem:[#allocation5 + $0x1b8] sm:$0xff] }
 0x462   :  { %1355 = vmatpush.msra.mxu2 %v1259_v54  ;;  %v1219_v54 = vld [vmem:[#allocation5 + $0x1a0] sm:$0xff] }
 0x464   :  { %2252 = vmatmul.msk.f32.gmra.mxu3 %vm325_vm0, %v2662_v27  ;;  %1356 = vmatpush.msra.mxu2 %v1256_v17  ;;  %v1216_v17 = vld [vmem:[#allocation5 + $0x188] sm:$0xff] }
 0x46c   :  { %2253 = vmatmul.msk.f32.gmra.mxu3 %vm325_vm0, %v2668_v29 }
 0x474   :  { %2254 = vmatmul.msk.f32.gmra.mxu3 %vm325_vm0, %v2674_v31 }
 0x47c   :  { %2255 = vmatmul.msk.f32.gmra.mxu3 %vm325_vm0, %v2680_v33 }
 0x484   :  { %2256 = vmatmul.msk.f32.gmra.mxu3 %vm325_vm0, %v2686_v35 }
 0x48c   :  { %2257 = vmatmul.msk.f32.gmra.mxu3 %vm325_vm0, %v2692_v37 }
 0x494   :  { %2258 = vmatmul.msk.f32.gmra.mxu3 %vm325_vm0, %v2698_v39 }
 0x49c   :  { %2259 = vmatmul.msk.f32.gmra.mxu3 %vm325_vm0, %v2704_v45 }
 0x4a4   :  { %2260 = vmatmul.msk.f32.gmra.mxu3 %vm325_vm0, %v2710_v55 }
 0x4ac   :  { %2261 = vmatmul.msk.f32.gmra.mxu3 %vm325_vm0, %v2716_v1 }
 0x4b4   :  { %2262 = vmatmul.msk.f32.gmra.mxu3 %vm325_vm0, %v2722_v11 }
 0x4bc   :  { %2263 = vmatmul.msk.f32.gmra.mxu3 %vm325_vm0, %v2731_v18 }
 0x4c4   :  { %2264 = vmatmul.msk.f32.gmra.mxu3 %vm325_vm0, %v2740_v23 }
 0x4cc   :  { %2265 = vmatmul.msk.f32.gmra.mxu3 %vm325_vm0, %v2749_v30 }
 0x4d4   :  { %2266 = vmatmul.msk.f32.gmra.mxu3 %vm325_vm0, %v2758_v36 }
 0x4df   :  { %v981_v15 = vpop.f32.mrf.mxu3 }
 0x4e0   :  { %1099 = vmatmul.f32.vlgmr.msra.gmra.mxu0 %v981_v15  ;;  %v1254_v15 = vld [vmem:[#allocation5 + $0x2b8] sm:$0xff] }
 0x4e1   :  { %1274 = vmatpush.msrb.mxu0 %v1254_v15  ;;  %v1220_v15 = vld [vmem:[#allocation5 + $0x1a8] sm:$0xff] }
 0x4e3   :  { %1275 = vmatpush.msrb.mxu0 %v1251_v7  ;;  %v1217_v7 = vld [vmem:[#allocation5 + $0x190] sm:$0xff] }
 0x4e5   :  { %1276 = vmatpush.msrb.mxu0 %v1248_v28 }
 0x4e7   :  { %v984_v26 = vpop.f32.mrf.mxu3  ;;  %1277 = vmatpush.msrb.mxu0 %v1245_v38 }
 0x4e8   :  { %1102 = vmatmul.f32.gmra.mxu0 %v984_v26  ;;  %v1253_v26 = vld [vmem:[#allocation5 + $0x2b0] sm:$0xff] }
 0x4e9   :  { %1357 = vmatpush.msra.mxu2 %v1253_v26  ;;  %1278 = vmatpush.msrb.mxu0 %v1242_v41  ;;  %v1141_v26 = vpop.f32.mrf.mxu1 }
 0x4eb   :  { %1358 = vmatpush.msra.mxu2 %v1250_v62 }
 0x4ed   :  { %1359 = vmatpush.msra.mxu2 %v1247_v40 }
 0x4ef   :  { %v987_v24 = vpop.f32.mrf.mxu3  ;;  %1360 = vmatpush.msra.mxu2 %v1244_v48 }
 0x4f0   :  { %1105 = vmatmul.f32.gmra.mxu0 %v987_v24  ;;  %v1246_v24 = vld [vmem:[#allocation5 + $0x278] sm:$0xff] }
 0x4f1   :  { %1318 = vmatpush.msra.mxu1 %v1246_v24  ;;  %1361 = vmatpush.msra.mxu2 %v1241_v43  ;;  %v1144_v62 = vpop.f32.mrf.mxu1 }
 0x4f3   :  { %1319 = vmatpush.msra.mxu1 %v1243_v42 }
 0x4f5   :  { %1320 = vmatpush.msra.mxu1 %v1240_v32 }
 0x4f7   :  { %v990_v50 = vpop.f32.mrf.mxu3  ;;  %1321 = vmatpush.msra.mxu1 %v1237_v21 }
 0x4f8   :  { %1108 = vmatmul.f32.gmra.mxu0 %v990_v50  ;;  %v1239_v50 = vld [vmem:[#allocation5 + $0x240] sm:$0xff] }
 0x4f9   :  { %1279 = vmatpush.msrb.mxu0 %v1239_v50  ;;  %v1147_v32 = vpop.f32.mrf.mxu1 }
 0x4fb   :  { %1280 = vmatpush.msrb.mxu0 %v1236_v56 }
 0x4ff   :  { %v993_v53 = vpop.f32.mrf.mxu3 }
 0x500   :  { %1111 = vmatmul.f32.gmra.mxu0 %v993_v53  ;;  %v1238_v53 = vld [vmem:[#allocation5 + $0x238] sm:$0xff] }
 0x501   :  { %1362 = vmatpush.msra.mxu2 %v1238_v53 }
 0x507   :  { %v996_v59 = vpop.f32.mrf.mxu3 }
 0x508   :  { %1114 = vmatmul.f32.gmra.mxu0 %v996_v59  ;;  %v1233_v59 = vld [vmem:[#allocation5 + $0x210] sm:$0xff] }
 0x509   :  { %1281 = vmatpush.msrb.mxu0 %v1233_v59 }
 0x50f   :  { %v999_v58 = vpop.f32.mrf.mxu3 }
 0x510   :  { %1117 = vmatmul.f32.gmra.mxu0 %v999_v58  ;;  %v1234_v58 = vld [vmem:[#allocation5 + $0x218] sm:$0xff] }
 0x511   :  { %1322 = vmatpush.msra.mxu1 %v1234_v58 }
 0x517   :  { %v1002_v61 = vpop.f32.mrf.mxu3 }
 0x518   :  { %1120 = vmatmul.f32.gmra.mxu0 %v1002_v61  ;;  %v1235_v61 = vld [vmem:[#allocation5 + $0x220] sm:$0xff] }
 0x519   :  { %1363 = vmatpush.msra.mxu2 %v1235_v61  ;;  %v1150_v61 = vpop.f32.mrf.mxu1 }
 0x51f   :  { %v1005_v44 = vpop.f32.mrf.mxu3 }
 0x520   :  { %1181 = vmatmul.f32.vlgmr.msrb.gmra.mxu2 %v1005_v44  ;;  %v1230_v44 = vld [vmem:[#allocation5 + $0x1f8] sm:$0xff] }
 0x521   :  { %1282 = vmatpush.msrb.mxu0 %v1230_v44 }
 0x527   :  { %v1008_v20 = vpop.f32.mrf.mxu3 }
 0x528   :  { %1184 = vmatmul.f32.gmra.mxu2 %v1008_v20  ;;  %v1231_v20 = vld [vmem:[#allocation5 + $0x200] sm:$0xff] }
 0x529   :  { %1323 = vmatpush.msra.mxu1 %v1231_v20 }
 0x52f   :  { %v1011_v63 = vpop.f32.mrf.mxu3 }
 0x530   :  { %1187 = vmatmul.f32.gmra.mxu2 %v1011_v63  ;;  %v1232_v63 = vld [vmem:[#allocation5 + $0x208] sm:$0xff] }
 0x531   :  { %1364 = vmatpush.msra.mxu2 %v1232_v63 }
 0x537   :  { %v1014_v46 = vpop.f32.mrf.mxu3 }
 0x538   :  { %1190 = vmatmul.f32.gmra.mxu2 %v1014_v46  ;;  %v1227_v46 = vld [vmem:[#allocation5 + $0x1e0] sm:$0xff] }
 0x539   :  { %1283 = vmatpush.msrb.mxu0 %v1227_v46 }
 0x53f   :  { %v1017_v0 = vpop.f32.mrf.mxu3 }
 0x540   :  { %1193 = vmatmul.f32.gmra.mxu2 %v1017_v0  ;;  %v1228_v0 = vld [vmem:[#allocation5 + $0x1e8] sm:$0xff] }
 0x541   :  { %1324 = vmatpush.msra.mxu1 %v1228_v0 }
 0x547   :  { %v1020_v3 = vpop.f32.mrf.mxu3 }
 0x548   :  { %1196 = vmatmul.f32.gmra.mxu2 %v1020_v3  ;;  %v1229_v3 = vld [vmem:[#allocation5 + $0x1f0] sm:$0xff] }
 0x549   :  { %1365 = vmatpush.msra.mxu2 %v1229_v3 }
 0x54b   :  { %1366 = vmatpush.msra.mxu2 %v1226_v8 }
 0x54d   :  { %1367 = vmatpush.msra.mxu2 %v1223_v12 }
 0x54f   :  { %v1023_v2 = vpop.f32.mrf.mxu3  ;;  %1368 = vmatpush.msra.mxu2 %v1220_v15 }
 0x550   :  { %1199 = vmatmul.f32.gmra.mxu2 %v1023_v2  ;;  %v1224_v2 = vld [vmem:[#allocation5 + $0x1c8] sm:$0xff] }
 0x551   :  { %1284 = vmatpush.msrb.mxu0 %v1224_v2  ;;  %1369 = vmatpush.msra.mxu2 %v1217_v7 }
 0x553   :  { %1285 = vmatpush.msrb.mxu0 %v1221_v9 }
 0x555   :  { %1286 = vmatpush.msrb.mxu0 %v1218_v13 }
 0x557   :  { %v1026_v4 = vpop.f32.mrf.mxu3  ;;  %1287 = vmatpush.msrb.mxu0 %v1215_v16 }
 0x558   :  { %1202 = vmatmul.f32.gmra.mxu2 %v1026_v4  ;;  %v1225_v4 = vld [vmem:[#allocation5 + $0x1d0] sm:$0xff] }
 0x559   :  { %1325 = vmatpush.msra.mxu1 %v1225_v4  ;;  %v1153_v4 = vpop.f32.mrf.mxu1 }
 0x55b   :  { %1326 = vmatpush.msra.mxu1 %v1222_v10 }
 0x55d   :  { %1327 = vmatpush.msra.mxu1 %v1219_v54  ;;  %v1100_v19 = vpop.f32.mrf.mxu0 }
 0x55e   :  { %v1101_v38 = vadd.f32 %v2941_v34, %v1100_v19 }
 0x55f   :  { %1328 = vmatpush.msra.mxu1 %v1216_v17 }
 0x560   :  { %v1142_v40 = vadd.f32 %v1141_v26, %v1101_v38 }
 0x561   :  { %v1156_v17 = vpop.f32.mrf.mxu1 }
 0x565   :  { %v1103_v28 = vpop.f32.mrf.mxu0 }
 0x566   :  { %v1104_v48 = vadd.f32 %v2941_v34, %v1103_v28 }
 0x568   :  { %v1145_v43 = vadd.f32 %v1144_v62, %v1104_v48 }
 0x56d   :  { %v1106_v24 = vpop.f32.mrf.mxu0 }
 0x56e   :  { %v1107_v59 = vadd.f32 %v2941_v34, %v1106_v24 }
 0x570   :  { %v1148_v44 = vadd.f32 %v1147_v32, %v1107_v59 }
 0x575   :  { %v1109_v56 = vpop.f32.mrf.mxu0 }
 0x576   :  { %v1110_v0 = vadd.f32 %v2941_v34, %v1109_v56 }
 0x578   :  { %v1151_v2 = vadd.f32 %v1150_v61, %v1110_v0 }
 0x57d   :  { %v1112_v46 = vpop.f32.mrf.mxu0 }
 0x57e   :  { %v1113_v10 = vadd.f32 %v2941_v34, %v1112_v46 }
 0x580   :  { %v1154_v54 = vadd.f32 %v1153_v4, %v1113_v10 }
 0x585   :  { %v1115_v13 = vpop.f32.mrf.mxu0 }
 0x586   :  { %v1116_v7 = vadd.f32 %v2941_v34, %v1115_v13  ;;  %v2954_v13 = vld [vmem:[%s3095_s7 + $0x3] sm:$0x7] }
 0x588   :  { %v1157_v28 = vadd.f32 %v1156_v17, %v1116_v7 }
 0x58d   :  { %v1118_v26 = vpop.f32.mrf.mxu0 }
 0x58e   :  { %v1119_v24 = vadd.f32 %v2941_v34, %v1118_v26 }
 0x595   :  { %v1121_v48 = vpop.f32.mrf.mxu0 }
 0x5a3   :  { %v1182_v41 = vpop.f32.mrf.mxu2 }
 0x5a4   :  { %v1183_v42 = vadd.f32 %v1182_v41, %v1142_v40  ;;  %v1159_v41 = vpop.f32.mrf.mxu1 }
 0x5a6   :  { %v1206_v50 = vmax.f32 %v1183_v42, 0.0  ;;  %v1160_v42 = vadd.f32 %v1159_v41, %v1119_v24 }
 0x5a8   :  { %1288 = vmatmul.f32.vlgmr.msrb.gmra.mxu0 %v1206_v50  ;;  %1329 = vmatmul.f32.vlgmr.msra.gmra.mxu1 %v1206_v50 }
 0x5a9   :  { %1370 = vmatmul.f32.vlgmr.msra.gmra.mxu2 %v1206_v50 }
 0x5ab   :  { %v1185_v21 = vpop.f32.mrf.mxu2 }
 0x5ac   :  { %v1186_v53 = vadd.f32 %v1185_v21, %v1145_v43  ;;  %v1122_v43 = vadd.f32 %v2941_v34, %v1121_v48  ;;  %v1162_v21 = vpop.f32.mrf.mxu1 }
 0x5ae   :  { %v1207_v58 = vmax.f32 %v1186_v53, 0.0  ;;  %v1163_v53 = vadd.f32 %v1162_v21, %v1122_v43 }
 0x5b0   :  { %1291 = vmatmul.f32.gmra.mxu0 %v1207_v58  ;;  %1332 = vmatmul.f32.gmra.mxu1 %v1207_v58 }
 0x5b1   :  { %1373 = vmatmul.f32.gmra.mxu2 %v1207_v58 }
 0x5b3   :  { %v1188_v20 = vpop.f32.mrf.mxu2 }
 0x5b4   :  { %v1189_v63 = vadd.f32 %v1188_v20, %v1148_v44 }
 0x5b6   :  { %v1208_v3 = vmax.f32 %v1189_v63, 0.0 }
 0x5b8   :  { %1294 = vmatmul.f32.gmra.mxu0 %v1208_v3  ;;  %1335 = vmatmul.f32.gmra.mxu1 %v1208_v3 }
 0x5b9   :  { %1376 = vmatmul.f32.gmra.mxu2 %v1208_v3 }
 0x5bb   :  { %v1191_v8 = vpop.f32.mrf.mxu2 }
 0x5bc   :  { %v1192_v9 = vadd.f32 %v1191_v8, %v1151_v2 }
 0x5be   :  { %v1209_v12 = vmax.f32 %v1192_v9, 0.0 }
 0x5c0   :  { %1297 = vmatmul.f32.gmra.mxu0 %v1209_v12  ;;  %1338 = vmatmul.f32.gmra.mxu1 %v1209_v12 }
 0x5c1   :  { %1379 = vmatmul.f32.gmra.mxu2 %v1209_v12 }
 0x5c3   :  { %v1194_v15 = vpop.f32.mrf.mxu2 }
 0x5c4   :  { %v1195_v16 = vadd.f32 %v1194_v15, %v1154_v54  ;;  %v1268_v54 = vperm.slane %v2954_v13, 2 }
 0x5c6   :  { %v1210_v19 = vmax.f32 %v1195_v16, 0.0 }
 0x5c8   :  { %1300 = vmatmul.f32.gmra.mxu0 %v1210_v19  ;;  %1341 = vmatmul.f32.gmra.mxu1 %v1210_v19 }
 0x5c9   :  { %1382 = vmatmul.f32.gmra.mxu2 %v1210_v19 }
 0x5cb   :  { %v1197_v62 = vpop.f32.mrf.mxu2 }
 0x5cc   :  { %v1198_v38 = vadd.f32 %v1197_v62, %v1157_v28 }
 0x5ce   :  { %v1211_v40 = vmax.f32 %v1198_v38, 0.0 }
 0x5d0   :  { %1303 = vmatmul.f32.gmra.mxu0 %v1211_v40  ;;  %1344 = vmatmul.f32.gmra.mxu1 %v1211_v40 }
 0x5d1   :  { %1385 = vmatmul.f32.gmra.mxu2 %v1211_v40 }
 0x5d3   :  { %v1200_v50 = vpop.f32.mrf.mxu2 }
 0x5d4   :  { %v1201_v32 = vadd.f32 %v1200_v50, %v1160_v42 }
 0x5d6   :  { %v1212_v56 = vmax.f32 %v1201_v32, 0.0  ;;  %v1266_v32 = vperm.slane %v2954_v13, 0 }
 0x5d8   :  { %1306 = vmatmul.f32.gmra.mxu0 %v1212_v56  ;;  %1347 = vmatmul.f32.gmra.mxu1 %v1212_v56 }
 0x5d9   :  { %1388 = vmatmul.f32.gmra.mxu2 %v1212_v56 }
 0x5db   :  { %v1203_v59 = vpop.f32.mrf.mxu2 }
 0x5dc   :  { %v1204_v58 = vadd.f32 %v1203_v59, %v1163_v53 }
 0x5de   :  { %v1213_v61 = vmax.f32 %v1204_v58, 0.0 }
 0x5e0   :  { %1309 = vmatmul.f32.gmra.mxu0 %v1213_v61  ;;  %1350 = vmatmul.f32.gmra.mxu1 %v1213_v61 }
 0x5e1   :  { %1391 = vmatmul.f32.gmra.mxu2 %v1213_v61 }
 0x625   :  { %v1289_v44 = vpop.f32.mrf.mxu0 }
 0x62c   :  { %v1371_v20 = vpop.f32.mrf.mxu2 }
 0x62d   :  { %v1292_v63 = vpop.f32.mrf.mxu0  ;;  %v1372_v43 = vadd.f32 %v1371_v20, %v1268_v54 }
 0x62e   :  { %v1293_v20 = vadd.f32 %v1292_v63, %v1266_v32  ;;  %v1462_v63 = vld [vmem:[#allocation7 + $0xc8] sm:$0xff] }
 0x62f   :  { %v1397_v59 = vmax.f32 %v1372_v43, 0.0  ;;  %v1658_v43 = vld [vmem:[#allocation2 + $0x3f0] sm:$0xff] }
 0x634   :  { %v1374_v46 = vpop.f32.mrf.mxu2 }
 0x635   :  { %v1295_v3 = vpop.f32.mrf.mxu0  ;;  %v1375_v42 = vadd.f32 %v1374_v46, %v1268_v54 }
 0x637   :  { %v1400_v21 = vmax.f32 %v1375_v42, 0.0  ;;  %v1455_v42 = vld [vmem:[#allocation7 + $0x90] sm:$0xff] }
 0x63c   :  { %v1377_v0 = vpop.f32.mrf.mxu2 }
 0x63d   :  { %v1298_v34 = vpop.f32.mrf.mxu0  ;;  %v1378_v40 = vadd.f32 %v1377_v0, %v1268_v54 }
 0x63e   :  { %v1299_v46 = vadd.f32 %v1298_v34, %v1266_v32 }
 0x63f   :  { %v1403_v56 = vmax.f32 %v1378_v40, 0.0  ;;  %v1457_v40 = vld [vmem:[#allocation7 + $0xa0] sm:$0xff] }
 0x644   :  { %v1380_v2 = vpop.f32.mrf.mxu2 }
 0x645   :  { %v1301_v8 = vpop.f32.mrf.mxu0  ;;  %v1381_v38 = vadd.f32 %v1380_v2, %v1268_v54 }
 0x646   :  { %v1302_v0 = vadd.f32 %v1301_v8, %v1266_v32  ;;  %v1465_v8 = vld [vmem:[#allocation7 + $0xe0] sm:$0xff] }
 0x647   :  { %v1406_v48 = vmax.f32 %v1381_v38, 0.0  ;;  %v1459_v38 = vld [vmem:[#allocation7 + $0xb0] sm:$0xff] }
 0x64c   :  { %v1383_v4 = vpop.f32.mrf.mxu2 }
 0x64d   :  { %v1304_v10 = vpop.f32.mrf.mxu0  ;;  %v1384_v28 = vadd.f32 %v1383_v4, %v1268_v54 }
 0x64e   :  { %v1305_v61 = vadd.f32 %v1304_v10, %v1266_v32  ;;  %v1466_v10 = vld [vmem:[#allocation7 + $0xe8] sm:$0xff] }
 0x64f   :  { %v1409_v41 = vmax.f32 %v1384_v28, 0.0  ;;  %v1461_v28 = vld [vmem:[#allocation7 + $0xc0] sm:$0xff] }
 0x654   :  { %v1386_v9 = vpop.f32.mrf.mxu2 }
 0x655   :  { %v1307_v7 = vpop.f32.mrf.mxu0  ;;  %v1387_v19 = vadd.f32 %v1386_v9, %v1268_v54  ;;  %v1410_v9 = vmax.f32 %v1305_v61, 0.0  ;;  %v1652_v61 = vld [vmem:[#allocation2 + $0x3c0] sm:$0xff] }
 0x656   :  { %v1308_v58 = vadd.f32 %v1307_v7, %v1266_v32 }
 0x657   :  { %v1412_v24 = vmax.f32 %v1387_v19, 0.0  ;;  %v1290_v19 = vadd.f32 %v1289_v44, %v1266_v32  ;;  %v1463_v44 = vld [vmem:[#allocation7 + $0xd0] sm:$0xff] }
 0x658   :  { %v1413_v4 = vmax.f32 %v1308_v58, 0.0  ;;  %v1653_v58 = vld [vmem:[#allocation2 + $0x3c8] sm:$0xff] }
 0x659   :  { %v1395_v34 = vmax.f32 %v1290_v19, 0.0 }
 0x65c   :  { %v1389_v12 = vpop.f32.mrf.mxu2 }
 0x65d   :  { %v1390_v16 = vadd.f32 %v1389_v12, %v1268_v54  ;;  %v1310_v50 = vpop.f32.mrf.mxu0  ;;  %v1296_v12 = vadd.f32 %v1295_v3, %v1266_v32  ;;  %v1464_v3 = vld [vmem:[#allocation7 + $0xd8] sm:$0xff] }
 0x65e   :  { %v1311_v53 = vadd.f32 %v1310_v50, %v1266_v32  ;;  %v1453_v50 = vld [vmem:[#allocation7 + $0x80] sm:$0xff]  ;;  %v1659_v32 = vld [vmem:[#allocation2 + $0x3f8] sm:$0xff] }
 0x65f   :  { %v1415_v62 = vmax.f32 %v1390_v16, 0.0  ;;  %v1468_v16 = vld [vmem:[#allocation7 + $0xf8] sm:$0xff]  ;;  %v1401_v7 = vmax.f32 %v1296_v12, 0.0  ;;  %v1646_v12 = vld [vmem:[#allocation2 + $0x390] sm:$0xff] }
 0x660   :  { %v1416_v2 = vmax.f32 %v1311_v53, 0.0  ;;  %1474 = vmatpush.msra.mxu0 %v1468_v16  ;;  %v1655_v53 = vld [vmem:[#allocation2 + $0x3d8] sm:$0xff] }
 0x664   :  { %v1392_v15 = vpop.f32.mrf.mxu2 }
 0x665   :  { %v1393_v17 = vadd.f32 %v1392_v15, %v1268_v54  ;;  %v1407_v15 = vmax.f32 %v1302_v0, 0.0  ;;  %v1404_v54 = vmax.f32 %v1299_v46, 0.0  ;;  %v1650_v0 = vld [vmem:[#allocation2 + $0x3b0] sm:$0xff]  ;;  %v1648_v46 = vld [vmem:[#allocation2 + $0x3a0] sm:$0xff] }
 0x667   :  { %v1418_v26 = vmax.f32 %v1393_v17, 0.0  ;;  %v1467_v17 = vld [vmem:[#allocation7 + $0xf0] sm:$0xff] }
 0x668   :  { %1475 = vmatpush.msra.mxu0 %v1467_v17 }
 0x669   :  { %1419 = vmatpush.msrb.mxu3 %v1418_v26  ;;  %v1398_v26 = vmax.f32 %v1293_v20, 0.0  ;;  %v1644_v20 = vld [vmem:[#allocation2 + $0x380] sm:$0xff] }
 0x66a   :  { %1476 = vmatpush.msra.mxu0 %v1466_v10 }
 0x66b   :  { %1420 = vmatpush.msrb.mxu3 %v1415_v62  ;;  %v1460_v62 = vld [vmem:[#allocation7 + $0xb8] sm:$0xff] }
 0x66c   :  { %1477 = vmatpush.msra.mxu0 %v1465_v8 }
 0x66d   :  { %1421 = vmatpush.msrb.mxu3 %v1412_v24  ;;  %v1458_v24 = vld [vmem:[#allocation7 + $0xa8] sm:$0xff] }
 0x66e   :  { %1478 = vmatpush.msra.mxu0 %v1464_v3  ;;  %v1267_v3 = vperm.slane %v2954_v13, 1  ;;  %v1522_v13 = vld [vmem:[#allocation8 + $0xf0] sm:$0xff] }
 0x66f   :  { %1422 = vmatpush.msrb.mxu3 %v1409_v41  ;;  %v1456_v41 = vld [vmem:[#allocation7 + $0x98] sm:$0xff] }
 0x670   :  { %1479 = vmatpush.msra.mxu0 %v1463_v44 }
 0x671   :  { %1423 = vmatpush.msrb.mxu3 %v1406_v48  ;;  %v1454_v48 = vld [vmem:[#allocation7 + $0x88] sm:$0xff] }
 0x672   :  { %1480 = vmatpush.msra.mxu0 %v1462_v63 }
 0x673   :  { %1424 = vmatpush.msrb.mxu3 %v1403_v56  ;;  %v1657_v56 = vld [vmem:[#allocation2 + $0x3e8] sm:$0xff] }
 0x674   :  { %1481 = vmatpush.msra.mxu0 %v1461_v28 }
 0x675   :  { %1425 = vmatpush.msrb.mxu3 %v1400_v21  ;;  %v1656_v21 = vld [vmem:[#allocation2 + $0x3e0] sm:$0xff] }
 0x676   :  { %1482 = vmatpush.msra.mxu0 %v1460_v62 }
 0x677   :  { %1426 = vmatpush.msrb.mxu3 %v1397_v59  ;;  %v1654_v59 = vld [vmem:[#allocation2 + $0x3d0] sm:$0xff] }
 0x678   :  { %1483 = vmatpush.msra.mxu0 %v1459_v38 }
 0x679   :  { %1427 = vmatpush.msrb.mxu3 %v1416_v2  ;;  %v1651_v2 = vld [vmem:[#allocation2 + $0x3b8] sm:$0xff] }
 0x67a   :  { %1484 = vmatpush.msra.mxu0 %v1458_v24 }
 0x67b   :  { %1428 = vmatpush.msrb.mxu3 %v1413_v4  ;;  %v1649_v4 = vld [vmem:[#allocation2 + $0x3a8] sm:$0xff] }
 0x67c   :  { %1485 = vmatpush.msra.mxu0 %v1457_v40 }
 0x67d   :  { %1429 = vmatpush.msrb.mxu3 %v1410_v9  ;;  %v1647_v9 = vld [vmem:[#allocation2 + $0x398] sm:$0xff] }
 0x67e   :  { %1486 = vmatpush.msra.mxu0 %v1456_v41 }
 0x67f   :  { %1430 = vmatpush.msrb.mxu3 %v1407_v15  ;;  %v1645_v15 = vld [vmem:[#allocation2 + $0x388] sm:$0xff] }
 0x680   :  { %1487 = vmatpush.msra.mxu0 %v1455_v42 }
 0x681   :  { %1431 = vmatpush.msrb.mxu3 %v1404_v54 }
 0x682   :  { %1488 = vmatpush.msra.mxu0 %v1454_v48 }
 0x683   :  { %1432 = vmatpush.msrb.mxu3 %v1401_v7  ;;  %v1330_v7 = vpop.f32.mrf.mxu1 }
 0x684   :  { %1489 = vmatpush.msra.mxu0 %v1453_v50  ;;  %v1331_v63 = vadd.f32 %v1330_v7, %v1267_v3  ;;  %v1511_v7 = vld [vmem:[#allocation8 + $0x98] sm:$0xff] }
 0x685   :  { %1433 = vmatpush.msrb.mxu3 %v1398_v26 }
 0x686   :  { %1722 = vmatpush.msrb.mxu0 %v1659_v32  ;;  %v1396_v62 = vmax.f32 %v1331_v63, 0.0  ;;  %v1508_v63 = vld [vmem:[#allocation8 + $0x80] sm:$0xff] }
 0x687   :  { %1434 = vmatpush.msrb.mxu3 %v1395_v34 }
 0x688   :  { %2269 = vmatmul.msk.f32.vlgmr.msrb.gmra.mxu3 %vm229_vm2, %v2497_v49  ;;  %1723 = vmatpush.msrb.mxu0 %v1658_v43  ;;  %v1523_v43 = vld [vmem:[#allocation8 + $0xf8] sm:$0xff] }
 0x689   :  { %1529 = vmatpush.msrb.mxu1 %v1523_v43 }
 0x68a   :  { %1724 = vmatpush.msrb.mxu0 %v1657_v56 }
 0x68b   :  { %v1333_v8 = vpop.f32.mrf.mxu1  ;;  %1530 = vmatpush.msrb.mxu1 %v1522_v13 }
 0x68c   :  { %1725 = vmatpush.msrb.mxu0 %v1656_v21  ;;  %v1334_v38 = vadd.f32 %v1333_v8, %v1267_v3  ;;  %v1521_v21 = vld [vmem:[#allocation8 + $0xe8] sm:$0xff] }
 0x68d   :  { %1531 = vmatpush.msrb.mxu1 %v1521_v21 }
 0x68e   :  { %1726 = vmatpush.msrb.mxu0 %v1655_v53  ;;  %v1399_v24 = vmax.f32 %v1334_v38, 0.0 }
 0x690   :  { %2270 = vmatmul.msk.f32.gmra.mxu3 %vm230_vm3, %v2497_v49  ;;  %1727 = vmatpush.msrb.mxu0 %v1654_v59  ;;  %v1520_v59 = vld [vmem:[#allocation8 + $0xe0] sm:$0xff] }
 0x691   :  { %1532 = vmatpush.msrb.mxu1 %v1520_v59  ;;  %v2321_v59 = vld [vmem:[%s3099_s11 + $0x1] ss:$0 sm:$0xff] }
 0x692   :  { %1728 = vmatpush.msrb.mxu0 %v1653_v58 }
 0x693   :  { %v1336_v28 = vpop.f32.mrf.mxu1 }
 0x694   :  { %1729 = vmatpush.msrb.mxu0 %v1652_v61  ;;  %v1337_v41 = vadd.f32 %v1336_v28, %v1267_v3  ;;  %v1519_v61 = vld [vmem:[#allocation8 + $0xd8] sm:$0xff]  ;;  %v2320_v28 = vld [vmem:[%s3097_s9 + $0x1] ss:$0 sm:$0xff] }
 0x695   :  { %1533 = vmatpush.msrb.mxu1 %v1519_v61 }
 0x696   :  { %1730 = vmatpush.msrb.mxu0 %v1651_v2  ;;  %v1402_v42 = vmax.f32 %v1337_v41, 0.0  ;;  %v1518_v2 = vld [vmem:[#allocation8 + $0xd0] sm:$0xff] }
 0x697   :  { %1534 = vmatpush.msrb.mxu1 %v1518_v2 }
 0x698   :  { %2271 = vmatmul.msk.f32.gmra.mxu3 %vm231_vm4, %v2497_v49  ;;  %1731 = vmatpush.msrb.mxu0 %v1650_v0 }
 0x69a   :  { %1732 = vmatpush.msrb.mxu0 %v1649_v4  ;;  %v1517_v4 = vld [vmem:[#allocation8 + $0xc8] sm:$0xff] }
 0x69b   :  { %v1339_v40 = vpop.f32.mrf.mxu1  ;;  %1535 = vmatpush.msrb.mxu1 %v1517_v4 }
 0x69c   :  { %1733 = vmatpush.msrb.mxu0 %v1648_v46  ;;  %v1340_v50 = vadd.f32 %v1339_v40, %v1267_v3  ;;  %v1516_v46 = vld [vmem:[#allocation8 + $0xc0] sm:$0xff] }
 0x69d   :  { %1536 = vmatpush.msrb.mxu1 %v1516_v46 }
 0x69e   :  { %1734 = vmatpush.msrb.mxu0 %v1647_v9  ;;  %v1405_v32 = vmax.f32 %v1340_v50, 0.0 }
 0x6a0   :  { %2272 = vmatmul.msk.f32.gmra.mxu3 %vm232_vm5, %v2497_v49  ;;  %1735 = vmatpush.msrb.mxu0 %v1646_v12 }
 0x6a2   :  { %1736 = vmatpush.msrb.mxu0 %v1645_v15  ;;  %v1515_v15 = vld [vmem:[#allocation8 + $0xb8] sm:$0xff] }
 0x6a3   :  { %v1342_v48 = vpop.f32.mrf.mxu1  ;;  %1537 = vmatpush.msrb.mxu1 %v1515_v15 }
 0x6a4   :  { %1737 = vmatpush.msrb.mxu0 %v1644_v20  ;;  %v1343_v56 = vadd.f32 %v1342_v48, %v1267_v3  ;;  %v1514_v20 = vld [vmem:[#allocation8 + $0xb0] sm:$0xff] }
 0x6a5   :  { %1538 = vmatpush.msrb.mxu1 %v1514_v20  ;;  %v1634_v20 = vld [vmem:[#allocation2 + $0x330] sm:$0xff] }
 0x6a6   :  { %v1408_v58 = vmax.f32 %v1343_v56, 0.0 }
 0x6ab   :  { %v1345_v53 = vpop.f32.mrf.mxu1 }
 0x6ac   :  { %v1346_v0 = vadd.f32 %v1345_v53, %v1267_v3 }
 0x6ae   :  { %v1411_v12 = vmax.f32 %v1346_v0, 0.0 }
 0x6b3   :  { %v1348_v9 = vpop.f32.mrf.mxu1 }
 0x70b   :  { %v1436_v54 = vpop.f32.mrf.mxu3 }
 0x70c   :  { %v1448_v16 = vmul.f32 %v1436_v54, %v2878_v14  ;;  %v1349_v54 = vadd.f32 %v1348_v9, %v1267_v3 }
 0x70e   :  { %1490 = vmatmul.f32.vlgmr.msra.gmra.mxu0 %v1448_v16  ;;  %v1513_v16 = vld [vmem:[#allocation8 + $0xa8] sm:$0xff] }
 0x70f   :  { %1539 = vmatpush.msrb.mxu1 %v1513_v16  ;;  %v1631_v16 = vld [vmem:[#allocation2 + $0x318] sm:$0xff] }
 0x713   :  { %v1439_v17 = vpop.f32.mrf.mxu3 }
 0x714   :  { %v1449_v19 = vmul.f32 %v1439_v17, %v2885_v47  ;;  %v1512_v17 = vld [vmem:[#allocation8 + $0xa0] sm:$0xff] }
 0x715   :  { %1540 = vmatpush.msrb.mxu1 %v1512_v17  ;;  %v1630_v17 = vld [vmem:[#allocation2 + $0x310] sm:$0xff] }
 0x716   :  { %1493 = vmatmul.f32.gmra.mxu0 %v1449_v19  ;;  %v1414_v19 = vmax.f32 %v1349_v54, 0.0  ;;  %v1632_v54 = vld [vmem:[#allocation2 + $0x320] sm:$0xff] }
 0x717   :  { %1541 = vmatpush.msrb.mxu1 %v1511_v7  ;;  %v1675_v7 = vld [vmem:[#allocation2 + $0x478] sm:$0xff] }
 0x71b   :  { %v1442_v10 = vpop.f32.mrf.mxu3 }
 0x71c   :  { %v1450_v26 = vmul.f32 %v1442_v10, %v2891_v22  ;;  %v1351_v10 = vpop.f32.mrf.mxu1 }
 0x71e   :  { %1496 = vmatmul.f32.gmra.mxu0 %v1450_v26  ;;  %v1352_v26 = vadd.f32 %v1351_v10, %v1267_v3  ;;  %v1674_v10 = vld [vmem:[#allocation2 + $0x470] sm:$0xff] }
 0x720   :  { %v1417_v8 = vmax.f32 %v1352_v26, 0.0  ;;  %v1673_v26 = vld [vmem:[#allocation2 + $0x468] sm:$0xff] }
 0x723   :  { %v1445_v34 = vpop.f32.mrf.mxu3 }
 0x724   :  { %v1451_v44 = vmul.f32 %v1445_v34, %v2896_v6  ;;  %v1510_v34 = vld [vmem:[#allocation8 + $0x90] sm:$0xff] }
 0x725   :  { %1542 = vmatpush.msrb.mxu1 %v1510_v34  ;;  %v1671_v34 = vld [vmem:[#allocation2 + $0x458] sm:$0xff] }
 0x726   :  { %1499 = vmatmul.f32.gmra.mxu0 %v1451_v44  ;;  %v1509_v44 = vld [vmem:[#allocation8 + $0x88] sm:$0xff] }
 0x727   :  { %1543 = vmatpush.msrb.mxu1 %v1509_v44  ;;  %v1669_v44 = vld [vmem:[#allocation2 + $0x448] sm:$0xff] }
 0x729   :  { %1544 = vmatpush.msrb.mxu1 %v1508_v63  ;;  %v1667_v63 = vld [vmem:[#allocation2 + $0x438] sm:$0xff] }
 0x72b   :  { %1763 = vmatpush.msra.mxu1 %v1675_v7  ;;  %v1839_v7 = vld [vmem:[#allocation5 + $0x3d0] sm:$0xff] }
 0x72d   :  { %1764 = vmatpush.msra.mxu1 %v1674_v10  ;;  %v1834_v10 = vld [vmem:[#allocation5 + $0x3a8] sm:$0xff] }
 0x72e   :  { %1738 = vmatmul.f32.vlgmr.msrb.gmra.mxu0 %v1396_v62 }
 0x72f   :  { %1765 = vmatpush.msra.mxu1 %v1673_v26  ;;  %v1835_v26 = vld [vmem:[#allocation5 + $0x3b0] sm:$0xff] }
 0x736   :  { %1741 = vmatmul.f32.gmra.mxu0 %v1399_v24 }
 0x73e   :  { %1744 = vmatmul.f32.gmra.mxu0 %v1402_v42 }
 0x746   :  { %1747 = vmatmul.f32.gmra.mxu0 %v1405_v32 }
 0x74e   :  { %1750 = vmatmul.f32.gmra.mxu0 %v1408_v58 }
 0x756   :  { %1753 = vmatmul.f32.gmra.mxu0 %v1411_v12 }
 0x75e   :  { %1756 = vmatmul.f32.gmra.mxu0 %v1414_v19  ;;  %v1629_v19 = vld [vmem:[#allocation2 + $0x308] sm:$0xff] }
 0x766   :  { %1759 = vmatmul.f32.gmra.mxu0 %v1417_v8 }
 0x78b   :  { %v1491_v62 = vpop.f32.mrf.mxu0 }
 0x78c   :  { %v1492_v38 = vadd.f32 %v2320_v28, %v1491_v62  ;;  %v1665_v62 = vld [vmem:[#allocation2 + $0x428] sm:$0xff] }
 0x78e   :  { %v1503_v24 = vmax.f32 %v1492_v38, 0.0  ;;  %v1664_v38 = vld [vmem:[#allocation2 + $0x420] sm:$0xff] }
 0x790   :  { %1545 = vmatmul.f32.vlgmr.msrb.gmra.mxu1 %v1503_v24 }
 0x793   :  { %v1494_v40 = vpop.f32.mrf.mxu0 }
 0x794   :  { %v1495_v41 = vadd.f32 %v2320_v28, %v1494_v40  ;;  %v1663_v40 = vld [vmem:[#allocation2 + $0x418] sm:$0xff] }
 0x796   :  { %v1504_v42 = vmax.f32 %v1495_v41, 0.0  ;;  %v1662_v41 = vld [vmem:[#allocation2 + $0x410] sm:$0xff] }
 0x798   :  { %1548 = vmatmul.f32.gmra.mxu1 %v1504_v42  ;;  %v1661_v42 = vld [vmem:[#allocation2 + $0x408] sm:$0xff] }
 0x79b   :  { %v1497_v3 = vpop.f32.mrf.mxu0 }
 0x79c   :  { %v1498_v48 = vadd.f32 %v2320_v28, %v1497_v3  ;;  %v1660_v3 = vld [vmem:[#allocation2 + $0x400] sm:$0xff] }
 0x79e   :  { %v1505_v50 = vmax.f32 %v1498_v48, 0.0 }
 0x7a0   :  { %1551 = vmatmul.f32.gmra.mxu1 %v1505_v50 }
 0x7a3   :  { %v1500_v32 = vpop.f32.mrf.mxu0 }
 0x7a4   :  { %v1501_v43 = vadd.f32 %v2320_v28, %v1500_v32  ;;  %v1666_v28 = vld [vmem:[#allocation2 + $0x430] sm:$0xff] }
 0x7a6   :  { %v1506_v13 = vmax.f32 %v1501_v43, 0.0 }
 0x7a8   :  { %1554 = vmatmul.f32.gmra.mxu1 %v1506_v13 }
 0x80d   :  { %v1546_v56 = vpop.f32.mrf.mxu1 }
 0x80e   :  { %v1547_v46 = vadd.f32 %v2321_v59, %v1546_v56 }
 0x810   :  { %v1558_v15 = vmax.f32 %v1547_v46, 0.0  ;;  %v1860_v46 = vld [vmem:[#allocation5 + $0x478] sm:$0xff] }
 0x815   :  { %v1549_v21 = vpop.f32.mrf.mxu1 }
 0x816   :  { %v1550_v0 = vadd.f32 %v2321_v59, %v1549_v21 }
 0x818   :  { %v1559_v12 = vmax.f32 %v1550_v0, 0.0  ;;  %v1858_v0 = vld [vmem:[#allocation5 + $0x468] sm:$0xff] }
 0x81d   :  { %v1552_v53 = vpop.f32.mrf.mxu1 }
 0x81e   :  { %v1553_v61 = vadd.f32 %v2321_v59, %v1552_v53 }
 0x820   :  { %v1560_v9 = vmax.f32 %v1553_v61, 0.0 }
 0x825   :  { %v1555_v58 = vpop.f32.mrf.mxu1 }
 0x826   :  { %v1556_v2 = vadd.f32 %v2321_v59, %v1555_v58 }
 0x828   :  { %v1561_v4 = vmax.f32 %v1556_v2, 0.0 }
 0x82a   :  { %1574 = vmatpush.msrb.mxu2 %v1561_v4  ;;  %v1859_v4 = vld [vmem:[#allocation5 + $0x470] sm:$0xff] }
 0x82b   :  { %1911 = vmatpush.msra.mxu0 %v1859_v4 }
 0x82c   :  { %1575 = vmatpush.msrb.mxu2 %v1560_v9  ;;  %v1855_v9 = vld [vmem:[#allocation5 + $0x450] sm:$0xff] }
 0x82e   :  { %1576 = vmatpush.msrb.mxu2 %v1559_v12  ;;  %v1856_v12 = vld [vmem:[#allocation5 + $0x458] sm:$0xff] }
 0x82f   :  { %1912 = vmatpush.msra.mxu0 %v1856_v12 }
 0x830   :  { %1577 = vmatpush.msrb.mxu2 %v1558_v15  ;;  %v1857_v15 = vld [vmem:[#allocation5 + $0x460] sm:$0xff] }
 0x831   :  { %2275 = vmatmul.msk.f32.vlgmr.msrb.gmra.mxu2 %vm325_vm0, %v2656_v25  ;;  %v1643_v25 = vld [vmem:[#allocation2 + $0x378] sm:$0xff] }
 0x832   :  { %1681 = vmatpush.msra.mxu3 %v1643_v25  ;;  %v1852_v25 = vld [vmem:[#allocation5 + $0x438] sm:$0xff] }
 0x839   :  { %2276 = vmatmul.msk.f32.gmra.mxu2 %vm325_vm0, %v2662_v27  ;;  %v1642_v27 = vld [vmem:[#allocation2 + $0x370] sm:$0xff] }
 0x83a   :  { %1682 = vmatpush.msra.mxu3 %v1642_v27  ;;  %v1853_v27 = vld [vmem:[#allocation5 + $0x440] sm:$0xff] }
 0x83b   :  { %1913 = vmatpush.msra.mxu0 %v1853_v27 }
 0x841   :  { %2277 = vmatmul.msk.f32.gmra.mxu2 %vm325_vm0, %v2668_v29  ;;  %v1641_v29 = vld [vmem:[#allocation2 + $0x368] sm:$0xff] }
 0x842   :  { %1683 = vmatpush.msra.mxu3 %v1641_v29  ;;  %v1854_v29 = vld [vmem:[#allocation5 + $0x448] sm:$0xff] }
 0x849   :  { %2278 = vmatmul.msk.f32.gmra.mxu2 %vm325_vm0, %v2674_v31  ;;  %v1640_v31 = vld [vmem:[#allocation2 + $0x360] sm:$0xff] }
 0x84a   :  { %1684 = vmatpush.msra.mxu3 %v1640_v31  ;;  %v1849_v31 = vld [vmem:[#allocation5 + $0x420] sm:$0xff] }
 0x851   :  { %2279 = vmatmul.msk.f32.gmra.mxu2 %vm325_vm0, %v2680_v33  ;;  %v1639_v33 = vld [vmem:[#allocation2 + $0x358] sm:$0xff] }
 0x852   :  { %1685 = vmatpush.msra.mxu3 %v1639_v33  ;;  %v1850_v33 = vld [vmem:[#allocation5 + $0x428] sm:$0xff] }
 0x853   :  { %1914 = vmatpush.msra.mxu0 %v1850_v33 }
 0x859   :  { %2280 = vmatmul.msk.f32.gmra.mxu2 %vm325_vm0, %v2686_v35  ;;  %v1638_v35 = vld [vmem:[#allocation2 + $0x350] sm:$0xff] }
 0x85a   :  { %1686 = vmatpush.msra.mxu3 %v1638_v35  ;;  %v1851_v35 = vld [vmem:[#allocation5 + $0x430] sm:$0xff] }
 0x861   :  { %2281 = vmatmul.msk.f32.gmra.mxu2 %vm325_vm0, %v2692_v37  ;;  %v1637_v37 = vld [vmem:[#allocation2 + $0x348] sm:$0xff] }
 0x862   :  { %1687 = vmatpush.msra.mxu3 %v1637_v37  ;;  %v1846_v37 = vld [vmem:[#allocation5 + $0x408] sm:$0xff] }
 0x869   :  { %2282 = vmatmul.msk.f32.gmra.mxu2 %vm325_vm0, %v2698_v39  ;;  %v1636_v39 = vld [vmem:[#allocation2 + $0x340] sm:$0xff] }
 0x86a   :  { %1688 = vmatpush.msra.mxu3 %v1636_v39  ;;  %v1847_v39 = vld [vmem:[#allocation5 + $0x410] sm:$0xff] }
 0x86b   :  { %1915 = vmatpush.msra.mxu0 %v1847_v39 }
 0x871   :  { %2283 = vmatmul.msk.f32.gmra.mxu2 %vm325_vm0, %v2704_v45  ;;  %v1635_v45 = vld [vmem:[#allocation2 + $0x338] sm:$0xff] }
 0x872   :  { %1689 = vmatpush.msra.mxu3 %v1635_v45  ;;  %v1848_v45 = vld [vmem:[#allocation5 + $0x418] sm:$0xff] }
 0x874   :  { %1690 = vmatpush.msra.mxu3 %v1634_v20  ;;  %v1843_v20 = vld [vmem:[#allocation5 + $0x3f0] sm:$0xff] }
 0x879   :  { %2284 = vmatmul.msk.f32.gmra.mxu2 %vm325_vm0, %v2710_v55  ;;  %v1633_v55 = vld [vmem:[#allocation2 + $0x328] sm:$0xff] }
 0x87a   :  { %1691 = vmatpush.msra.mxu3 %v1633_v55  ;;  %v1844_v55 = vld [vmem:[#allocation5 + $0x3f8] sm:$0xff] }
 0x87b   :  { %1916 = vmatpush.msra.mxu0 %v1844_v55 }
 0x87c   :  { %1692 = vmatpush.msra.mxu3 %v1632_v54  ;;  %v1845_v54 = vld [vmem:[#allocation5 + $0x400] sm:$0xff] }
 0x87e   :  { %1693 = vmatpush.msra.mxu3 %v1631_v16  ;;  %v1840_v16 = vld [vmem:[#allocation5 + $0x3d8] sm:$0xff] }
 0x880   :  { %1694 = vmatpush.msra.mxu3 %v1630_v17  ;;  %v1841_v17 = vld [vmem:[#allocation5 + $0x3e0] sm:$0xff] }
 0x881   :  { %2285 = vmatmul.msk.f32.gmra.mxu2 %vm325_vm0, %v2716_v1  ;;  %v1628_v1 = vld [vmem:[#allocation2 + $0x300] sm:$0xff]  ;;  %1917 = vmatpush.msra.mxu0 %v1841_v17 }
 0x882   :  { %1695 = vmatpush.msra.mxu3 %v1629_v19  ;;  %v1842_v19 = vld [vmem:[#allocation5 + $0x3e8] sm:$0xff] }
 0x884   :  { %1696 = vmatpush.msra.mxu3 %v1628_v1  ;;  %v1837_v1 = vld [vmem:[#allocation5 + $0x3c0] sm:$0xff] }
 0x886   :  { %1870 = vmatpush.msrb.mxu3 %v1858_v0 }
 0x888   :  { %1871 = vmatpush.msrb.mxu3 %v1855_v9 }
 0x889   :  { %2286 = vmatmul.msk.f32.gmra.mxu2 %vm325_vm0, %v2722_v11 }
 0x88a   :  { %1872 = vmatpush.msrb.mxu3 %v1852_v25 }
 0x88c   :  { %1873 = vmatpush.msrb.mxu3 %v1849_v31 }
 0x88e   :  { %1874 = vmatpush.msrb.mxu3 %v1846_v37 }
 0x890   :  { %1875 = vmatpush.msrb.mxu3 %v1843_v20 }
 0x891   :  { %2287 = vmatmul.msk.f32.gmra.mxu2 %vm325_vm0, %v2731_v18  ;;  %v1672_v18 = vld [vmem:[#allocation2 + $0x460] sm:$0xff] }
 0x892   :  { %1766 = vmatpush.msra.mxu1 %v1672_v18  ;;  %1876 = vmatpush.msrb.mxu3 %v1840_v16  ;;  %v1836_v18 = vld [vmem:[#allocation5 + $0x3b8] sm:$0xff] }
 0x894   :  { %1767 = vmatpush.msra.mxu1 %v1671_v34  ;;  %1877 = vmatpush.msrb.mxu3 %v1837_v1  ;;  %v1832_v34 = vld [vmem:[#allocation5 + $0x398] sm:$0xff] }
 0x896   :  { %1878 = vmatpush.msrb.mxu3 %v1834_v10 }
 0x899   :  { %2288 = vmatmul.msk.f32.gmra.mxu2 %vm325_vm0, %v2740_v23  ;;  %v1670_v23 = vld [vmem:[#allocation2 + $0x450] sm:$0xff] }
 0x89a   :  { %1768 = vmatpush.msra.mxu1 %v1670_v23  ;;  %v1833_v23 = vld [vmem:[#allocation5 + $0x3a0] sm:$0xff] }
 0x89c   :  { %1769 = vmatpush.msra.mxu1 %v1669_v44  ;;  %v1828_v44 = vld [vmem:[#allocation5 + $0x378] sm:$0xff] }
 0x8a1   :  { %2289 = vmatmul.msk.f32.gmra.mxu2 %vm325_vm0, %v2749_v30  ;;  %v1668_v30 = vld [vmem:[#allocation2 + $0x440] sm:$0xff] }
 0x8a2   :  { %1770 = vmatpush.msra.mxu1 %v1668_v30  ;;  %v1829_v30 = vld [vmem:[#allocation5 + $0x380] sm:$0xff] }
 0x8a4   :  { %1771 = vmatpush.msra.mxu1 %v1667_v63  ;;  %v1825_v63 = vld [vmem:[#allocation5 + $0x360] sm:$0xff] }
 0x8a6   :  { %1772 = vmatpush.msra.mxu1 %v1666_v28  ;;  %v1826_v28 = vld [vmem:[#allocation5 + $0x368] sm:$0xff] }
 0x8a8   :  { %1773 = vmatpush.msra.mxu1 %v1665_v62  ;;  %v1827_v62 = vld [vmem:[#allocation5 + $0x370] sm:$0xff] }
 0x8a9   :  { %2290 = vmatmul.msk.f32.gmra.mxu2 %vm325_vm0, %v2758_v36 }
 0x8aa   :  { %1774 = vmatpush.msra.mxu1 %v1664_v38  ;;  %v1822_v38 = vld [vmem:[#allocation5 + $0x348] sm:$0xff] }
 0x8ac   :  { %1775 = vmatpush.msra.mxu1 %v1663_v40  ;;  %v1824_v40 = vld [vmem:[#allocation5 + $0x358] sm:$0xff] }
 0x8ae   :  { %1776 = vmatpush.msra.mxu1 %v1662_v41  ;;  %v1819_v41 = vld [vmem:[#allocation5 + $0x330] sm:$0xff] }
 0x8b0   :  { %1777 = vmatpush.msra.mxu1 %v1661_v42  ;;  %v1820_v42 = vld [vmem:[#allocation5 + $0x338] sm:$0xff] }
 0x8b2   :  { %1778 = vmatpush.msra.mxu1 %v1660_v3  ;;  %v1821_v3 = vld [vmem:[#allocation5 + $0x340] sm:$0xff] }
 0x8b4   :  { %v1579_v11 = vpop.f32.mrf.mxu2  ;;  %1952 = vmatpush.msrb.mxu1 %v1860_v46 }
 0x8b5   :  { %1697 = vmatmul.f32.vlgmr.msra.gmra.mxu3 %v1579_v11  ;;  %v1838_v11 = vld [vmem:[#allocation5 + $0x3c8] sm:$0xff] }
 0x8b6   :  { %1953 = vmatpush.msrb.mxu1 %v1857_v15  ;;  %1918 = vmatpush.msra.mxu0 %v1838_v11 }
 0x8b8   :  { %1954 = vmatpush.msrb.mxu1 %v1854_v29  ;;  %1919 = vmatpush.msra.mxu0 %v1835_v26 }
 0x8ba   :  { %1955 = vmatpush.msrb.mxu1 %v1851_v35  ;;  %1920 = vmatpush.msra.mxu0 %v1832_v34 }
 0x8bc   :  { %v1582_v8 = vpop.f32.mrf.mxu2  ;;  %1956 = vmatpush.msrb.mxu1 %v1848_v45  ;;  %1921 = vmatpush.msra.mxu0 %v1829_v30 }
 0x8bd   :  { %1700 = vmatmul.f32.gmra.mxu3 %v1582_v8  ;;  %v1831_v8 = vld [vmem:[#allocation5 + $0x390] sm:$0xff] }
 0x8be   :  { %1957 = vmatpush.msrb.mxu1 %v1845_v54  ;;  %1879 = vmatpush.msrb.mxu3 %v1831_v8 }
 0x8bf   :  { %1922 = vmatpush.msra.mxu0 %v1826_v28 }
 0x8c0   :  { %1958 = vmatpush.msrb.mxu1 %v1842_v19  ;;  %1880 = vmatpush.msrb.mxu3 %v1828_v44 }
 0x8c2   :  { %1959 = vmatpush.msrb.mxu1 %v1839_v7  ;;  %1881 = vmatpush.msrb.mxu3 %v1825_v63 }
 0x8c4   :  { %v1585_v36 = vpop.f32.mrf.mxu2  ;;  %1960 = vmatpush.msrb.mxu1 %v1836_v18  ;;  %1882 = vmatpush.msrb.mxu3 %v1822_v38 }
 0x8c5   :  { %1703 = vmatmul.f32.gmra.mxu3 %v1585_v36  ;;  %v1830_v36 = vld [vmem:[#allocation5 + $0x388] sm:$0xff] }
 0x8c6   :  { %1961 = vmatpush.msrb.mxu1 %v1833_v23  ;;  %1883 = vmatpush.msrb.mxu3 %v1819_v41 }
 0x8c8   :  { %1962 = vmatpush.msrb.mxu1 %v1830_v36 }
 0x8ca   :  { %1963 = vmatpush.msrb.mxu1 %v1827_v62 }
 0x8cc   :  { %v1588_v24 = vpop.f32.mrf.mxu2  ;;  %1964 = vmatpush.msrb.mxu1 %v1824_v40 }
 0x8cd   :  { %1706 = vmatmul.f32.gmra.mxu3 %v1588_v24  ;;  %v1823_v24 = vld [vmem:[#allocation5 + $0x350] sm:$0xff] }
 0x8ce   :  { %1923 = vmatpush.msra.mxu0 %v1823_v24  ;;  %1965 = vmatpush.msrb.mxu1 %v1821_v3 }
 0x8d0   :  { %1924 = vmatpush.msra.mxu0 %v1820_v42 }
 0x8d4   :  { %v1591_v48 = vpop.f32.mrf.mxu2 }
 0x8d5   :  { %1709 = vmatmul.f32.gmra.mxu3 %v1591_v48  ;;  %v1816_v48 = vld [vmem:[#allocation5 + $0x318] sm:$0xff] }
 0x8d6   :  { %1884 = vmatpush.msrb.mxu3 %v1816_v48 }
 0x8dc   :  { %v1594_v50 = vpop.f32.mrf.mxu2 }
 0x8dd   :  { %1712 = vmatmul.f32.gmra.mxu3 %v1594_v50  ;;  %v1817_v50 = vld [vmem:[#allocation5 + $0x320] sm:$0xff] }
 0x8de   :  { %1925 = vmatpush.msra.mxu0 %v1817_v50 }
 0x8e4   :  { %v1597_v32 = vpop.f32.mrf.mxu2 }
 0x8e5   :  { %1715 = vmatmul.f32.gmra.mxu3 %v1597_v32  ;;  %v1818_v32 = vld [vmem:[#allocation5 + $0x328] sm:$0xff] }
 0x8e6   :  { %1966 = vmatpush.msrb.mxu1 %v1818_v32 }
 0x8ec   :  { %v1600_v43 = vpop.f32.mrf.mxu2 }
 0x8ed   :  { %1718 = vmatmul.f32.gmra.mxu3 %v1600_v43  ;;  %v1813_v43 = vld [vmem:[#allocation5 + $0x300] sm:$0xff] }
 0x8ee   :  { %1885 = vmatpush.msrb.mxu3 %v1813_v43 }
 0x8f4   :  { %v1603_v13 = vpop.f32.mrf.mxu2 }
 0x8f5   :  { %1779 = vmatmul.f32.vlgmr.msra.gmra.mxu1 %v1603_v13  ;;  %v1814_v13 = vld [vmem:[#allocation5 + $0x308] sm:$0xff] }
 0x8f6   :  { %1926 = vmatpush.msra.mxu0 %v1814_v13 }
 0x8fc   :  { %v1606_v56 = vpop.f32.mrf.mxu2 }
 0x8fd   :  { %1782 = vmatmul.f32.gmra.mxu1 %v1606_v56  ;;  %v1815_v56 = vld [vmem:[#allocation5 + $0x310] sm:$0xff] }
 0x8fe   :  { %1967 = vmatpush.msrb.mxu1 %v1815_v56 }
 0x904   :  { %v1609_v21 = vpop.f32.mrf.mxu2 }
 0x905   :  { %1785 = vmatmul.f32.gmra.mxu1 %v1609_v21 }
 0x90c   :  { %v1612_v53 = vpop.f32.mrf.mxu2 }
 0x90d   :  { %1788 = vmatmul.f32.gmra.mxu1 %v1612_v53  ;;  %v1739_v53 = vpop.f32.mrf.mxu0 }
 0x914   :  { %v1615_v59 = vpop.f32.mrf.mxu2 }
 0x915   :  { %1791 = vmatmul.f32.gmra.mxu1 %v1615_v59 }
 0x91c   :  { %v1618_v58 = vpop.f32.mrf.mxu2 }
 0x91d   :  { %1794 = vmatmul.f32.gmra.mxu1 %v1618_v58  ;;  %v3020_v58 = vld [vmem:[%s3093_s5 + $0x2] ss:$0 sm:$0xff] }
 0x924   :  { %v1621_v61 = vpop.f32.mrf.mxu2 }
 0x925   :  { %1797 = vmatmul.f32.gmra.mxu1 %v1621_v61  ;;  %v1742_v61 = vpop.f32.mrf.mxu0 }
 0x92c   :  { %v1624_v2 = vpop.f32.mrf.mxu2 }
 0x92d   :  { %1800 = vmatmul.f32.gmra.mxu1 %v1624_v2  ;;  %v1745_v25 = vpop.f32.mrf.mxu0 }
 0x935   :  { %v1748_v39 = vpop.f32.mrf.mxu0 }
 0x938   :  { %v1698_v21 = vpop.f32.mrf.mxu3 }
 0x939   :  { %v1699_v2 = vadd.f32 %v3020_v58, %v1698_v21 }
 0x93b   :  { %v1740_v4 = vadd.f32 %v1739_v53, %v1699_v2 }
 0x93d   :  { %v1751_v1 = vpop.f32.mrf.mxu0 }
 0x940   :  { %v1701_v59 = vpop.f32.mrf.mxu3 }
 0x941   :  { %v1702_v12 = vadd.f32 %v3020_v58, %v1701_v59 }
 0x943   :  { %v1743_v27 = vadd.f32 %v1742_v61, %v1702_v12  ;;  %v3033_v61 = vld [vmem:[%s3095_s7 + $0x6] sm:$0x7] }
 0x944   :  { %v1865_v2 = vperm.slane %v3033_v61, 1 }
 0x945   :  { %v1754_v44 = vpop.f32.mrf.mxu0 }
 0x948   :  { %v1704_v0 = vpop.f32.mrf.mxu3 }
 0x949   :  { %v1705_v35 = vadd.f32 %v3020_v58, %v1704_v0 }
 0x94b   :  { %v1746_v45 = vadd.f32 %v1745_v25, %v1705_v35 }
 0x94d   :  { %v1757_v41 = vpop.f32.mrf.mxu0 }
 0x950   :  { %v1707_v29 = vpop.f32.mrf.mxu3 }
 0x951   :  { %v1708_v16 = vadd.f32 %v3020_v58, %v1707_v29 }
 0x953   :  { %v1749_v19 = vadd.f32 %v1748_v39, %v1708_v16 }
 0x955   :  { %v1760_v13 = vpop.f32.mrf.mxu0 }
 0x958   :  { %v1710_v54 = vpop.f32.mrf.mxu3 }
 0x959   :  { %v1711_v10 = vadd.f32 %v3020_v58, %v1710_v54 }
 0x95b   :  { %v1752_v8 = vadd.f32 %v1751_v1, %v1711_v10 }
 0x960   :  { %v1713_v18 = vpop.f32.mrf.mxu3 }
 0x961   :  { %v1714_v30 = vadd.f32 %v3020_v58, %v1713_v18 }
 0x963   :  { %v1755_v28 = vadd.f32 %v1754_v44, %v1714_v30 }
 0x968   :  { %v1716_v63 = vpop.f32.mrf.mxu3 }
 0x969   :  { %v1717_v24 = vadd.f32 %v3020_v58, %v1716_v63  ;;  %v1866_v63 = vperm.slane %v3033_v61, 2 }
 0x96b   :  { %v1758_v42 = vadd.f32 %v1757_v41, %v1717_v24 }
 0x970   :  { %v1719_v3 = vpop.f32.mrf.mxu3 }
 0x971   :  { %v1720_v32 = vadd.f32 %v3020_v58, %v1719_v3 }
 0x972   :  { %v1780_v46 = vpop.f32.mrf.mxu1 }
 0x973   :  { %v1781_v9 = vadd.f32 %v1780_v46, %v1740_v4  ;;  %v1761_v56 = vadd.f32 %v1760_v13, %v1720_v32 }
 0x975   :  { %v1804_v15 = vmax.f32 %v1781_v9, 0.0 }
 0x977   :  { %1886 = vmatmul.f32.vlgmr.msrb.gmra.mxu3 %v1804_v15  ;;  %1927 = vmatmul.f32.vlgmr.msra.gmra.mxu0 %v1804_v15 }
 0x978   :  { %1968 = vmatmul.f32.vlgmr.msrb.gmra.mxu1 %v1804_v15 }
 0x97a   :  { %v1783_v31 = vpop.f32.mrf.mxu1 }
 0x97b   :  { %v1784_v33 = vadd.f32 %v1783_v31, %v1743_v27 }
 0x97d   :  { %v1805_v37 = vmax.f32 %v1784_v33, 0.0 }
 0x97f   :  { %1889 = vmatmul.f32.gmra.mxu3 %v1805_v37  ;;  %1930 = vmatmul.f32.gmra.mxu0 %v1805_v37 }
 0x980   :  { %1971 = vmatmul.f32.gmra.mxu1 %v1805_v37 }
 0x982   :  { %v1786_v20 = vpop.f32.mrf.mxu1 }
 0x983   :  { %v1787_v55 = vadd.f32 %v1786_v20, %v1746_v45 }
 0x985   :  { %v1806_v17 = vmax.f32 %v1787_v55, 0.0 }
 0x987   :  { %1892 = vmatmul.f32.gmra.mxu3 %v1806_v17  ;;  %1933 = vmatmul.f32.gmra.mxu0 %v1806_v17 }
 0x988   :  { %1974 = vmatmul.f32.gmra.mxu1 %v1806_v17 }
 0x98a   :  { %v1789_v11 = vpop.f32.mrf.mxu1 }
 0x98b   :  { %v1790_v7 = vadd.f32 %v1789_v11, %v1749_v19 }
 0x98d   :  { %v1807_v26 = vmax.f32 %v1790_v7, 0.0 }
 0x98f   :  { %1895 = vmatmul.f32.gmra.mxu3 %v1807_v26  ;;  %1936 = vmatmul.f32.gmra.mxu0 %v1807_v26 }
 0x990   :  { %1977 = vmatmul.f32.gmra.mxu1 %v1807_v26 }
 0x992   :  { %v1792_v34 = vpop.f32.mrf.mxu1 }
 0x993   :  { %v1793_v23 = vadd.f32 %v1792_v34, %v1752_v8 }
 0x995   :  { %v1808_v36 = vmax.f32 %v1793_v23, 0.0 }
 0x997   :  { %1898 = vmatmul.f32.gmra.mxu3 %v1808_v36  ;;  %1939 = vmatmul.f32.gmra.mxu0 %v1808_v36 }
 0x998   :  { %1980 = vmatmul.f32.gmra.mxu1 %v1808_v36 }
 0x99a   :  { %v1795_v62 = vpop.f32.mrf.mxu1 }
 0x99b   :  { %v1796_v38 = vadd.f32 %v1795_v62, %v1755_v28 }
 0x99d   :  { %v1809_v40 = vmax.f32 %v1796_v38, 0.0 }
 0x99f   :  { %1901 = vmatmul.f32.gmra.mxu3 %v1809_v40  ;;  %1942 = vmatmul.f32.gmra.mxu0 %v1809_v40 }
 0x9a0   :  { %1983 = vmatmul.f32.gmra.mxu1 %v1809_v40 }
 0x9a2   :  { %v1798_v48 = vpop.f32.mrf.mxu1 }
 0x9a3   :  { %v1799_v50 = vadd.f32 %v1798_v48, %v1758_v42 }
 0x9a5   :  { %v1810_v43 = vmax.f32 %v1799_v50, 0.0 }
 0x9a7   :  { %1904 = vmatmul.f32.gmra.mxu3 %v1810_v43  ;;  %1945 = vmatmul.f32.gmra.mxu0 %v1810_v43 }
 0x9a8   :  { %1986 = vmatmul.f32.gmra.mxu1 %v1810_v43 }
 0x9aa   :  { %v1801_v21 = vpop.f32.mrf.mxu1 }
 0x9ab   :  { %v1802_v53 = vadd.f32 %v1801_v21, %v1761_v56 }
 0x9ad   :  { %v1811_v59 = vmax.f32 %v1802_v53, 0.0 }
 0x9af   :  { %1907 = vmatmul.f32.gmra.mxu3 %v1811_v59  ;;  %1948 = vmatmul.f32.gmra.mxu0 %v1811_v59 }
 0x9b0   :  { %1989 = vmatmul.f32.gmra.mxu1 %v1811_v59 }
 0x9f4   :  { %v1928_v58 = vpop.f32.mrf.mxu0 }
 0x9f5   :  { %v1929_v0 = vadd.f32 %v1928_v58, %v1865_v2  ;;  %v3036_v4 = vpop.f32.mrf.mxu1 }
 0x9f6   :  { %v1970_v58 = vadd.f32 %v3036_v4, %v1866_v63 }
 0x9f7   :  { %v1994_v46 = vmax.f32 %v1929_v0, 0.0  ;;  %v1864_v0 = vperm.slane %v3033_v61, 0 }
 0x9f9   :  { %2164 = vst [vmem:[#allocation11] sm:$0xff] %v1994_v46 }
 0x9fa   :  { %v3038_v9 = vpop.f32.mrf.mxu3 }
 0x9fc   :  { %v1931_v12 = vpop.f32.mrf.mxu0 }
 0x9fd   :  { %v1932_v15 = vadd.f32 %v1931_v12, %v1865_v2  ;;  %v1972_v25 = vpop.f32.mrf.mxu1 }
 0x9fe   :  { %v1973_v53 = vadd.f32 %v1972_v25, %v1866_v63 }
 0x9ff   :  { %v1997_v27 = vmax.f32 %v1932_v15, 0.0 }
 0xa00   :  { %v1998_v12 = vmax.f32 %v1973_v53, 0.0  ;;  %v2107_v53 = vld [vmem:[#allocation8 + $0x108] sm:$0xff] }
 0xa01   :  { %2165 = vst [vmem:[#allocation11 + $0x8] sm:$0xff] %v1997_v27  ;;  %v1995_v27 = vmax.f32 %v1970_v58, 0.0 }
 0xa02   :  { %v3040_v29 = vpop.f32.mrf.mxu3 }
 0xa04   :  { %v1934_v31 = vpop.f32.mrf.mxu0 }
 0xa05   :  { %v1935_v33 = vadd.f32 %v1934_v31, %v1865_v2  ;;  %v1975_v35 = vpop.f32.mrf.mxu1 }
 0xa06   :  { %v1976_v56 = vadd.f32 %v1975_v35, %v1866_v63 }
 0xa07   :  { %v2000_v37 = vmax.f32 %v1935_v33, 0.0 }
 0xa08   :  { %v2001_v46 = vmax.f32 %v1976_v56, 0.0 }
 0xa09   :  { %2166 = vst [vmem:[#allocation11 + $0x10] sm:$0xff] %v2000_v37 }
 0xa0a   :  { %v3042_v39 = vpop.f32.mrf.mxu3 }
 0xa0b   :  { %v1894_v4 = vadd.f32 %v3042_v39, %v1864_v0  ;;  %v2062_v39 = vld [vmem:[#allocation7 + $0x158] sm:$0xff] }
 0xa0c   :  { %v1937_v45 = vpop.f32.mrf.mxu0 }
 0xa0d   :  { %v1938_v20 = vadd.f32 %v1937_v45, %v1865_v2  ;;  %v1978_v55 = vpop.f32.mrf.mxu1 }
 0xa0e   :  { %v1979_v43 = vadd.f32 %v1978_v55, %v1866_v63  ;;  %v1891_v55 = vadd.f32 %v3040_v29, %v1864_v0  ;;  %v2060_v29 = vld [vmem:[#allocation7 + $0x148] sm:$0xff] }
 0xa0f   :  { %v2003_v54 = vmax.f32 %v1938_v20, 0.0 }
 0xa10   :  { %v2004_v59 = vmax.f32 %v1979_v43, 0.0 }
 0xa11   :  { %2167 = vst [vmem:[#allocation11 + $0x18] sm:$0xff] %v2003_v54 }
 0xa12   :  { %v1896_v16 = vpop.f32.mrf.mxu3 }
 0xa13   :  { %v1897_v45 = vadd.f32 %v1896_v16, %v1864_v0  ;;  %v2063_v16 = vld [vmem:[#allocation7 + $0x160] sm:$0xff] }
 0xa14   :  { %v1940_v17 = vpop.f32.mrf.mxu0 }
 0xa15   :  { %v1941_v19 = vadd.f32 %v1940_v17, %v1865_v2  ;;  %v1981_v1 = vpop.f32.mrf.mxu1  ;;  %v2002_v54 = vmax.f32 %v1897_v45, 0.0  ;;  %v2066_v17 = vld [vmem:[#allocation7 + $0x178] sm:$0xff] }
 0xa16   :  { %v1982_v50 = vadd.f32 %v1981_v1, %v1866_v63  ;;  %v1888_v1 = vadd.f32 %v3038_v9, %v1864_v0  ;;  %2072 = vmatpush.msra.mxu3 %v2066_v17  ;;  %v2061_v9 = vld [vmem:[#allocation7 + $0x150] sm:$0xff] }
 0xa17   :  { %v2006_v11 = vmax.f32 %v1941_v19, 0.0  ;;  %v2065_v19 = vld [vmem:[#allocation7 + $0x170] sm:$0xff] }
 0xa18   :  { %v2007_v21 = vmax.f32 %v1982_v50, 0.0  ;;  %2073 = vmatpush.msra.mxu3 %v2065_v19  ;;  %v2111_v50 = vld [vmem:[#allocation8 + $0x128] sm:$0xff] }
 0xa19   :  { %2168 = vst [vmem:[#allocation11 + $0x20] sm:$0xff] %v2006_v11  ;;  %v1999_v11 = vmax.f32 %v1894_v4, 0.0 }
 0xa1a   :  { %v1899_v7 = vpop.f32.mrf.mxu3 }
 0xa1b   :  { %v1900_v37 = vadd.f32 %v1899_v7, %v1864_v0  ;;  %v2064_v7 = vld [vmem:[#allocation7 + $0x168] sm:$0xff] }
 0xa1c   :  { %v1943_v10 = vpop.f32.mrf.mxu0  ;;  %2074 = vmatpush.msra.mxu3 %v2064_v7 }
 0xa1d   :  { %v1944_v26 = vadd.f32 %v1943_v10, %v1865_v2  ;;  %v1984_v18 = vpop.f32.mrf.mxu1  ;;  %v2005_v61 = vmax.f32 %v1900_v37, 0.0  ;;  %v1996_v10 = vmax.f32 %v1891_v55, 0.0 }
 0xa1e   :  { %v1985_v3 = vadd.f32 %v1984_v18, %v1866_v63  ;;  %2075 = vmatpush.msra.mxu3 %v2063_v16  ;;  %v2059_v18 = vld [vmem:[#allocation7 + $0x140] sm:$0xff] }
 0xa1f   :  { %v2009_v8 = vmax.f32 %v1944_v26, 0.0  ;;  %v1993_v26 = vmax.f32 %v1888_v1, 0.0 }
 0xa20   :  { %v2010_v13 = vmax.f32 %v1985_v3, 0.0  ;;  %2076 = vmatpush.msra.mxu3 %v2062_v39  ;;  %v2113_v3 = vld [vmem:[#allocation8 + $0x138] sm:$0xff] }
 0xa21   :  { %2169 = vst [vmem:[#allocation11 + $0x28] sm:$0xff] %v2009_v8  ;;  %v2058_v8 = vld [vmem:[#allocation7 + $0x138] sm:$0xff] }
 0xa22   :  { %v1902_v23 = vpop.f32.mrf.mxu3  ;;  %2077 = vmatpush.msra.mxu3 %v2061_v9 }
 0xa23   :  { %v1903_v33 = vadd.f32 %v1902_v23, %v1864_v0  ;;  %v2056_v23 = vld [vmem:[#allocation7 + $0x128] sm:$0xff] }
 0xa24   :  { %v1946_v34 = vpop.f32.mrf.mxu0  ;;  %2078 = vmatpush.msra.mxu3 %v2060_v29 }
 0xa25   :  { %v1947_v44 = vadd.f32 %v1946_v34, %v1865_v2  ;;  %v1987_v30 = vpop.f32.mrf.mxu1  ;;  %v2008_v20 = vmax.f32 %v1903_v33, 0.0  ;;  %v2057_v34 = vld [vmem:[#allocation7 + $0x130] sm:$0xff] }
 0xa26   :  { %v1988_v24 = vadd.f32 %v1987_v30, %v1866_v63  ;;  %2079 = vmatpush.msra.mxu3 %v2059_v18  ;;  %v2053_v30 = vld [vmem:[#allocation7 + $0x110] sm:$0xff] }
 0xa27   :  { %v2012_v36 = vmax.f32 %v1947_v44, 0.0  ;;  %v2055_v44 = vld [vmem:[#allocation7 + $0x120] sm:$0xff] }
 0xa28   :  { %v2013_v32 = vmax.f32 %v1988_v24, 0.0  ;;  %2080 = vmatpush.msra.mxu3 %v2058_v8 }
 0xa29   :  { %2170 = vst [vmem:[#allocation11 + $0x30] sm:$0xff] %v2012_v36  ;;  %v2051_v36 = vld [vmem:[#allocation7 + $0x100] sm:$0xff] }
 0xa2a   :  { %v1905_v41 = vpop.f32.mrf.mxu3  ;;  %2081 = vmatpush.msra.mxu3 %v2057_v34 }
 0xa2b   :  { %v1906_v31 = vadd.f32 %v1905_v41, %v1864_v0  ;;  %v2116_v41 = vld [vmem:[#allocation8 + $0x150] sm:$0xff] }
 0xa2c   :  { %v1949_v28 = vpop.f32.mrf.mxu0  ;;  %2082 = vmatpush.msra.mxu3 %v2056_v23 }
 0xa2d   :  { %v1950_v62 = vadd.f32 %v1949_v28, %v1865_v2  ;;  %v1990_v38 = vpop.f32.mrf.mxu1  ;;  %v2011_v25 = vmax.f32 %v1906_v31, 0.0  ;;  %v2120_v28 = vld [vmem:[#allocation8 + $0x170] sm:$0xff] }
 0xa2e   :  { %v1991_v40 = vadd.f32 %v1990_v38, %v1866_v63  ;;  %2083 = vmatpush.msra.mxu3 %v2055_v44  ;;  %v2121_v63 = vld [vmem:[#allocation8 + $0x178] sm:$0xff]  ;;  %v2118_v38 = vld [vmem:[#allocation8 + $0x160] sm:$0xff] }
 0xa2f   :  { %v2015_v42 = vmax.f32 %v1950_v62, 0.0  ;;  %2127 = vmatpush.msrb.mxu0 %v2121_v63  ;;  %v2119_v62 = vld [vmem:[#allocation8 + $0x168] sm:$0xff] }
 0xa30   :  { %v2016_v48 = vmax.f32 %v1991_v40, 0.0  ;;  %2084 = vmatpush.msra.mxu3 %v2054_v51  ;;  %v2117_v40 = vld [vmem:[#allocation8 + $0x158] sm:$0xff] }
 0xa31   :  { %2171 = vst [vmem:[#allocation11 + $0x38] sm:$0xff] %v2015_v42  ;;  %2128 = vmatpush.msrb.mxu0 %v2120_v28 }
 0xa32   :  { %2017 = vmatpush.msra.mxu2 %v2016_v48  ;;  %v1908_v2 = vpop.f32.mrf.mxu3  ;;  %2085 = vmatpush.msra.mxu3 %v2053_v30  ;;  %v2112_v48 = vld [vmem:[#allocation8 + $0x130] sm:$0xff]  ;;  %2197 = dma.vmem_to_hbm [thread:$0]  %s2190_s3, 1024, %s2192_s28, [#allocation12], %s2491_s20, %s2491_s20, %s2492_s21  }
 0xa33   :  { %v1909_v15 = vadd.f32 %v1908_v2, %v1864_v0  ;;  %2129 = vmatpush.msrb.mxu0 %v2119_v62  ;;  %v2323_v2 = vld [vmem:[%s3097_s9 + $0x2] ss:$0 sm:$0xff] }
 0xa34   :  { %2018 = vmatpush.msra.mxu2 %v2013_v32  ;;  %2086 = vmatpush.msra.mxu3 %v2052_v57 }
 0xa35   :  { %v2014_v35 = vmax.f32 %v1909_v15, 0.0  ;;  %2130 = vmatpush.msrb.mxu0 %v2118_v38 }
 0xa36   :  { %2019 = vmatpush.msra.mxu2 %v2010_v13  ;;  %2087 = vmatpush.msra.mxu3 %v2051_v36  ;;  %v2109_v13 = vld [vmem:[#allocation8 + $0x118] sm:$0xff] }
 0xa37   :  { %2131 = vmatpush.msrb.mxu0 %v2117_v40 }
 0xa38   :  { %2020 = vmatpush.msra.mxu2 %v2007_v21 }
 0xa39   :  { %2132 = vmatpush.msrb.mxu0 %v2116_v41 }
 0xa3a   :  { %2021 = vmatpush.msra.mxu2 %v2004_v59  ;;  %v2106_v59 = vld [vmem:[#allocation8 + $0x100] sm:$0xff] }
 0xa3b   :  { %2133 = vmatpush.msrb.mxu0 %v2115_v52 }
 0xa3c   :  { %2022 = vmatpush.msra.mxu2 %v2001_v46 }
 0xa3d   :  { %2134 = vmatpush.msrb.mxu0 %v2114_v5 }
 0xa3e   :  { %2023 = vmatpush.msra.mxu2 %v1998_v12 }
 0xa3f   :  { %2135 = vmatpush.msrb.mxu0 %v2113_v3 }
 0xa40   :  { %2024 = vmatpush.msra.mxu2 %v1995_v27 }
 0xa41   :  { %2136 = vmatpush.msrb.mxu0 %v2112_v48 }
 0xa42   :  { %2025 = vmatpush.msra.mxu2 %v2014_v35 }
 0xa43   :  { %2137 = vmatpush.msrb.mxu0 %v2111_v50 }
 0xa44   :  { %2026 = vmatpush.msra.mxu2 %v2011_v25  ;;  %v2324_v25 = vld [vmem:[%s3099_s11 + $0x2] ss:$0 sm:$0xff] }
 0xa46   :  { %2027 = vmatpush.msra.mxu2 %v2008_v20 }
 0xa48   :  { %2028 = vmatpush.msra.mxu2 %v2005_v61 }
 0xa4a   :  { %2029 = vmatpush.msra.mxu2 %v2002_v54 }
 0xa4c   :  { %2030 = vmatpush.msra.mxu2 %v1999_v11 }
 0xa4e   :  { %2031 = vmatpush.msra.mxu2 %v1996_v10 }
 0xa50   :  { %2032 = vmatpush.msra.mxu2 %v1993_v26 }
 0xa51   :  { %2293 = vmatmul.msk.f32.vlgmr.msra.gmra.mxu2 %vm229_vm2, %v2497_v49 }
 0xa59   :  { %2294 = vmatmul.msk.f32.gmra.mxu2 %vm230_vm3, %v2497_v49 }
 0xa61   :  { %2295 = vmatmul.msk.f32.gmra.mxu2 %vm231_vm4, %v2497_v49 }
 0xa69   :  { %2296 = vmatmul.msk.f32.gmra.mxu2 %vm232_vm5, %v2497_v49 }
 0xad4   :  { %v2034_v60 = vpop.f32.mrf.mxu2 }
 0xad5   :  { %v2046_v24 = vmul.f32 %v2034_v60, %v2878_v14  ;;  %v2110_v14 = vld [vmem:[#allocation8 + $0x120] sm:$0xff] }
 0xad6   :  { %2138 = vmatpush.msrb.mxu0 %v2110_v14 }
 0xad7   :  { %2088 = vmatmul.f32.vlgmr.msra.gmra.mxu3 %v2046_v24 }
 0xad8   :  { %2139 = vmatpush.msrb.mxu0 %v2109_v13 }
 0xadc   :  { %v2037_v49 = vpop.f32.mrf.mxu2 }
 0xadd   :  { %v2047_v42 = vmul.f32 %v2037_v49, %v2885_v47  ;;  %v2108_v47 = vld [vmem:[#allocation8 + $0x110] sm:$0xff] }
 0xade   :  { %2140 = vmatpush.msrb.mxu0 %v2108_v47 }
 0xadf   :  { %2091 = vmatmul.f32.gmra.mxu3 %v2047_v42 }
 0xae0   :  { %2141 = vmatpush.msrb.mxu0 %v2107_v53 }
 0xae2   :  { %2142 = vmatpush.msrb.mxu0 %v2106_v59 }
 0xae4   :  { %v2040_v32 = vpop.f32.mrf.mxu2 }
 0xae5   :  { %v2048_v43 = vmul.f32 %v2040_v32, %v2891_v22 }
 0xae7   :  { %2094 = vmatmul.f32.gmra.mxu3 %v2048_v43 }
 0xaec   :  { %v2043_v56 = vpop.f32.mrf.mxu2 }
 0xaed   :  { %v2049_v21 = vmul.f32 %v2043_v56, %v2896_v6 }
 0xaef   :  { %2097 = vmatmul.f32.gmra.mxu3 %v2049_v21 }
 0xb5a   :  { %v2089_v58 = vpop.f32.mrf.mxu3 }
 0xb5b   :  { %v2090_v22 = vadd.f32 %v2323_v2, %v2089_v58 }
 0xb5d   :  { %v2101_v0 = vmax.f32 %v2090_v22, 0.0 }
 0xb5f   :  { %2143 = vmatmul.f32.vlgmr.msrb.gmra.mxu0 %v2101_v0 }
 0xb62   :  { %v2092_v46 = vpop.f32.mrf.mxu3 }
 0xb63   :  { %v2093_v12 = vadd.f32 %v2323_v2, %v2092_v46 }
 0xb65   :  { %v2102_v15 = vmax.f32 %v2093_v12, 0.0 }
 0xb67   :  { %2146 = vmatmul.f32.gmra.mxu0 %v2102_v15 }
 0xb6a   :  { %v2095_v6 = vpop.f32.mrf.mxu3 }
 0xb6b   :  { %v2096_v27 = vadd.f32 %v2323_v2, %v2095_v6 }
 0xb6d   :  { %v2103_v31 = vmax.f32 %v2096_v27, 0.0 }
 0xb6f   :  { %2149 = vmatmul.f32.gmra.mxu0 %v2103_v31 }
 0xb72   :  { %v2098_v33 = vpop.f32.mrf.mxu3 }
 0xb73   :  { %v2099_v35 = vadd.f32 %v2323_v2, %v2098_v33 }
 0xb75   :  { %v2104_v37 = vmax.f32 %v2099_v35, 0.0 }
 0xb77   :  { %2152 = vmatmul.f32.gmra.mxu0 %v2104_v37 }
 0xbdc   :  { %v2144_v45 = vpop.f32.mrf.mxu0 }
 0xbdd   :  { %v2145_v20 = vadd.f32 %v2324_v25, %v2144_v45 }
 0xbdf   :  { %v2156_v4 = vmax.f32 %v2145_v20, 0.0 }
 0xbe1   :  { %2160 = vst [vmem:[#allocation10] sm:$0xff] %v2156_v4 }
 0xbe4   :  { %v2147_v61 = vpop.f32.mrf.mxu0 }
 0xbe5   :  { %v2148_v55 = vadd.f32 %v2324_v25, %v2147_v61 }
 0xbe7   :  { %v2157_v54 = vmax.f32 %v2148_v55, 0.0 }
 0xbe9   :  { %2161 = vst [vmem:[#allocation10 + $0x8] sm:$0xff] %v2157_v54 }
 0xbec   :  { %v2150_v17 = vpop.f32.mrf.mxu0 }
 0xbed   :  { %v2151_v19 = vadd.f32 %v2324_v25, %v2150_v17 }
 0xbef   :  { %v2158_v1 = vmax.f32 %v2151_v19, 0.0 }
 0xbf1   :  { %2162 = vst [vmem:[#allocation10 + $0x10] sm:$0xff] %v2158_v1 }
 0xbf4   :  { %v2153_v11 = vpop.f32.mrf.mxu0 }
 0xbf5   :  { %v2154_v7 = vadd.f32 %v2324_v25, %v2153_v11 }
 0xbf7   :  { %v2159_v10 = vmax.f32 %v2154_v7, 0.0 }
 0xbf9   :  { %2163 = vst [vmem:[#allocation10 + $0x18] sm:$0xff] %v2159_v10 }
 0xbfa   :  { %2184 = dma.vmem_to_hbm [thread:$0]  %s2177_s8, 512, %s2179_s2, [#allocation4], %s2491_s20, %s2491_s20, %s2492_s21  }
 0xbfb   :  { %2483 = dma.done.wait [#allocation4], 512  }
 0xbfc   :  { %2484 = vsyncadd [#allocation4], 4294966784 }
 0xbfd   :  { %2485 = dma.done.wait [#allocation12], 1024  }
 0xbfe   :  { %2486 = vsyncadd [#allocation12], 4294966272 }
 0xbff   :  { %2206 = vsyncpa [#allocation3], 1 }
 0xc00   :  { %2207 = vsyncpa [#allocation6], 1 }
 0xc01   :  { %2208 = vsyncpa [#allocation9], 1 }
 0xc02   :  { %2209 = vsyncpa [#allocation4], 1 }
 0xc03   :  { %2210 = vsyncpa [#allocation12], 1 }

</bundles_post_ra>
